<compile_context>
chip_gen: v6e
topology: v6e:2x2x1
jax: 0.10.0
libtpu: 0.0.40
codegen_flags: <defaults>
</compile_context>

<pallas_src>
import math

import jax
import jax.numpy as jnp
from jax.experimental import pallas as pl
from jax.experimental.pallas import tpu as pltpu

# Hyper-parameters implied by the module / nn.TransformerEncoderLayer defaults.
D_IN = 40
K_PAD = 128                       # lane-padded input feature dim
D_MODEL = 256
N_HEAD = 8
HEAD_DIM = D_MODEL // N_HEAD
D_FF = 2048                       # TransformerEncoderLayer default dim_feedforward
N_LAYERS = 4
N_OUT = 30
N_OUT_PAD = 128                   # lane-padded classifier output dim
LN_EPS = 1e-5
ATTN_SCALE = 1.0 / math.sqrt(HEAD_DIM)
NEG_INF = -1e30


def _mm_t(x, w):
    """x @ w.T with f32 accumulation; x is cast to w's dtype (bf16 for weights)."""
    return jax.lax.dot_general(
        x.astype(w.dtype), w, (((1,), (1,)), ((), ())),
        preferred_element_type=jnp.float32)


def _layer_norm(x, gamma, beta):
    mu = jnp.mean(x, axis=-1, keepdims=True)
    xc = x - mu
    var = jnp.mean(xc * xc, axis=-1, keepdims=True)
    return xc * jax.lax.rsqrt(var + LN_EPS) * gamma + beta


# ------------------------------------------------------------------- kernel --

def fused_kernel(tok_ref, fcfw_ref, fcfb_ref, bias_ref, pool_ref,
                 inw_ref, inb_ref, ow_ref, ob_ref,
                 ln1w_ref, ln1b_ref, l1w_ref, l1b_ref, l2w_ref, l2b_ref,
                 ln2w_ref, ln2b_ref, fcw_ref, fcb_ref,
                 o_ref, h_ref, attn_ref):
    """One grid step = one encoder layer; front linear on step 0, pool+FC on last."""
    layer = pl.program_id(0)

    # ---- front linear (only once) ----
    @pl.when(layer == 0)
    def _():
        h_ref[...] = _mm_t(tok_ref[...], fcfw_ref[...]) + fcfb_ref[...]

    h = h_ref[...]                                            # (B*S, D) f32

    # ---- multi-head self-attention over flattened tokens -------------------
    qkv = _mm_t(h, inw_ref[...]) + inb_ref[...]               # (B*S, 3D) f32
    q = qkv[:, 0:D_MODEL] * ATTN_SCALE
    k = qkv[:, D_MODEL:2 * D_MODEL]
    v = qkv[:, 2 * D_MODEL:3 * D_MODEL]
    bias = bias_ref[...]                                      # (BS, BS): 0 / -1e30

    for hd in range(N_HEAD):                                  # static, 8 heads
        c0 = hd * HEAD_DIM
        qh = q[:, c0:c0 + HEAD_DIM]
        kh = k[:, c0:c0 + HEAD_DIM]
        vh = v[:, c0:c0 + HEAD_DIM]
        s = _mm_t(qh, kh) + bias                              # (BS, BS), batch-masked
        s = s - jnp.max(s, axis=-1, keepdims=True)
        p = jnp.exp(s)
        p = p * pl.reciprocal(jnp.sum(p, axis=-1, keepdims=True), approx=True)
        attn_ref[:, c0:c0 + HEAD_DIM] = jnp.dot(
            p, vh, preferred_element_type=jnp.float32)

    attn = _mm_t(attn_ref[...], ow_ref[...]) + ob_ref[...]

    # ---- residual + layernorm 1 (post-norm) ----
    h1 = _layer_norm(h + attn, ln1w_ref[...], ln1b_ref[...])

    # ---- feed-forward (relu) + residual + layernorm 2 ----
    ff = jnp.maximum(_mm_t(h1, l1w_ref[...]) + l1b_ref[...], 0.0)
    ff = _mm_t(ff, l2w_ref[...]) + l2b_ref[...]
    h2 = _layer_norm(h1 + ff, ln2w_ref[...], ln2b_ref[...])
    h_ref[...] = h2

    # ---- last layer: per-batch mean over sequence + final linear ----
    @pl.when(layer == pl.num_programs(0) - 1)
    def _():
        pooled = jnp.dot(pool_ref[...], h2,
                         preferred_element_type=jnp.float32)   # (B, D)
        o_ref[...] = _mm_t(pooled, fcw_ref[...]) + fcb_ref[...]

    # TODO(synk): dropout layers are eval-mode no-ops and intentionally omitted.


# ------------------------------------------------------------------ wrapper --

def tiny_trans_forward(x, params):
    B, _, S, F = x.shape
    BS = B * S

    tok = x.reshape(BS, F).astype(jnp.float32)                # glue reshape
    tok = jnp.pad(tok, ((0, 0), (0, K_PAD - F)))              # lane-dense K

    # Additive block-diagonal batch mask and mean-pool matrix (built in XLA).
    ids = jnp.repeat(jnp.arange(B, dtype=jnp.int32), S)       # (BS,)
    attn_bias = jnp.where(ids[:, None] == ids[None, :],
                          0.0, NEG_INF).astype(jnp.float32)   # (BS, BS)
    pool_mat = (jnp.arange(B, dtype=jnp.int32)[:, None] == ids[None, :]
                ).astype(jnp.float32) / S                     # (B, BS)

    full2 = lambda shape: pl.BlockSpec(shape, lambda l: (0, 0))
    stack2 = lambda r, c: pl.BlockSpec((None, r, c), lambda l: (l, 0, 0))

    grid_spec = pltpu.PrefetchScalarGridSpec(
        num_scalar_prefetch=0,
        grid=(N_LAYERS,),
        in_specs=[
            full2((BS, K_PAD)),                 # tok (padded)
            full2((D_MODEL, K_PAD)),            # fc_front_w (padded, bf16)
            full2((1, D_MODEL)),                # fc_front_b
            full2((BS, BS)),                    # attention batch-mask bias
            full2((B, BS)),                     # mean-pool matrix
            stack2(3 * D_MODEL, D_MODEL),       # in_proj_w   (L, 3D, D) bf16
            stack2(1, 3 * D_MODEL),             # in_proj_b
            stack2(D_MODEL, D_MODEL),           # out_proj_w  bf16
            stack2(1, D_MODEL),                 # out_proj_b
            stack2(1, D_MODEL),                 # ln1_w
            stack2(1, D_MODEL),                 # ln1_b
            stack2(D_FF, D_MODEL),              # linear1_w   bf16
            stack2(1, D_FF),                    # linear1_b
            stack2(D_MODEL, D_FF),              # linear2_w   bf16
            stack2(1, D_MODEL),                 # linear2_b
            stack2(1, D_MODEL),                 # ln2_w
            stack2(1, D_MODEL),                 # ln2_b
            full2((N_OUT_PAD, D_MODEL)),        # fc_w (padded, bf16)
            full2((1, N_OUT_PAD)),              # fc_b (padded)
        ],
        out_specs=pl.BlockSpec((B, N_OUT_PAD), lambda l: (0, 0)),
        scratch_shapes=[
            pltpu.VMEM((BS, D_MODEL), jnp.float32),    # resident hidden state h
            pltpu.VMEM((BS, D_MODEL), jnp.float32),    # attention head outputs
        ],
    )

    out_pad = pl.pallas_call(
        fused_kernel,
        out_shape=jax.ShapeDtypeStruct((B, N_OUT_PAD), jnp.float32),
        grid_spec=grid_spec,
        compiler_params=pltpu.CompilerParams(
            dimension_semantics=("arbitrary",),        # h carries across layers
            vmem_limit_bytes=32 * 1024 * 1024),
    )(tok, params["fc_front_w"], params["fc_front_b"], attn_bias, pool_mat,
      params["in_w"], params["in_b"], params["out_w"], params["out_b"],
      params["ln1_w"], params["ln1_b"], params["l1_w"], params["l1_b"],
      params["l2_w"], params["l2_b"], params["ln2_w"], params["ln2_b"],
      params["fc_w"], params["fc_b"])

    out = out_pad[:, :N_OUT]                                  # strip lane padding
    return out, out                                           # module returns (x, x)


# ------------------------------------------------------------------- params --

def init_params(key):
    """Deterministic synthetic parameters; matrices bf16 (streamed), rest f32."""
    def dense(k, n_out, n_in, scale=0.05):
        kw, kb = jax.random.split(k)
        w = jax.random.normal(kw, (n_out, n_in), jnp.float32) * scale
        b = (jax.random.normal(kb, (n_out,), jnp.float32) * 0.02).reshape(1, n_out)
        return w, b

    keys = jax.random.split(key, 2 + N_LAYERS)

    fcf_w, fcf_b = dense(keys[0], D_MODEL, D_IN)
    fcf_w = jnp.pad(fcf_w, ((0, 0), (0, K_PAD - D_IN))).astype(jnp.bfloat16)

    fc_w, fc_b = dense(keys[1], N_OUT, D_MODEL)
    fc_w = jnp.pad(fc_w, ((0, N_OUT_PAD - N_OUT), (0, 0))).astype(jnp.bfloat16)
    fc_b = jnp.pad(fc_b, ((0, 0), (0, N_OUT_PAD - N_OUT)))

    in_w, in_b, out_w, out_b = [], [], [], []
    l1_w, l1_b, l2_w, l2_b = [], [], [], []
    for i in range(N_LAYERS):
        lk = jax.random.split(keys[2 + i], 4)
        w, b = dense(lk[0], 3 * D_MODEL, D_MODEL); in_w.append(w);  in_b.append(b)
        w, b = dense(lk[1], D_MODEL, D_MODEL);     out_w.append(w); out_b.append(b)
        w, b = dense(lk[2], D_FF, D_MODEL);        l1_w.append(w);  l1_b.append(b)
        w, b = dense(lk[3], D_MODEL, D_FF);        l2_w.append(w);  l2_b.append(b)

    stackw = lambda xs: jnp.stack(xs).astype(jnp.bfloat16)   # (L, n_out, n_in)
    stackb = lambda xs: jnp.stack(xs)                        # (L, 1, n_out) f32
    ones = jnp.ones((N_LAYERS, 1, D_MODEL), jnp.float32)
    zeros = jnp.zeros((N_LAYERS, 1, D_MODEL), jnp.float32)

    return dict(
        fc_front_w=fcf_w, fc_front_b=fcf_b,
        fc_w=fc_w, fc_b=fc_b,
        in_w=stackw(in_w), in_b=stackb(in_b),
        out_w=stackw(out_w), out_b=stackb(out_b),
        ln1_w=ones, ln1_b=zeros,
        l1_w=stackw(l1_w), l1_b=stackb(l1_b),
        l2_w=stackw(l2_w), l2_b=stackb(l2_b),
        ln2_w=ones, ln2_b=zeros,
    )


if __name__ == "__main__":
    key = jax.random.PRNGKey(0)
    k_x, k_p = jax.random.split(key)
    B, C, S, F = 2, 1, 8, 40        # (batch, channel=1, seq, feature=40)
    x = jax.random.normal(k_x, (B, C, S, F), jnp.float32)
    params = init_params(k_p)

    fwd = jax.jit(tiny_trans_forward)
    out_a, out_b = fwd(x, params)
    jax.block_until_ready((out_a, out_b))
    assert out_a.shape == (B, N_OUT) and out_b.shape == (B, N_OUT)
    assert bool(jnp.all(jnp.isfinite(out_a)))
    print("KERNEL_OK")
</pallas_src>

<mosaic_0001>
module attributes {stable_mosaic.version = 11 : i64} {
  func.func @fused_kernel(%arg0: i32, %arg1: memref<16x128xf32, #tpu.memory_space<vmem>>, %arg2: memref<256x128xbf16, #tpu.memory_space<vmem>>, %arg3: memref<1x256xf32, #tpu.memory_space<vmem>>, %arg4: memref<16x16xf32, #tpu.memory_space<vmem>>, %arg5: memref<2x16xf32, #tpu.memory_space<vmem>>, %arg6: memref<1x768x256xbf16, #tpu.memory_space<vmem>>, %arg7: memref<1x1x768xf32, #tpu.memory_space<vmem>>, %arg8: memref<1x256x256xbf16, #tpu.memory_space<vmem>>, %arg9: memref<1x1x256xf32, #tpu.memory_space<vmem>>, %arg10: memref<1x1x256xf32, #tpu.memory_space<vmem>>, %arg11: memref<1x1x256xf32, #tpu.memory_space<vmem>>, %arg12: memref<1x2048x256xbf16, #tpu.memory_space<vmem>>, %arg13: memref<1x1x2048xf32, #tpu.memory_space<vmem>>, %arg14: memref<1x256x2048xbf16, #tpu.memory_space<vmem>>, %arg15: memref<1x1x256xf32, #tpu.memory_space<vmem>>, %arg16: memref<1x1x256xf32, #tpu.memory_space<vmem>>, %arg17: memref<1x1x256xf32, #tpu.memory_space<vmem>>, %arg18: memref<128x256xbf16, #tpu.memory_space<vmem>>, %arg19: memref<1x128xf32, #tpu.memory_space<vmem>>, %arg20: memref<2x128xf32, #tpu.memory_space<vmem>>, %arg21: memref<16x256xf32, #tpu.memory_space<vmem>>, %arg22: memref<16x256xf32, #tpu.memory_space<vmem>>) attributes {dimension_semantics = [#tpu.dimension_semantics<arbitrary>], iteration_bounds = array<i64: 4>, scalar_prefetch = 0 : i64, scratch_operands = 2 : i64, tpu.core_type = #tpu.core_type<tc>, window_params = [{pipeline_mode = #tpu.pipeline_mode<synchronous>, transform_indices = @transform_0, window_bounds = array<i64: 16, 128>}, {pipeline_mode = #tpu.pipeline_mode<synchronous>, transform_indices = @transform_1, window_bounds = array<i64: 256, 128>}, {pipeline_mode = #tpu.pipeline_mode<synchronous>, transform_indices = @transform_2, window_bounds = array<i64: 1, 256>}, {pipeline_mode = #tpu.pipeline_mode<synchronous>, transform_indices = @transform_3, window_bounds = array<i64: 16, 16>}, {pipeline_mode = #tpu.pipeline_mode<synchronous>, transform_indices = @transform_4, window_bounds = array<i64: 2, 16>}, {transform_indices = @transform_5, window_bounds = array<i64: 1, 768, 256>}, {transform_indices = @transform_6, window_bounds = array<i64: 1, 1, 768>}, {transform_indices = @transform_7, window_bounds = array<i64: 1, 256, 256>}, {transform_indices = @transform_8, window_bounds = array<i64: 1, 1, 256>}, {transform_indices = @transform_9, window_bounds = array<i64: 1, 1, 256>}, {transform_indices = @transform_10, window_bounds = array<i64: 1, 1, 256>}, {transform_indices = @transform_11, window_bounds = array<i64: 1, 2048, 256>}, {transform_indices = @transform_12, window_bounds = array<i64: 1, 1, 2048>}, {transform_indices = @transform_13, window_bounds = array<i64: 1, 256, 2048>}, {transform_indices = @transform_14, window_bounds = array<i64: 1, 1, 256>}, {transform_indices = @transform_15, window_bounds = array<i64: 1, 1, 256>}, {transform_indices = @transform_16, window_bounds = array<i64: 1, 1, 256>}, {pipeline_mode = #tpu.pipeline_mode<synchronous>, transform_indices = @transform_17, window_bounds = array<i64: 128, 256>}, {pipeline_mode = #tpu.pipeline_mode<synchronous>, transform_indices = @transform_18, window_bounds = array<i64: 1, 128>}, {pipeline_mode = #tpu.pipeline_mode<synchronous>, transform_indices = @transform_19, window_bounds = array<i64: 2, 128>}]} {
    %c0_i32 = arith.constant 0 : i32
    %0 = arith.cmpi eq, %arg0, %c0_i32 : i32
    %1 = arith.extui %0 : i1 to i32
    %c0_i32_0 = arith.constant 0 : i32
    %2 = arith.cmpi ne, %1, %c0_i32_0 : i32
    scf.if %2 {
      %c0_101 = arith.constant 0 : index
      %c0_102 = arith.constant 0 : index
      %235 = vector.load %arg1[%c0_101, %c0_102] : memref<16x128xf32, #tpu.memory_space<vmem>>, vector<16x128xf32>
      %c0_103 = arith.constant 0 : index
      %c0_104 = arith.constant 0 : index
      %236 = vector.load %arg2[%c0_103, %c0_104] : memref<256x128xbf16, #tpu.memory_space<vmem>>, vector<256x128xbf16>
      %237 = arith.truncf %235 : vector<16x128xf32> to vector<16x128xbf16>
      %cst_105 = arith.constant dense<0.000000e+00> : vector<16x256xf32>
      %238 = tpu.matmul %237, %236, %cst_105 {dimension_numbers = #tpu.dot_dimension_numbers<[1], [1], [0], [0], [0, 0, 1, 0], [], []>} : vector<16x128xbf16>, vector<256x128xbf16>, vector<16x256xf32> -> vector<16x256xf32>
      %c0_106 = arith.constant 0 : index
      %c0_107 = arith.constant 0 : index
      %239 = vector.load %arg3[%c0_106, %c0_107] : memref<1x256xf32, #tpu.memory_space<vmem>>, vector<1x256xf32>
      %240 = vector.broadcast %239 : vector<1x256xf32> to vector<16x256xf32>
      %241 = arith.addf %238, %240 : vector<16x256xf32>
      %c0_108 = arith.constant 0 : index
      %c0_109 = arith.constant 0 : index
      %242 = vector.load %arg21[%c0_108, %c0_109] : memref<16x256xf32, #tpu.memory_space<vmem>>, vector<16x256xf32>
      tpu.vector_store %arg21[%c0_108, %c0_109], %241 {strides = array<i32>} : memref<16x256xf32, #tpu.memory_space<vmem>>, vector<16x256xf32>,
    } else {
    }
    %c0 = arith.constant 0 : index
    %c0_1 = arith.constant 0 : index
    %3 = vector.load %arg21[%c0, %c0_1] : memref<16x256xf32, #tpu.memory_space<vmem>>, vector<16x256xf32>
    %c0_2 = arith.constant 0 : index
    %c0_3 = arith.constant 0 : index
    %c0_4 = arith.constant 0 : index
    %4 = vector.load %arg6[%c0_2, %c0_3, %c0_4] : memref<1x768x256xbf16, #tpu.memory_space<vmem>>, vector<1x768x256xbf16>
    %5 = vector.shape_cast %4 : vector<1x768x256xbf16> to vector<768x256xbf16>
    %6 = arith.truncf %3 : vector<16x256xf32> to vector<16x256xbf16>
    %cst = arith.constant dense<0.000000e+00> : vector<16x768xf32>
    %7 = tpu.matmul %6, %5, %cst {dimension_numbers = #tpu.dot_dimension_numbers<[1], [1], [0], [0], [0, 0, 1, 0], [], []>} : vector<16x256xbf16>, vector<768x256xbf16>, vector<16x768xf32> -> vector<16x768xf32>
    %c0_5 = arith.constant 0 : index
    %c0_6 = arith.constant 0 : index
    %c0_7 = arith.constant 0 : index
    %8 = vector.load %arg7[%c0_5, %c0_6, %c0_7] : memref<1x1x768xf32, #tpu.memory_space<vmem>>, vector<1x1x768xf32>
    %9 = vector.shape_cast %8 : vector<1x1x768xf32> to vector<1x768xf32>
    %10 = vector.broadcast %9 : vector<1x768xf32> to vector<16x768xf32>
    %11 = arith.addf %7, %10 : vector<16x768xf32>
    %12 = vector.extract_strided_slice %11 {offsets = [0, 0], sizes = [16, 256], strides = [1, 1]} : vector<16x768xf32> to vector<16x256xf32>
    %cst_8 = arith.constant 0.176776692 : f32
    %13 = vector.broadcast %cst_8 : f32 to vector<16x256xf32>
    %14 = arith.mulf %12, %13 : vector<16x256xf32>
    %15 = vector.extract_strided_slice %11 {offsets = [0, 256], sizes = [16, 256], strides = [1, 1]} : vector<16x768xf32> to vector<16x256xf32>
    %16 = vector.extract_strided_slice %11 {offsets = [0, 512], sizes = [16, 256], strides = [1, 1]} : vector<16x768xf32> to vector<16x256xf32>
    %c0_9 = arith.constant 0 : index
    %c0_10 = arith.constant 0 : index
    %17 = vector.load %arg4[%c0_9, %c0_10] : memref<16x16xf32, #tpu.memory_space<vmem>>, vector<16x16xf32>
    %18 = vector.extract_strided_slice %14 {offsets = [0, 0], sizes = [16, 32], strides = [1, 1]} : vector<16x256xf32> to vector<16x32xf32>
    %19 = vector.extract_strided_slice %15 {offsets = [0, 0], sizes = [16, 32], strides = [1, 1]} : vector<16x256xf32> to vector<16x32xf32>
    %20 = vector.extract_strided_slice %16 {offsets = [0, 0], sizes = [16, 32], strides = [1, 1]} : vector<16x256xf32> to vector<16x32xf32>
    %cst_11 = arith.constant dense<0.000000e+00> : vector<16x16xf32>
    %21 = tpu.matmul %18, %19, %cst_11 {dimension_numbers = #tpu.dot_dimension_numbers<[1], [1], [0], [0], [0, 0, 1, 0], [], []>} : vector<16x32xf32>, vector<16x32xf32>, vector<16x16xf32> -> vector<16x16xf32>
    %22 = arith.addf %21, %17 : vector<16x16xf32>
    %cst_12 = arith.constant dense<0xFF800000> : vector<16xf32>
    %23 = vector.multi_reduction <maximumf>, %22, %cst_12 [1] : vector<16x16xf32> to vector<16xf32>
    %24 = vector.shape_cast %23 : vector<16xf32> to vector<16x1xf32>
    %25 = vector.broadcast %24 : vector<16x1xf32> to vector<16x16xf32>
    %26 = arith.subf %22, %25 : vector<16x16xf32>
    %27 = math.exp %26 : vector<16x16xf32>
    %cst_13 = arith.constant dense<0.000000e+00> : vector<16xf32>
    %28 = vector.multi_reduction <add>, %27, %cst_13 [1] : vector<16x16xf32> to vector<16xf32>
    %29 = vector.shape_cast %28 : vector<16xf32> to vector<16x1xf32>
    %30 = tpu.reciprocal %29 {approx = true} : vector<16x1xf32> -> vector<16x1xf32>
    %31 = vector.broadcast %30 : vector<16x1xf32> to vector<16x16xf32>
    %32 = arith.mulf %27, %31 : vector<16x16xf32>
    %cst_14 = arith.constant dense<0.000000e+00> : vector<16x32xf32>
    %33 = tpu.matmul %32, %20, %cst_14 {dimension_numbers = #tpu.dot_dimension_numbers<[1], [0], [0], [1], [0, 0, 1, 1], [], []>} : vector<16x16xf32>, vector<16x32xf32>, vector<16x32xf32> -> vector<16x32xf32>
    %c0_15 = arith.constant 0 : index
    %c0_16 = arith.constant 0 : index
    %34 = vector.load %arg22[%c0_15, %c0_16] : memref<16x256xf32, #tpu.memory_space<vmem>>, vector<16x32xf32>
    tpu.vector_store %arg22[%c0_15, %c0_16], %33 {strides = array<i32>} : memref<16x256xf32, #tpu.memory_space<vmem>>, vector<16x32xf32>,
    %35 = vector.extract_strided_slice %14 {offsets = [0, 32], sizes = [16, 32], strides = [1, 1]} : vector<16x256xf32> to vector<16x32xf32>
    %36 = vector.extract_strided_slice %15 {offsets = [0, 32], sizes = [16, 32], strides = [1, 1]} : vector<16x256xf32> to vector<16x32xf32>
    %37 = vector.extract_strided_slice %16 {offsets = [0, 32], sizes = [16, 32], strides = [1, 1]} : vector<16x256xf32> to vector<16x32xf32>
    %cst_17 = arith.constant dense<0.000000e+00> : vector<16x16xf32>
    %38 = tpu.matmul %35, %36, %cst_17 {dimension_numbers = #tpu.dot_dimension_numbers<[1], [1], [0], [0], [0, 0, 1, 0], [], []>} : vector<16x32xf32>, vector<16x32xf32>, vector<16x16xf32> -> vector<16x16xf32>
    %39 = arith.addf %38, %17 : vector<16x16xf32>
    %cst_18 = arith.constant dense<0xFF800000> : vector<16xf32>
    %40 = vector.multi_reduction <maximumf>, %39, %cst_18 [1] : vector<16x16xf32> to vector<16xf32>
    %41 = vector.shape_cast %40 : vector<16xf32> to vector<16x1xf32>
    %42 = vector.broadcast %41 : vector<16x1xf32> to vector<16x16xf32>
    %43 = arith.subf %39, %42 : vector<16x16xf32>
    %44 = math.exp %43 : vector<16x16xf32>
    %cst_19 = arith.constant dense<0.000000e+00> : vector<16xf32>
    %45 = vector.multi_reduction <add>, %44, %cst_19 [1] : vector<16x16xf32> to vector<16xf32>
    %46 = vector.shape_cast %45 : vector<16xf32> to vector<16x1xf32>
    %47 = tpu.reciprocal %46 {approx = true} : vector<16x1xf32> -> vector<16x1xf32>
    %48 = vector.broadcast %47 : vector<16x1xf32> to vector<16x16xf32>
    %49 = arith.mulf %44, %48 : vector<16x16xf32>
    %cst_20 = arith.constant dense<0.000000e+00> : vector<16x32xf32>
    %50 = tpu.matmul %49, %37, %cst_20 {dimension_numbers = #tpu.dot_dimension_numbers<[1], [0], [0], [1], [0, 0, 1, 1], [], []>} : vector<16x16xf32>, vector<16x32xf32>, vector<16x32xf32> -> vector<16x32xf32>
    %c0_21 = arith.constant 0 : index
    %c32 = arith.constant 32 : index
    %51 = vector.load %arg22[%c0_21, %c32] : memref<16x256xf32, #tpu.memory_space<vmem>>, vector<16x32xf32>
    tpu.vector_store %arg22[%c0_21, %c32], %50 {strides = array<i32>} : memref<16x256xf32, #tpu.memory_space<vmem>>, vector<16x32xf32>,
    %52 = vector.extract_strided_slice %14 {offsets = [0, 64], sizes = [16, 32], strides = [1, 1]} : vector<16x256xf32> to vector<16x32xf32>
    %53 = vector.extract_strided_slice %15 {offsets = [0, 64], sizes = [16, 32], strides = [1, 1]} : vector<16x256xf32> to vector<16x32xf32>
    %54 = vector.extract_strided_slice %16 {offsets = [0, 64], sizes = [16, 32], strides = [1, 1]} : vector<16x256xf32> to vector<16x32xf32>
    %cst_22 = arith.constant dense<0.000000e+00> : vector<16x16xf32>
    %55 = tpu.matmul %52, %53, %cst_22 {dimension_numbers = #tpu.dot_dimension_numbers<[1], [1], [0], [0], [0, 0, 1, 0], [], []>} : vector<16x32xf32>, vector<16x32xf32>, vector<16x16xf32> -> vector<16x16xf32>
    %56 = arith.addf %55, %17 : vector<16x16xf32>
    %cst_23 = arith.constant dense<0xFF800000> : vector<16xf32>
    %57 = vector.multi_reduction <maximumf>, %56, %cst_23 [1] : vector<16x16xf32> to vector<16xf32>
    %58 = vector.shape_cast %57 : vector<16xf32> to vector<16x1xf32>
    %59 = vector.broadcast %58 : vector<16x1xf32> to vector<16x16xf32>
    %60 = arith.subf %56, %59 : vector<16x16xf32>
    %61 = math.exp %60 : vector<16x16xf32>
    %cst_24 = arith.constant dense<0.000000e+00> : vector<16xf32>
    %62 = vector.multi_reduction <add>, %61, %cst_24 [1] : vector<16x16xf32> to vector<16xf32>
    %63 = vector.shape_cast %62 : vector<16xf32> to vector<16x1xf32>
    %64 = tpu.reciprocal %63 {approx = true} : vector<16x1xf32> -> vector<16x1xf32>
    %65 = vector.broadcast %64 : vector<16x1xf32> to vector<16x16xf32>
    %66 = arith.mulf %61, %65 : vector<16x16xf32>
    %cst_25 = arith.constant dense<0.000000e+00> : vector<16x32xf32>
    %67 = tpu.matmul %66, %54, %cst_25 {dimension_numbers = #tpu.dot_dimension_numbers<[1], [0], [0], [1], [0, 0, 1, 1], [], []>} : vector<16x16xf32>, vector<16x32xf32>, vector<16x32xf32> -> vector<16x32xf32>
    %c0_26 = arith.constant 0 : index
    %c64 = arith.constant 64 : index
    %68 = vector.load %arg22[%c0_26, %c64] : memref<16x256xf32, #tpu.memory_space<vmem>>, vector<16x32xf32>
    tpu.vector_store %arg22[%c0_26, %c64], %67 {strides = array<i32>} : memref<16x256xf32, #tpu.memory_space<vmem>>, vector<16x32xf32>,
    %69 = vector.extract_strided_slice %14 {offsets = [0, 96], sizes = [16, 32], strides = [1, 1]} : vector<16x256xf32> to vector<16x32xf32>
    %70 = vector.extract_strided_slice %15 {offsets = [0, 96], sizes = [16, 32], strides = [1, 1]} : vector<16x256xf32> to vector<16x32xf32>
    %71 = vector.extract_strided_slice %16 {offsets = [0, 96], sizes = [16, 32], strides = [1, 1]} : vector<16x256xf32> to vector<16x32xf32>
    %cst_27 = arith.constant dense<0.000000e+00> : vector<16x16xf32>
    %72 = tpu.matmul %69, %70, %cst_27 {dimension_numbers = #tpu.dot_dimension_numbers<[1], [1], [0], [0], [0, 0, 1, 0], [], []>} : vector<16x32xf32>, vector<16x32xf32>, vector<16x16xf32> -> vector<16x16xf32>
    %73 = arith.addf %72, %17 : vector<16x16xf32>
    %cst_28 = arith.constant dense<0xFF800000> : vector<16xf32>
    %74 = vector.multi_reduction <maximumf>, %73, %cst_28 [1] : vector<16x16xf32> to vector<16xf32>
    %75 = vector.shape_cast %74 : vector<16xf32> to vector<16x1xf32>
    %76 = vector.broadcast %75 : vector<16x1xf32> to vector<16x16xf32>
    %77 = arith.subf %73, %76 : vector<16x16xf32>
    %78 = math.exp %77 : vector<16x16xf32>
    %cst_29 = arith.constant dense<0.000000e+00> : vector<16xf32>
    %79 = vector.multi_reduction <add>, %78, %cst_29 [1] : vector<16x16xf32> to vector<16xf32>
    %80 = vector.shape_cast %79 : vector<16xf32> to vector<16x1xf32>
    %81 = tpu.reciprocal %80 {approx = true} : vector<16x1xf32> -> vector<16x1xf32>
    %82 = vector.broadcast %81 : vector<16x1xf32> to vector<16x16xf32>
    %83 = arith.mulf %78, %82 : vector<16x16xf32>
    %cst_30 = arith.constant dense<0.000000e+00> : vector<16x32xf32>
    %84 = tpu.matmul %83, %71, %cst_30 {dimension_numbers = #tpu.dot_dimension_numbers<[1], [0], [0], [1], [0, 0, 1, 1], [], []>} : vector<16x16xf32>, vector<16x32xf32>, vector<16x32xf32> -> vector<16x32xf32>
    %c0_31 = arith.constant 0 : index
    %c96 = arith.constant 96 : index
    %85 = vector.load %arg22[%c0_31, %c96] : memref<16x256xf32, #tpu.memory_space<vmem>>, vector<16x32xf32>
    tpu.vector_store %arg22[%c0_31, %c96], %84 {strides = array<i32>} : memref<16x256xf32, #tpu.memory_space<vmem>>, vector<16x32xf32>,
    %86 = vector.extract_strided_slice %14 {offsets = [0, 128], sizes = [16, 32], strides = [1, 1]} : vector<16x256xf32> to vector<16x32xf32>
    %87 = vector.extract_strided_slice %15 {offsets = [0, 128], sizes = [16, 32], strides = [1, 1]} : vector<16x256xf32> to vector<16x32xf32>
    %88 = vector.extract_strided_slice %16 {offsets = [0, 128], sizes = [16, 32], strides = [1, 1]} : vector<16x256xf32> to vector<16x32xf32>
    %cst_32 = arith.constant dense<0.000000e+00> : vector<16x16xf32>
    %89 = tpu.matmul %86, %87, %cst_32 {dimension_numbers = #tpu.dot_dimension_numbers<[1], [1], [0], [0], [0, 0, 1, 0], [], []>} : vector<16x32xf32>, vector<16x32xf32>, vector<16x16xf32> -> vector<16x16xf32>
    %90 = arith.addf %89, %17 : vector<16x16xf32>
    %cst_33 = arith.constant dense<0xFF800000> : vector<16xf32>
    %91 = vector.multi_reduction <maximumf>, %90, %cst_33 [1] : vector<16x16xf32> to vector<16xf32>
    %92 = vector.shape_cast %91 : vector<16xf32> to vector<16x1xf32>
    %93 = vector.broadcast %92 : vector<16x1xf32> to vector<16x16xf32>
    %94 = arith.subf %90, %93 : vector<16x16xf32>
    %95 = math.exp %94 : vector<16x16xf32>
    %cst_34 = arith.constant dense<0.000000e+00> : vector<16xf32>
    %96 = vector.multi_reduction <add>, %95, %cst_34 [1] : vector<16x16xf32> to vector<16xf32>
    %97 = vector.shape_cast %96 : vector<16xf32> to vector<16x1xf32>
    %98 = tpu.reciprocal %97 {approx = true} : vector<16x1xf32> -> vector<16x1xf32>
    %99 = vector.broadcast %98 : vector<16x1xf32> to vector<16x16xf32>
    %100 = arith.mulf %95, %99 : vector<16x16xf32>
    %cst_35 = arith.constant dense<0.000000e+00> : vector<16x32xf32>
    %101 = tpu.matmul %100, %88, %cst_35 {dimension_numbers = #tpu.dot_dimension_numbers<[1], [0], [0], [1], [0, 0, 1, 1], [], []>} : vector<16x16xf32>, vector<16x32xf32>, vector<16x32xf32> -> vector<16x32xf32>
    %c0_36 = arith.constant 0 : index
    %c128 = arith.constant 128 : index
    %102 = vector.load %arg22[%c0_36, %c128] : memref<16x256xf32, #tpu.memory_space<vmem>>, vector<16x32xf32>
    tpu.vector_store %arg22[%c0_36, %c128], %101 {strides = array<i32>} : memref<16x256xf32, #tpu.memory_space<vmem>>, vector<16x32xf32>,
    %103 = vector.extract_strided_slice %14 {offsets = [0, 160], sizes = [16, 32], strides = [1, 1]} : vector<16x256xf32> to vector<16x32xf32>
    %104 = vector.extract_strided_slice %15 {offsets = [0, 160], sizes = [16, 32], strides = [1, 1]} : vector<16x256xf32> to vector<16x32xf32>
    %105 = vector.extract_strided_slice %16 {offsets = [0, 160], sizes = [16, 32], strides = [1, 1]} : vector<16x256xf32> to vector<16x32xf32>
    %cst_37 = arith.constant dense<0.000000e+00> : vector<16x16xf32>
    %106 = tpu.matmul %103, %104, %cst_37 {dimension_numbers = #tpu.dot_dimension_numbers<[1], [1], [0], [0], [0, 0, 1, 0], [], []>} : vector<16x32xf32>, vector<16x32xf32>, vector<16x16xf32> -> vector<16x16xf32>
    %107 = arith.addf %106, %17 : vector<16x16xf32>
    %cst_38 = arith.constant dense<0xFF800000> : vector<16xf32>
    %108 = vector.multi_reduction <maximumf>, %107, %cst_38 [1] : vector<16x16xf32> to vector<16xf32>
    %109 = vector.shape_cast %108 : vector<16xf32> to vector<16x1xf32>
    %110 = vector.broadcast %109 : vector<16x1xf32> to vector<16x16xf32>
    %111 = arith.subf %107, %110 : vector<16x16xf32>
    %112 = math.exp %111 : vector<16x16xf32>
    %cst_39 = arith.constant dense<0.000000e+00> : vector<16xf32>
    %113 = vector.multi_reduction <add>, %112, %cst_39 [1] : vector<16x16xf32> to vector<16xf32>
    %114 = vector.shape_cast %113 : vector<16xf32> to vector<16x1xf32>
    %115 = tpu.reciprocal %114 {approx = true} : vector<16x1xf32> -> vector<16x1xf32>
    %116 = vector.broadcast %115 : vector<16x1xf32> to vector<16x16xf32>
    %117 = arith.mulf %112, %116 : vector<16x16xf32>
    %cst_40 = arith.constant dense<0.000000e+00> : vector<16x32xf32>
    %118 = tpu.matmul %117, %105, %cst_40 {dimension_numbers = #tpu.dot_dimension_numbers<[1], [0], [0], [1], [0, 0, 1, 1], [], []>} : vector<16x16xf32>, vector<16x32xf32>, vector<16x32xf32> -> vector<16x32xf32>
    %c0_41 = arith.constant 0 : index
    %c160 = arith.constant 160 : index
    %119 = vector.load %arg22[%c0_41, %c160] : memref<16x256xf32, #tpu.memory_space<vmem>>, vector<16x32xf32>
    tpu.vector_store %arg22[%c0_41, %c160], %118 {strides = array<i32>} : memref<16x256xf32, #tpu.memory_space<vmem>>, vector<16x32xf32>,
    %120 = vector.extract_strided_slice %14 {offsets = [0, 192], sizes = [16, 32], strides = [1, 1]} : vector<16x256xf32> to vector<16x32xf32>
    %121 = vector.extract_strided_slice %15 {offsets = [0, 192], sizes = [16, 32], strides = [1, 1]} : vector<16x256xf32> to vector<16x32xf32>
    %122 = vector.extract_strided_slice %16 {offsets = [0, 192], sizes = [16, 32], strides = [1, 1]} : vector<16x256xf32> to vector<16x32xf32>
    %cst_42 = arith.constant dense<0.000000e+00> : vector<16x16xf32>
    %123 = tpu.matmul %120, %121, %cst_42 {dimension_numbers = #tpu.dot_dimension_numbers<[1], [1], [0], [0], [0, 0, 1, 0], [], []>} : vector<16x32xf32>, vector<16x32xf32>, vector<16x16xf32> -> vector<16x16xf32>
    %124 = arith.addf %123, %17 : vector<16x16xf32>
    %cst_43 = arith.constant dense<0xFF800000> : vector<16xf32>
    %125 = vector.multi_reduction <maximumf>, %124, %cst_43 [1] : vector<16x16xf32> to vector<16xf32>
    %126 = vector.shape_cast %125 : vector<16xf32> to vector<16x1xf32>
    %127 = vector.broadcast %126 : vector<16x1xf32> to vector<16x16xf32>
    %128 = arith.subf %124, %127 : vector<16x16xf32>
    %129 = math.exp %128 : vector<16x16xf32>
    %cst_44 = arith.constant dense<0.000000e+00> : vector<16xf32>
    %130 = vector.multi_reduction <add>, %129, %cst_44 [1] : vector<16x16xf32> to vector<16xf32>
    %131 = vector.shape_cast %130 : vector<16xf32> to vector<16x1xf32>
    %132 = tpu.reciprocal %131 {approx = true} : vector<16x1xf32> -> vector<16x1xf32>
    %133 = vector.broadcast %132 : vector<16x1xf32> to vector<16x16xf32>
    %134 = arith.mulf %129, %133 : vector<16x16xf32>
    %cst_45 = arith.constant dense<0.000000e+00> : vector<16x32xf32>
    %135 = tpu.matmul %134, %122, %cst_45 {dimension_numbers = #tpu.dot_dimension_numbers<[1], [0], [0], [1], [0, 0, 1, 1], [], []>} : vector<16x16xf32>, vector<16x32xf32>, vector<16x32xf32> -> vector<16x32xf32>
    %c0_46 = arith.constant 0 : index
    %c192 = arith.constant 192 : index
    %136 = vector.load %arg22[%c0_46, %c192] : memref<16x256xf32, #tpu.memory_space<vmem>>, vector<16x32xf32>
    tpu.vector_store %arg22[%c0_46, %c192], %135 {strides = array<i32>} : memref<16x256xf32, #tpu.memory_space<vmem>>, vector<16x32xf32>,
    %137 = vector.extract_strided_slice %14 {offsets = [0, 224], sizes = [16, 32], strides = [1, 1]} : vector<16x256xf32> to vector<16x32xf32>
    %138 = vector.extract_strided_slice %15 {offsets = [0, 224], sizes = [16, 32], strides = [1, 1]} : vector<16x256xf32> to vector<16x32xf32>
    %139 = vector.extract_strided_slice %16 {offsets = [0, 224], sizes = [16, 32], strides = [1, 1]} : vector<16x256xf32> to vector<16x32xf32>
    %cst_47 = arith.constant dense<0.000000e+00> : vector<16x16xf32>
    %140 = tpu.matmul %137, %138, %cst_47 {dimension_numbers = #tpu.dot_dimension_numbers<[1], [1], [0], [0], [0, 0, 1, 0], [], []>} : vector<16x32xf32>, vector<16x32xf32>, vector<16x16xf32> -> vector<16x16xf32>
    %141 = arith.addf %140, %17 : vector<16x16xf32>
    %cst_48 = arith.constant dense<0xFF800000> : vector<16xf32>
    %142 = vector.multi_reduction <maximumf>, %141, %cst_48 [1] : vector<16x16xf32> to vector<16xf32>
    %143 = vector.shape_cast %142 : vector<16xf32> to vector<16x1xf32>
    %144 = vector.broadcast %143 : vector<16x1xf32> to vector<16x16xf32>
    %145 = arith.subf %141, %144 : vector<16x16xf32>
    %146 = math.exp %145 : vector<16x16xf32>
    %cst_49 = arith.constant dense<0.000000e+00> : vector<16xf32>
    %147 = vector.multi_reduction <add>, %146, %cst_49 [1] : vector<16x16xf32> to vector<16xf32>
    %148 = vector.shape_cast %147 : vector<16xf32> to vector<16x1xf32>
    %149 = tpu.reciprocal %148 {approx = true} : vector<16x1xf32> -> vector<16x1xf32>
    %150 = vector.broadcast %149 : vector<16x1xf32> to vector<16x16xf32>
    %151 = arith.mulf %146, %150 : vector<16x16xf32>
    %cst_50 = arith.constant dense<0.000000e+00> : vector<16x32xf32>
    %152 = tpu.matmul %151, %139, %cst_50 {dimension_numbers = #tpu.dot_dimension_numbers<[1], [0], [0], [1], [0, 0, 1, 1], [], []>} : vector<16x16xf32>, vector<16x32xf32>, vector<16x32xf32> -> vector<16x32xf32>
    %c0_51 = arith.constant 0 : index
    %c224 = arith.constant 224 : index
    %153 = vector.load %arg22[%c0_51, %c224] : memref<16x256xf32, #tpu.memory_space<vmem>>, vector<16x32xf32>
    tpu.vector_store %arg22[%c0_51, %c224], %152 {strides = array<i32>} : memref<16x256xf32, #tpu.memory_space<vmem>>, vector<16x32xf32>,
    %c0_52 = arith.constant 0 : index
    %c0_53 = arith.constant 0 : index
    %154 = vector.load %arg22[%c0_52, %c0_53] : memref<16x256xf32, #tpu.memory_space<vmem>>, vector<16x256xf32>
    %c0_54 = arith.constant 0 : index
    %c0_55 = arith.constant 0 : index
    %c0_56 = arith.constant 0 : index
    %155 = vector.load %arg8[%c0_54, %c0_55, %c0_56] : memref<1x256x256xbf16, #tpu.memory_space<vmem>>, vector<1x256x256xbf16>
    %156 = vector.shape_cast %155 : vector<1x256x256xbf16> to vector<256x256xbf16>
    %157 = arith.truncf %154 : vector<16x256xf32> to vector<16x256xbf16>
    %cst_57 = arith.constant dense<0.000000e+00> : vector<16x256xf32>
    %158 = tpu.matmul %157, %156, %cst_57 {dimension_numbers = #tpu.dot_dimension_numbers<[1], [1], [0], [0], [0, 0, 1, 0], [], []>} : vector<16x256xbf16>, vector<256x256xbf16>, vector<16x256xf32> -> vector<16x256xf32>
    %c0_58 = arith.constant 0 : index
    %c0_59 = arith.constant 0 : index
    %c0_60 = arith.constant 0 : index
    %159 = vector.load %arg9[%c0_58, %c0_59, %c0_60] : memref<1x1x256xf32, #tpu.memory_space<vmem>>, vector<1x1x256xf32>
    %160 = vector.shape_cast %159 : vector<1x1x256xf32> to vector<1x256xf32>
    %161 = vector.broadcast %160 : vector<1x256xf32> to vector<16x256xf32>
    %162 = arith.addf %158, %161 : vector<16x256xf32>
    %163 = arith.addf %3, %162 : vector<16x256xf32>
    %c0_61 = arith.constant 0 : index
    %c0_62 = arith.constant 0 : index
    %c0_63 = arith.constant 0 : index
    %164 = vector.load %arg10[%c0_61, %c0_62, %c0_63] : memref<1x1x256xf32, #tpu.memory_space<vmem>>, vector<1x1x256xf32>
    %165 = vector.shape_cast %164 : vector<1x1x256xf32> to vector<1x256xf32>
    %c0_64 = arith.constant 0 : index
    %c0_65 = arith.constant 0 : index
    %c0_66 = arith.constant 0 : index
    %166 = vector.load %arg11[%c0_64, %c0_65, %c0_66] : memref<1x1x256xf32, #tpu.memory_space<vmem>>, vector<1x1x256xf32>
    %167 = vector.shape_cast %166 : vector<1x1x256xf32> to vector<1x256xf32>
    %cst_67 = arith.constant dense<0.000000e+00> : vector<16xf32>
    %168 = vector.multi_reduction <add>, %163, %cst_67 [1] : vector<16x256xf32> to vector<16xf32>
    %169 = vector.shape_cast %168 : vector<16xf32> to vector<16x1xf32>
    %cst_68 = arith.constant 2.560000e+02 : f32
    %170 = vector.broadcast %cst_68 : f32 to vector<16x1xf32>
    %171 = arith.divf %169, %170 : vector<16x1xf32>
    %172 = vector.broadcast %171 : vector<16x1xf32> to vector<16x256xf32>
    %173 = arith.subf %163, %172 : vector<16x256xf32>
    %174 = arith.mulf %173, %173 : vector<16x256xf32>
    %cst_69 = arith.constant dense<0.000000e+00> : vector<16xf32>
    %175 = vector.multi_reduction <add>, %174, %cst_69 [1] : vector<16x256xf32> to vector<16xf32>
    %176 = vector.shape_cast %175 : vector<16xf32> to vector<16x1xf32>
    %cst_70 = arith.constant 2.560000e+02 : f32
    %177 = vector.broadcast %cst_70 : f32 to vector<16x1xf32>
    %178 = arith.divf %176, %177 : vector<16x1xf32>
    %cst_71 = arith.constant 9.99999974E-6 : f32
    %179 = vector.broadcast %cst_71 : f32 to vector<16x1xf32>
    %180 = arith.addf %178, %179 : vector<16x1xf32>
    %181 = math.rsqrt %180 : vector<16x1xf32>
    %182 = vector.broadcast %181 : vector<16x1xf32> to vector<16x256xf32>
    %183 = arith.mulf %173, %182 : vector<16x256xf32>
    %184 = vector.broadcast %165 : vector<1x256xf32> to vector<16x256xf32>
    %185 = arith.mulf %183, %184 : vector<16x256xf32>
    %186 = vector.broadcast %167 : vector<1x256xf32> to vector<16x256xf32>
    %187 = arith.addf %185, %186 : vector<16x256xf32>
    %c0_72 = arith.constant 0 : index
    %c0_73 = arith.constant 0 : index
    %c0_74 = arith.constant 0 : index
    %188 = vector.load %arg12[%c0_72, %c0_73, %c0_74] : memref<1x2048x256xbf16, #tpu.memory_space<vmem>>, vector<1x2048x256xbf16>
    %189 = vector.shape_cast %188 : vector<1x2048x256xbf16> to vector<2048x256xbf16>
    %190 = arith.truncf %187 : vector<16x256xf32> to vector<16x256xbf16>
    %cst_75 = arith.constant dense<0.000000e+00> : vector<16x2048xf32>
    %191 = tpu.matmul %190, %189, %cst_75 {dimension_numbers = #tpu.dot_dimension_numbers<[1], [1], [0], [0], [0, 0, 1, 0], [], []>} : vector<16x256xbf16>, vector<2048x256xbf16>, vector<16x2048xf32> -> vector<16x2048xf32>
    %c0_76 = arith.constant 0 : index
    %c0_77 = arith.constant 0 : index
    %c0_78 = arith.constant 0 : index
    %192 = vector.load %arg13[%c0_76, %c0_77, %c0_78] : memref<1x1x2048xf32, #tpu.memory_space<vmem>>, vector<1x1x2048xf32>
    %193 = vector.shape_cast %192 : vector<1x1x2048xf32> to vector<1x2048xf32>
    %194 = vector.broadcast %193 : vector<1x2048xf32> to vector<16x2048xf32>
    %195 = arith.addf %191, %194 : vector<16x2048xf32>
    %cst_79 = arith.constant 0.000000e+00 : f32
    %196 = vector.broadcast %cst_79 : f32 to vector<16x2048xf32>
    %197 = arith.maximumf %195, %196 : vector<16x2048xf32>
    %c0_80 = arith.constant 0 : index
    %c0_81 = arith.constant 0 : index
    %c0_82 = arith.constant 0 : index
    %198 = vector.load %arg14[%c0_80, %c0_81, %c0_82] : memref<1x256x2048xbf16, #tpu.memory_space<vmem>>, vector<1x256x2048xbf16>
    %199 = vector.shape_cast %198 : vector<1x256x2048xbf16> to vector<256x2048xbf16>
    %200 = arith.truncf %197 : vector<16x2048xf32> to vector<16x2048xbf16>
    %cst_83 = arith.constant dense<0.000000e+00> : vector<16x256xf32>
    %201 = tpu.matmul %200, %199, %cst_83 {dimension_numbers = #tpu.dot_dimension_numbers<[1], [1], [0], [0], [0, 0, 1, 0], [], []>} : vector<16x2048xbf16>, vector<256x2048xbf16>, vector<16x256xf32> -> vector<16x256xf32>
    %c0_84 = arith.constant 0 : index
    %c0_85 = arith.constant 0 : index
    %c0_86 = arith.constant 0 : index
    %202 = vector.load %arg15[%c0_84, %c0_85, %c0_86] : memref<1x1x256xf32, #tpu.memory_space<vmem>>, vector<1x1x256xf32>
    %203 = vector.shape_cast %202 : vector<1x1x256xf32> to vector<1x256xf32>
    %204 = vector.broadcast %203 : vector<1x256xf32> to vector<16x256xf32>
    %205 = arith.addf %201, %204 : vector<16x256xf32>
    %206 = arith.addf %187, %205 : vector<16x256xf32>
    %c0_87 = arith.constant 0 : index
    %c0_88 = arith.constant 0 : index
    %c0_89 = arith.constant 0 : index
    %207 = vector.load %arg16[%c0_87, %c0_88, %c0_89] : memref<1x1x256xf32, #tpu.memory_space<vmem>>, vector<1x1x256xf32>
    %208 = vector.shape_cast %207 : vector<1x1x256xf32> to vector<1x256xf32>
    %c0_90 = arith.constant 0 : index
    %c0_91 = arith.constant 0 : index
    %c0_92 = arith.constant 0 : index
    %209 = vector.load %arg17[%c0_90, %c0_91, %c0_92] : memref<1x1x256xf32, #tpu.memory_space<vmem>>, vector<1x1x256xf32>
    %210 = vector.shape_cast %209 : vector<1x1x256xf32> to vector<1x256xf32>
    %cst_93 = arith.constant dense<0.000000e+00> : vector<16xf32>
    %211 = vector.multi_reduction <add>, %206, %cst_93 [1] : vector<16x256xf32> to vector<16xf32>
    %212 = vector.shape_cast %211 : vector<16xf32> to vector<16x1xf32>
    %cst_94 = arith.constant 2.560000e+02 : f32
    %213 = vector.broadcast %cst_94 : f32 to vector<16x1xf32>
    %214 = arith.divf %212, %213 : vector<16x1xf32>
    %215 = vector.broadcast %214 : vector<16x1xf32> to vector<16x256xf32>
    %216 = arith.subf %206, %215 : vector<16x256xf32>
    %217 = arith.mulf %216, %216 : vector<16x256xf32>
    %cst_95 = arith.constant dense<0.000000e+00> : vector<16xf32>
    %218 = vector.multi_reduction <add>, %217, %cst_95 [1] : vector<16x256xf32> to vector<16xf32>
    %219 = vector.shape_cast %218 : vector<16xf32> to vector<16x1xf32>
    %cst_96 = arith.constant 2.560000e+02 : f32
    %220 = vector.broadcast %cst_96 : f32 to vector<16x1xf32>
    %221 = arith.divf %219, %220 : vector<16x1xf32>
    %cst_97 = arith.constant 9.99999974E-6 : f32
    %222 = vector.broadcast %cst_97 : f32 to vector<16x1xf32>
    %223 = arith.addf %221, %222 : vector<16x1xf32>
    %224 = math.rsqrt %223 : vector<16x1xf32>
    %225 = vector.broadcast %224 : vector<16x1xf32> to vector<16x256xf32>
    %226 = arith.mulf %216, %225 : vector<16x256xf32>
    %227 = vector.broadcast %208 : vector<1x256xf32> to vector<16x256xf32>
    %228 = arith.mulf %226, %227 : vector<16x256xf32>
    %229 = vector.broadcast %210 : vector<1x256xf32> to vector<16x256xf32>
    %230 = arith.addf %228, %229 : vector<16x256xf32>
    %c0_98 = arith.constant 0 : index
    %c0_99 = arith.constant 0 : index
    %231 = vector.load %arg21[%c0_98, %c0_99] : memref<16x256xf32, #tpu.memory_space<vmem>>, vector<16x256xf32>
    tpu.vector_store %arg21[%c0_98, %c0_99], %230 {strides = array<i32>} : memref<16x256xf32, #tpu.memory_space<vmem>>, vector<16x256xf32>,
    %c3_i32 = arith.constant 3 : i32
    %232 = arith.cmpi eq, %arg0, %c3_i32 : i32
    %233 = arith.extui %232 : i1 to i32
    %c0_i32_100 = arith.constant 0 : i32
    %234 = arith.cmpi ne, %233, %c0_i32_100 : i32
    scf.if %234 {
      %c0_101 = arith.constant 0 : index
      %c0_102 = arith.constant 0 : index
      %235 = vector.load %arg5[%c0_101, %c0_102] : memref<2x16xf32, #tpu.memory_space<vmem>>, vector<2x16xf32>
      %cst_103 = arith.constant dense<0.000000e+00> : vector<2x256xf32>
      %236 = tpu.matmul %235, %230, %cst_103 {dimension_numbers = #tpu.dot_dimension_numbers<[1], [0], [0], [1], [0, 0, 1, 1], [], []>} : vector<2x16xf32>, vector<16x256xf32>, vector<2x256xf32> -> vector<2x256xf32>
      %c0_104 = arith.constant 0 : index
      %c0_105 = arith.constant 0 : index
      %237 = vector.load %arg18[%c0_104, %c0_105] : memref<128x256xbf16, #tpu.memory_space<vmem>>, vector<128x256xbf16>
      %238 = arith.truncf %236 : vector<2x256xf32> to vector<2x256xbf16>
      %cst_106 = arith.constant dense<0.000000e+00> : vector<2x128xf32>
      %239 = tpu.matmul %238, %237, %cst_106 {dimension_numbers = #tpu.dot_dimension_numbers<[1], [1], [0], [0], [0, 0, 1, 0], [], []>} : vector<2x256xbf16>, vector<128x256xbf16>, vector<2x128xf32> -> vector<2x128xf32>
      %c0_107 = arith.constant 0 : index
      %c0_108 = arith.constant 0 : index
      %240 = vector.load %arg19[%c0_107, %c0_108] : memref<1x128xf32, #tpu.memory_space<vmem>>, vector<1x128xf32>
      %241 = vector.broadcast %240 : vector<1x128xf32> to vector<2x128xf32>
      %242 = arith.addf %239, %241 : vector<2x128xf32>
      %c0_109 = arith.constant 0 : index
      %c0_110 = arith.constant 0 : index
      %243 = vector.load %arg20[%c0_109, %c0_110] : memref<2x128xf32, #tpu.memory_space<vmem>>, vector<2x128xf32>
      tpu.vector_store %arg20[%c0_109, %c0_110], %242 {strides = array<i32>} : memref<2x128xf32, #tpu.memory_space<vmem>>, vector<2x128xf32>,
    } else {
    }
    return
  }
  func.func @transform_0(%arg0: i32) -> (i32, i32) {
    %c0_i32 = arith.constant 0 : i32
    %c0_i32_0 = arith.constant 0 : i32
    %c0_i32_1 = arith.constant 0 : i32
    return %c0_i32, %c0_i32_0 : i32, i32
  }
  func.func @transform_1(%arg0: i32) -> (i32, i32) {
    %c0_i32 = arith.constant 0 : i32
    %c0_i32_0 = arith.constant 0 : i32
    %c0_i32_1 = arith.constant 0 : i32
    return %c0_i32, %c0_i32_0 : i32, i32
  }
  func.func @transform_2(%arg0: i32) -> (i32, i32) {
    %c0_i32 = arith.constant 0 : i32
    %c0_i32_0 = arith.constant 0 : i32
    %c0_i32_1 = arith.constant 0 : i32
    return %c0_i32, %c0_i32_0 : i32, i32
  }
  func.func @transform_3(%arg0: i32) -> (i32, i32) {
    %c0_i32 = arith.constant 0 : i32
    %c0_i32_0 = arith.constant 0 : i32
    %c0_i32_1 = arith.constant 0 : i32
    return %c0_i32, %c0_i32_0 : i32, i32
  }
  func.func @transform_4(%arg0: i32) -> (i32, i32) {
    %c0_i32 = arith.constant 0 : i32
    %c0_i32_0 = arith.constant 0 : i32
    %c0_i32_1 = arith.constant 0 : i32
    return %c0_i32, %c0_i32_0 : i32, i32
  }
  func.func @transform_5(%arg0: i32) -> (i32, i32, i32) {
    %c0_i32 = arith.constant 0 : i32
    %c0_i32_0 = arith.constant 0 : i32
    %c0_i32_1 = arith.constant 0 : i32
    return %arg0, %c0_i32, %c0_i32_0 : i32, i32, i32
  }
  func.func @transform_6(%arg0: i32) -> (i32, i32, i32) {
    %c0_i32 = arith.constant 0 : i32
    %c0_i32_0 = arith.constant 0 : i32
    %c0_i32_1 = arith.constant 0 : i32
    return %arg0, %c0_i32, %c0_i32_0 : i32, i32, i32
  }
  func.func @transform_7(%arg0: i32) -> (i32, i32, i32) {
    %c0_i32 = arith.constant 0 : i32
    %c0_i32_0 = arith.constant 0 : i32
    %c0_i32_1 = arith.constant 0 : i32
    return %arg0, %c0_i32, %c0_i32_0 : i32, i32, i32
  }
  func.func @transform_8(%arg0: i32) -> (i32, i32, i32) {
    %c0_i32 = arith.constant 0 : i32
    %c0_i32_0 = arith.constant 0 : i32
    %c0_i32_1 = arith.constant 0 : i32
    return %arg0, %c0_i32, %c0_i32_0 : i32, i32, i32
  }
  func.func @transform_9(%arg0: i32) -> (i32, i32, i32) {
    %c0_i32 = arith.constant 0 : i32
    %c0_i32_0 = arith.constant 0 : i32
    %c0_i32_1 = arith.constant 0 : i32
    return %arg0, %c0_i32, %c0_i32_0 : i32, i32, i32
  }
  func.func @transform_10(%arg0: i32) -> (i32, i32, i32) {
    %c0_i32 = arith.constant 0 : i32
    %c0_i32_0 = arith.constant 0 : i32
    %c0_i32_1 = arith.constant 0 : i32
    return %arg0, %c0_i32, %c0_i32_0 : i32, i32, i32
  }
  func.func @transform_11(%arg0: i32) -> (i32, i32, i32) {
    %c0_i32 = arith.constant 0 : i32
    %c0_i32_0 = arith.constant 0 : i32
    %c0_i32_1 = arith.constant 0 : i32
    return %arg0, %c0_i32, %c0_i32_0 : i32, i32, i32
  }
  func.func @transform_12(%arg0: i32) -> (i32, i32, i32) {
    %c0_i32 = arith.constant 0 : i32
    %c0_i32_0 = arith.constant 0 : i32
    %c0_i32_1 = arith.constant 0 : i32
    return %arg0, %c0_i32, %c0_i32_0 : i32, i32, i32
  }
  func.func @transform_13(%arg0: i32) -> (i32, i32, i32) {
    %c0_i32 = arith.constant 0 : i32
    %c0_i32_0 = arith.constant 0 : i32
    %c0_i32_1 = arith.constant 0 : i32
    return %arg0, %c0_i32, %c0_i32_0 : i32, i32, i32
  }
  func.func @transform_14(%arg0: i32) -> (i32, i32, i32) {
    %c0_i32 = arith.constant 0 : i32
    %c0_i32_0 = arith.constant 0 : i32
    %c0_i32_1 = arith.constant 0 : i32
    return %arg0, %c0_i32, %c0_i32_0 : i32, i32, i32
  }
  func.func @transform_15(%arg0: i32) -> (i32, i32, i32) {
    %c0_i32 = arith.constant 0 : i32
    %c0_i32_0 = arith.constant 0 : i32
    %c0_i32_1 = arith.constant 0 : i32
    return %arg0, %c0_i32, %c0_i32_0 : i32, i32, i32
  }
  func.func @transform_16(%arg0: i32) -> (i32, i32, i32) {
    %c0_i32 = arith.constant 0 : i32
    %c0_i32_0 = arith.constant 0 : i32
    %c0_i32_1 = arith.constant 0 : i32
    return %arg0, %c0_i32, %c0_i32_0 : i32, i32, i32
  }
  func.func @transform_17(%arg0: i32) -> (i32, i32) {
    %c0_i32 = arith.constant 0 : i32
    %c0_i32_0 = arith.constant 0 : i32
    %c0_i32_1 = arith.constant 0 : i32
    return %c0_i32, %c0_i32_0 : i32, i32
  }
  func.func @transform_18(%arg0: i32) -> (i32, i32) {
    %c0_i32 = arith.constant 0 : i32
    %c0_i32_0 = arith.constant 0 : i32
    %c0_i32_1 = arith.constant 0 : i32
    return %c0_i32, %c0_i32_0 : i32, i32
  }
  func.func @transform_19(%arg0: i32) -> (i32, i32) {
    %c0_i32 = arith.constant 0 : i32
    %c0_i32_0 = arith.constant 0 : i32
    %c0_i32_1 = arith.constant 0 : i32
    return %c0_i32, %c0_i32_0 : i32, i32
  }
}

</mosaic_0001>

<bundles_post_ra>
// kernel: eq.15
= control target key start
LH: loop header
LB: loop body
LE: loop exit
PB: predicated region body
PF: predicated region fallthrough
CT: control target
= control target key end

     0   :  { %vm8_vm0 = vcmask 64512   ;;  %vm14_vm1 = vcmask 130112   ;;  %s42_s0 = inlined_call_operand.vmem [shape: s32[2,8], index: 0, kind: input, shape index: {}]   ;;  %s43_s1 = inlined_call_operand.vmem [shape: s32[16], index: 1, kind: output, shape index: {}]  }
   0x1   :  { %v5_v0 = vld [vmem:[%s42_s0] sm:$0x3]  ;;  %s25_s0 = smov 8  }
   0x2   :  { %6 = vst [vmem:[#allocation1] sm:$0x3] %v5_v0 }
   0x9   :  { %v11_v1 = vld [vmem:[#allocation1 + $0x1] sm:$0x1]   ;;  %v7_v2 = vld [vmem:[#allocation1] sm:$0x1]  }
   0xa   :  { %12 = vrot.lane.b32.xlu0 %v11_v1, %s25_s0  ;;  %9 = vst.msk [vmem:[#allocation0] sm:$0x1] %vm8_vm0, %v7_v2  }
  0x7c   :  { %v13_v3 = vpop.permute.xlu0 %12  }
  0x7d   :  { %15 = vst.msk [vmem:[#allocation0] sm:$0x1] %vm14_vm1, %v13_v3  }
  0x84   :  { %v20_v4 = vld [vmem:[#allocation0] sm:$0x1] }
  0x85   :  { %23 = vst [vmem:[%s43_s1] sm:$0x1] %v20_v4 }

// kernel: tiny_trans_forward.1
= control target key start
LH: loop header
LB: loop body
LE: loop exit
PB: predicated region body
PF: predicated region fallthrough
CT: control target
= control target key end

     0   :  { %s12676_s0 = inlined_call_operand.vmem [shape: f32[16,128], index: 0, kind: input, shape index: {}]   ;;  %s12677_s1 = inlined_call_operand.hbm [shape: bf16[256,128], index: 1, kind: input, shape index: {}]   ;;  %s12678_s2 = inlined_call_operand.hbm [shape: f32[1,256], index: 2, kind: input, shape index: {}]   ;;  %s12679_s3 = inlined_call_operand.vmem [shape: f32[16,16], index: 3, kind: input, shape index: {}]   ;;  %s12680_s4 = inlined_call_operand.vmem [shape: f32[2,16], index: 4, kind: input, shape index: {}]   ;;  %s12681_s5 = inlined_call_operand.hbm [shape: bf16[4,768,256], index: 5, kind: input, shape index: {}]   ;;  %s12682_s6 = inlined_call_operand.hbm [shape: f32[4,1,768], index: 6, kind: input, shape index: {}]   ;;  %s12683_s7 = inlined_call_operand.hbm [shape: bf16[4,256,256], index: 7, kind: input, shape index: {}]   ;;  %s12684_s8 = inlined_call_operand.hbm [shape: f32[4,1,256], index: 8, kind: input, shape index: {}]   ;;  %s12685_s9 = inlined_call_operand.hbm [shape: f32[4,1,256], index: 9, kind: input, shape index: {}]   ;;  %s12686_s10 = inlined_call_operand.hbm [shape: f32[4,1,256], index: 10, kind: input, shape index: {}]   ;;  %s12687_s11 = inlined_call_operand.hbm [shape: bf16[4,2048,256], index: 11, kind: input, shape index: {}]   ;;  %s12688_s12 = inlined_call_operand.hbm [shape: f32[4,1,2048], index: 12, kind: input, shape index: {}]   ;;  %s12689_s13 = inlined_call_operand.hbm [shape: bf16[4,256,2048], index: 13, kind: input, shape index: {}]   ;;  %s12690_s14 = inlined_call_operand.hbm [shape: f32[4,1,256], index: 14, kind: input, shape index: {}]   ;;  %s12691_s15 = inlined_call_operand.hbm [shape: f32[4,1,256], index: 15, kind: input, shape index: {}]   ;;  %s12692_s16 = inlined_call_operand.hbm [shape: f32[4,1,256], index: 16, kind: input, shape index: {}]   ;;  %s12693_s17 = inlined_call_operand.hbm [shape: bf16[128,256], index: 17, kind: input, shape index: {}]   ;;  %s12694_s18 = inlined_call_operand.hbm [shape: f32[1,128], index: 18, kind: input, shape index: {}]   ;;  %s12695_s19 = inlined_call_operand.vmem [shape: f32[2,128], index: 19, kind: output, shape index: {}]  }
   0x1   :  { %12724 = sst [smem:[#allocation35_spill]] %s12676_s0 }
   0x2   :  { %12725 = sst [smem:[#allocation36_spill]] %s12677_s1 }
   0x3   :  { %12726 = sst [smem:[#allocation37_spill]] %s12678_s2 }
   0x4   :  { %12727 = sst [smem:[#allocation38_spill]] %s12679_s3 }
   0x5   :  { %12728 = sst [smem:[#allocation39_spill]] %s12680_s4 }
   0x6   :  { %12729 = sst [smem:[#allocation40_spill]] %s12681_s5 }
   0x7   :  { %12730 = sst [smem:[#allocation41_spill]] %s12682_s6 }
   0x8   :  { %12731 = sst [smem:[#allocation42_spill]] %s12683_s7 }
   0x9   :  { %12732 = sst [smem:[#allocation43_spill]] %s12691_s15 }
   0xa   :  { %12733 = sst [smem:[#allocation44_spill]] %s12692_s16 }
   0xb   :  { %12734 = sst [smem:[#allocation45_spill]] %s12693_s17 }
   0xc   :  { %12735 = sst [smem:[#allocation46_spill]] %s12694_s18 }
   0xd   :  { %12736 = sst [smem:[#allocation47_spill]] %s12695_s19 }
   0xe   :  { %24 = vsyncpa [#allocation5], 0 }
   0xf   :  { %25 = vsyncpa [#allocation7], 0 }
  0x10   :  { %26 = vsyncpa [#allocation22], 0  ;;  %s10914_s0 = smov 0   ;;  %s10916_s30 = smov 0  }
  0x11   :  { %s10918_s20 = smov 0   ;;  %s10920_s21 = smov 0  }
  0x12 LB: > { %12737 = sst [smem:[#allocation28_spill]] %s10779_s30  ;;  %s10933_s1 = sadd.s32 4294967295, %s10787_s21   ;;  %s10787_s21 = sphi %s10920_s21, %s12792_s21   ;;  %s10783_s20 = sphi %s10918_s20, %s12795_s20   ;;  %s10779_s30 = sphi %s10916_s30, %s12794_s30   ;;  %s10775_s0 = sphi %s10914_s0, %s12793_s0  }
  0x13   : > { %12738 = sst [smem:[#allocation29_spill]] %s10783_s20  ;;  %s10936_s22 = sadd.s32 1, %s10787_s21  }
  0x14   : > { %12739 = sst [smem:[#allocation30_spill]] %s10933_s1  ;;  %s141_s2 = ssub.s32 %s10787_s21, %s10936_s22 }
  0x15   : > { %12740 = sst [smem:[#allocation31_spill]] %s10936_s22  ;;  %s144_s23 = sadd.s32 1, %s10783_s20 }
  0x16   : > { %p142_p0 = scmp.eq.s32.totalorder %s141_s2, 0  ;;  %p151_p1 = scmp.ne.s32.totalorder %s10783_s20, %s10779_s30 }
  0x17   : > { %p152_p2 = scmp.eq.s32.totalorder %s10787_s21, 0  ;;  %p157_p3 = scmp.ne.s32.totalorder %s10779_s30, %s10775_s0 }
  0x18   : > { %s10946_s24 = scalar_select %p142_p0, %s10783_s20, %s144_s23  }
  0x19   : > { %p10948_p4 = por %p152_p2, %p151_p1  ;;  %p12698_p5 = scmp.eq.s32.totalorder %s10933_s1, 0 }
  0x1a   : > { %12741 = sst [smem:[#allocation32_spill]] %s10946_s24  ;;  %p8471_p6 = scmp.ge.s32.totalorder %s10787_s21, 1 }
  0x1b   : > { %p517_p7 = scmp.lt.s32.totalorder %s10787_s21, 5  ;;  %p10957_p8 = por %p12698_p5, %p157_p3 }
  0x1c   : > { %s10789_s27 = smov [#allocation4]   ;;  %p9554_p13 = scmp.lt.s32.totalorder %s10787_s21, 4 }
  0x1d   : > { %s12743_s3 = scalar_select %p10957_p8, 1, 0 }
  0x1e   : > { %p10962_p10 = pnand %p8471_p6, %p517_p7  ;;  %s532_s28 = sshll.u32 %s10789_s27, 4  ;;  %s533_s28 = int_to_ptr.vmem [resolvable:$true] %s532_s28 }
  0x1f   : > { %12744 = sst [smem:[#allocation33_spill]] %s12743_s3  ;;  %p10977_p0 = pnand %p9554_p13, %p10948_p4 }
  0x20   : > { %s12745_s26 = scalar_select %p10962_p10, 1, 0 }
  0x21   : > { %p9500_p11 = pneg %p10962_p10  ;;  %s10308_s2 = scalar_lea.vmem %s533_s28, 2048 }
  0x22   : > { %12746 = sst [smem:[#allocation34_spill]] %s12745_s26  ;;  %p10309_p2 = scmp.ne.s32.totalorder %s533_s28, %s10308_s2 }
  0x23   : > { %p10970_p12 = pnand %p9500_p11, %p12698_p5  ;;  %p10316_p7 = scmp.lt.s32.totalorder %s533_s28, %s533_s28 }
  0x24   : > { %p10317_p11 = scmp.lt.s32.totalorder %s10308_s2, %s10308_s2 }
  0x25   : > { %s12747_s29 = scalar_select %p10970_p12, 1, 0 }
  0x26   : > { %p12709_p1 = pneg %p10970_p12  ;;  %p10318_p9 = por %p10317_p11, %p10316_p7 }
  0x28   : > { %p10311_p3 = pnand %p10309_p2, %p12709_p1 }
  0x2a   : > { %p10312_p6 = pneg %p10311_p3 }
  0x2c   : > { %p10319_p5 = pnand %p10318_p9, %p10312_p6 }
  0x2e   : > { %10322 = shalt.err (!%p10319_p5)
}
  0x2f   : > { %s12708_s23 = smov 64   ;;  %s10791_s25 = smov 4  }
  0x30   : > { %s12749_s22 = sld [smem:[#allocation36_spill]]  ;;  %s587_s19 = sand.u32 1, %s10787_s21  }
  0x31   : > { %s10995_s4 = sand.u32 1, %s10783_s20   ;;  %s9455_s30 = smul.u32 12288, %s10787_s21 }
  0x32   : > { %s9454_s2 = smul.u32 768, %s10995_s4  ;;  %s12750_s5 = sld [smem:[#allocation40_spill]] }
  0x33   : > { %s9456_s1 = smul.u32 6, %s10995_s4  ;;  %p11014_p5 = pneg %p10977_p0 }
  0x34   : > { %s591_s24 = scalar_lea.vmem [#allocation8], %s9454_s2 }
  0x35   : > { %s12751_s27 = scalar_select %p11014_p5, 1, 0 }
  0x36   : > { %9503 = dma.hbm_to_vmem [thread:$0]  (!%p10970_p12), %s12749_s22, 2048, %s533_s28, [#allocation5], %s12708_s23, %s12708_s23, %s10791_s25  }
  0x37   : > { %s598_s22 = sshll.u32 %s591_s24, 4  ;;  %s11008_s28 = scalar_lea.sflag [#allocation5], %s587_s19  ;;  %s11006_s22 = int_to_ptr.vmem [resolvable:$true] %s598_s22 }
  0x38   : > { %s11004_s16 = scalar_lea.hbm %s12750_s5, %s9455_s30  ;;  %s10328_s26 = scalar_lea.hbm %s12750_s5, 49152 }
  0x39   : > { %s10323_s25 = scalar_lea.hbm %s11004_s16, 12288  ;;  %p10329_p2 = scmp.lt.s32.totalorder %s11004_s16, %s12750_s5 }
  0x3a   : > { %p10324_p4 = scmp.ne.s32.totalorder %s11004_s16, %s10323_s25  ;;  %p10330_p3 = scmp.lt.s32.totalorder %s10328_s26, %s10323_s25 }
  0x3c   : > { %p10326_p9 = pnand %p11014_p5, %p10324_p4  ;;  %p10331_p6 = por %p10330_p3, %p10329_p2 }
  0x3e   : > { %p10327_p13 = pneg %p10326_p9 }
  0x40   : > { %p10332_p7 = pnand %p10331_p6, %p10327_p13 }
  0x42   : > { %10335 = shalt.err (!%p10332_p7)
}
  0x43   : > { %s10336_s19 = scalar_lea.vmem %s11006_s22, 12288  ;;  %s10792_s23 = smov [#allocation8]  }
  0x44   : > { %p10337_p11 = scmp.ne.s32.totalorder %s11006_s22, %s10336_s19  ;;  %s10341_s18 = sshll.u32 %s10792_s23, 4  ;;  %s10342_s18 = int_to_ptr.vmem [resolvable:$false] %s10341_s18 }
  0x45   : > { %s10343_s30 = scalar_lea.vmem %s10342_s18, 24576  ;;  %p10344_p1 = scmp.lt.s32.totalorder %s11006_s22, %s10342_s18 }
  0x46   : > { %p10339_p4 = pnand %p10337_p11, %p11014_p5  ;;  %p10345_p8 = scmp.lt.s32.totalorder %s10343_s30, %s10336_s19 }
  0x48   : > { %p10340_p9 = pneg %p10339_p4  ;;  %p10346_p10 = por %p10345_p8, %p10344_p1 }
  0x4a   : > { %p10347_p12 = pnand %p10346_p10, %p10340_p9 }
  0x4c   : > { %10350 = shalt.err (!%p10347_p12)
}
  0x4d   : > { %s12716_s25 = smov 128   ;;  %s12718_s26 = smov 8  }
  0x4e   : > { %9516 = dma.hbm_to_vmem [thread:$0]  (!%p10977_p0), %s11004_s16, 12288, %s11006_s22, %s11008_s28, %s12716_s25, %s12716_s25, %s12718_s26  }
  0x4f   : > { %s9457_s23 = smul.u32 96, %s10787_s21  ;;  %s612_s2 = scalar_lea.vmem [#allocation9], %s9456_s1 }
  0x50   : > { %s620_s24 = sshll.u32 %s612_s2, 4  ;;  %s9250_s19 = sshll.u32 %s10787_s21, 12  ;;  %s621_s24 = int_to_ptr.vmem [resolvable:$true] %s620_s24 }
  0x51   : > { %s12752_s6 = sld [smem:[#allocation41_spill]] }
  0x52   : > { %s12753_s7 = sld [smem:[#allocation42_spill]] }
  0x57   : > { %s618_s3 = scalar_lea.hbm %s12752_s6, %s9457_s23  ;;  %s10356_s1 = scalar_lea.hbm %s12752_s6, 384 }
  0x58   : > { %s11050_s17 = scalar_lea.hbm %s12753_s7, %s9250_s19  ;;  %s10351_s15 = scalar_lea.hbm %s618_s3, 96 }
  0x59   : > { %p10352_p8 = scmp.ne.s32.totalorder %s618_s3, %s10351_s15  ;;  %p10357_p1 = scmp.lt.s32.totalorder %s618_s3, %s12752_s6 }
  0x5a   : > { %p10358_p13 = scmp.lt.s32.totalorder %s10356_s1, %s10351_s15 }
  0x5b   : > { %p10354_p10 = pnand %p10352_p8, %p11014_p5 }
  0x5c   : > { %p10359_p2 = por %p10358_p13, %p10357_p1 }
  0x5d   : > { %p10355_p12 = pneg %p10354_p10 }
  0x5f   : > { %p10360_p3 = pnand %p10359_p2, %p10355_p12 }
  0x61   : > { %10363 = shalt.err (!%p10360_p3)
}
  0x62   : > { %s10364_s5 = scalar_lea.vmem %s621_s24, 96  ;;  %s10795_s20 = smov [#allocation9]  }
  0x63   : > { %p10365_p6 = scmp.ne.s32.totalorder %s621_s24, %s10364_s5  ;;  %s10369_s23 = sshll.u32 %s10795_s20, 4  ;;  %s10370_s23 = int_to_ptr.vmem [resolvable:$false] %s10369_s23 }
  0x64   : > { %s10371_s19 = scalar_lea.vmem %s10370_s23, 192  ;;  %p10372_p4 = scmp.lt.s32.totalorder %s621_s24, %s10370_s23 }
  0x65   : > { %p10367_p7 = pnand %p10365_p6, %p11014_p5  ;;  %p10373_p9 = scmp.lt.s32.totalorder %s10371_s19, %s10364_s5 }
  0x67   : > { %p10368_p11 = pneg %p10367_p7  ;;  %p10374_p8 = por %p10373_p9, %p10372_p4 }
  0x69   : > { %p10375_p10 = pnand %p10374_p8, %p10368_p11 }
  0x6b   : > { %10378 = shalt.err (!%p10375_p10)
}
  0x6c   : > { %9519 = dma.hbm_to_vmem [thread:$0]  (!%p10977_p0), %s618_s3, 96, %s621_s24, %s11008_s28  }
  0x6d   : > { %s12754_s15 = sshll.u32 %s10995_s4, 8  ;;  %s11068_s30 = sshll.u32 %s10995_s4, 1 }
  0x6e   : > { %s631_s25 = scalar_lea.vmem [#allocation10], %s12754_s15  ;;  %s10379_s16 = scalar_lea.hbm %s11050_s17, 4096 }
  0x6f   : > { %s638_s18 = sshll.u32 %s631_s25, 4  ;;  %p10380_p12 = scmp.ne.s32.totalorder %s11050_s17, %s10379_s16  ;;  %s639_s18 = int_to_ptr.vmem [resolvable:$true] %s638_s18 }
  0x70   : > { %s10384_s2 = scalar_lea.hbm %s12753_s7, 16384  ;;  %p10385_p2 = scmp.lt.s32.totalorder %s11050_s17, %s12753_s7 }
  0x71   : > { %p10382_p1 = pnand %p10380_p12, %p11014_p5  ;;  %p10386_p3 = scmp.lt.s32.totalorder %s10384_s2, %s10379_s16 }
  0x73   : > { %p10383_p13 = pneg %p10382_p1  ;;  %p10387_p6 = por %p10386_p3, %p10385_p2 }
  0x75   : > { %p10388_p7 = pnand %p10387_p6, %p10383_p13 }
  0x77   : > { %10391 = shalt.err (!%p10388_p7)
}
  0x78   : > { %s10392_s3 = scalar_lea.vmem %s639_s18, 4096  ;;  %s10796_s24 = smov [#allocation10]  }
  0x79   : > { %p10393_p11 = scmp.ne.s32.totalorder %s639_s18, %s10392_s3  ;;  %s10397_s23 = sshll.u32 %s10796_s24, 4  ;;  %s10398_s23 = int_to_ptr.vmem [resolvable:$false] %s10397_s23 }
  0x7a   : > { %s10399_s19 = scalar_lea.vmem %s10398_s23, 8192  ;;  %p10400_p8 = scmp.lt.s32.totalorder %s639_s18, %s10398_s23 }
  0x7b   : > { %p10395_p4 = pnand %p10393_p11, %p11014_p5  ;;  %p10401_p10 = scmp.lt.s32.totalorder %s10399_s19, %s10392_s3 }
  0x7d   : > { %p10396_p9 = pneg %p10395_p4  ;;  %p10402_p12 = por %p10401_p10, %p10400_p8 }
  0x7f   : > { %p10403_p1 = pnand %p10402_p12, %p10396_p9 }
  0x81   : > { %10406 = shalt.err (!%p10403_p1)
}
  0x82   : > { %s12755_s15 = smov 128   ;;  %s11091_s25 = sshll.u32 %s10787_s21, 5 }
  0x83   : > { %9522 = dma.hbm_to_vmem [thread:$0]  (!%p10977_p0), %s11050_s17, 4096, %s639_s18, %s11008_s28, %s12755_s15, %s12755_s15, %s12718_s26  }
  0x84   : > { %s652_s16 = scalar_lea.vmem [#allocation11], %s11068_s30  ;;  %s658_s5 = scalar_lea.hbm %s12684_s8, %s11091_s25 }
  0x85   : > { %s660_s22 = sshll.u32 %s652_s16, 4  ;;  %s10407_s20 = scalar_lea.hbm %s658_s5, 32  ;;  %s661_s22 = int_to_ptr.vmem [resolvable:$true] %s660_s22 }
  0x86   : > { %p10408_p13 = scmp.ne.s32.totalorder %s658_s5, %s10407_s20  ;;  %s10412_s23 = scalar_lea.hbm %s12684_s8, 128 }
  0x87   : > { %p10413_p6 = scmp.lt.s32.totalorder %s658_s5, %s12684_s8  ;;  %p10414_p7 = scmp.lt.s32.totalorder %s10412_s23, %s10407_s20 }
  0x88   : > { %p10410_p2 = pnand %p10408_p13, %p11014_p5 }
  0x89   : > { %p10415_p11 = por %p10414_p7, %p10413_p6 }
  0x8a   : > { %p10411_p3 = pneg %p10410_p2 }
  0x8c   : > { %p10416_p4 = pnand %p10415_p11, %p10411_p3 }
  0x8e   : > { %10419 = shalt.err (!%p10416_p4)
}
  0x8f   : > { %s10420_s19 = scalar_lea.vmem %s661_s22, 32  ;;  %s10797_s16 = smov [#allocation11]  }
  0x90   : > { %p10421_p9 = scmp.ne.s32.totalorder %s661_s22, %s10420_s19  ;;  %s10425_s1 = sshll.u32 %s10797_s16, 4  ;;  %s10426_s1 = int_to_ptr.vmem [resolvable:$false] %s10425_s1 }
  0x91   : > { %s10427_s2 = scalar_lea.vmem %s10426_s1, 64  ;;  %p10428_p12 = scmp.lt.s32.totalorder %s661_s22, %s10426_s1 }
  0x92   : > { %p10423_p8 = pnand %p10421_p9, %p11014_p5  ;;  %p10429_p1 = scmp.lt.s32.totalorder %s10427_s2, %s10420_s19 }
  0x94   : > { %p10424_p10 = pneg %p10423_p8  ;;  %p10430_p13 = por %p10429_p1, %p10428_p12 }
  0x96   : > { %p10431_p2 = pnand %p10430_p13, %p10424_p10 }
  0x98   : > { %10434 = shalt.err (!%p10431_p2)
}
  0x99   : > { %9525 = dma.hbm_to_vmem [thread:$0]  (!%p10977_p0), %s658_s5, 32, %s661_s22, %s11008_s28  }
  0x9a   : > { %s11115_s24 = scalar_lea.hbm %s12685_s9, %s11091_s25  ;;  %s671_s23 = scalar_lea.vmem [#allocation12], %s11068_s30 }
  0x9b   : > { %s679_s17 = sshll.u32 %s671_s23, 4  ;;  %s11122_s16 = scalar_lea.hbm %s12686_s10, %s11091_s25  ;;  %s680_s17 = int_to_ptr.vmem [resolvable:$true] %s679_s17 }
  0x9c   : > { %s10435_s1 = scalar_lea.hbm %s11115_s24, 32  ;;  %s10440_s2 = scalar_lea.hbm %s12685_s9, 128 }
  0x9d   : > { %p10436_p3 = scmp.ne.s32.totalorder %s11115_s24, %s10435_s1  ;;  %p10441_p11 = scmp.lt.s32.totalorder %s11115_s24, %s12685_s9 }
  0x9e   : > { %p10442_p4 = scmp.lt.s32.totalorder %s10440_s2, %s10435_s1 }
  0x9f   : > { %p10438_p6 = pnand %p10436_p3, %p11014_p5 }
  0xa0   : > { %p10443_p9 = por %p10442_p4, %p10441_p11 }
  0xa1   : > { %p10439_p7 = pneg %p10438_p6 }
  0xa3   : > { %p10444_p8 = pnand %p10443_p9, %p10439_p7 }
  0xa5   : > { %10447 = shalt.err (!%p10444_p8)
}
  0xa6   : > { %s10448_s23 = scalar_lea.vmem %s680_s17, 32  ;;  %s10798_s18 = smov [#allocation12]  }
  0xa7   : > { %p10449_p10 = scmp.ne.s32.totalorder %s680_s17, %s10448_s23  ;;  %s10453_s19 = sshll.u32 %s10798_s18, 4  ;;  %s10454_s19 = int_to_ptr.vmem [resolvable:$false] %s10453_s19 }
  0xa8   : > { %s10455_s26 = scalar_lea.vmem %s10454_s19, 64  ;;  %p10456_p13 = scmp.lt.s32.totalorder %s680_s17, %s10454_s19 }
  0xa9   : > { %p10451_p12 = pnand %p10449_p10, %p11014_p5  ;;  %p10457_p2 = scmp.lt.s32.totalorder %s10455_s26, %s10448_s23 }
  0xab   : > { %p10452_p1 = pneg %p10451_p12  ;;  %p10458_p3 = por %p10457_p2, %p10456_p13 }
  0xad   : > { %p10459_p6 = pnand %p10458_p3, %p10452_p1 }
  0xaf   : > { %10462 = shalt.err (!%p10459_p6)
}
  0xb0   : > { %9528 = dma.hbm_to_vmem [thread:$0]  (!%p10977_p0), %s11115_s24, 32, %s680_s17, %s11008_s28  }
  0xb1   : > { %s690_s1 = scalar_lea.vmem [#allocation13], %s11068_s30  ;;  %s12720_s5 = sshll.u32 %s10995_s4, 11 }
  0xb2   : > { %s698_s22 = sshll.u32 %s690_s1, 4  ;;  %s10463_s2 = scalar_lea.hbm %s11122_s16, 32  ;;  %s699_s22 = int_to_ptr.vmem [resolvable:$true] %s698_s22 }
  0xb3   : > { %p10464_p7 = scmp.ne.s32.totalorder %s11122_s16, %s10463_s2  ;;  %s10468_s3 = scalar_lea.hbm %s12686_s10, 128 }
  0xb4   : > { %p10469_p9 = scmp.lt.s32.totalorder %s11122_s16, %s12686_s10  ;;  %p10470_p8 = scmp.lt.s32.totalorder %s10468_s3, %s10463_s2 }
  0xb5   : > { %p10466_p11 = pnand %p10464_p7, %p11014_p5 }
  0xb6   : > { %p10471_p10 = por %p10470_p8, %p10469_p9 }
  0xb7   : > { %p10467_p4 = pneg %p10466_p11 }
  0xb9   : > { %p10472_p12 = pnand %p10471_p10, %p10467_p4 }
  0xbb   : > { %10475 = shalt.err (!%p10472_p12)
}
  0xbc   : > { %s10476_s24 = scalar_lea.vmem %s699_s22, 32  ;;  %s10799_s17 = smov [#allocation13]  }
  0xbd   : > { %p10477_p1 = scmp.ne.s32.totalorder %s699_s22, %s10476_s24  ;;  %s10481_s19 = sshll.u32 %s10799_s17, 4  ;;  %s10482_s19 = int_to_ptr.vmem [resolvable:$false] %s10481_s19 }
  0xbe   : > { %s10483_s1 = scalar_lea.vmem %s10482_s19, 64  ;;  %p10484_p3 = scmp.lt.s32.totalorder %s699_s22, %s10482_s19 }
  0xbf   : > { %p10479_p13 = pnand %p10477_p1, %p11014_p5  ;;  %p10485_p6 = scmp.lt.s32.totalorder %s10483_s1, %s10476_s24 }
  0xc1   : > { %p10480_p2 = pneg %p10479_p13  ;;  %p10486_p7 = por %p10485_p6, %p10484_p3 }
  0xc3   : > { %p10487_p11 = pnand %p10486_p7, %p10480_p2 }
  0xc5   : > { %10490 = shalt.err (!%p10487_p11)
}
  0xc6   : > { %9531 = dma.hbm_to_vmem [thread:$0]  (!%p10977_p0), %s11122_s16, 32, %s699_s22, %s11008_s28  }
  0xc7   : > { %s9254_s2 = sshll.u32 %s10787_s21, 15  ;;  %s709_s26 = scalar_lea.vmem [#allocation14], %s12720_s5 }
  0xc8   : > { %s716_s20 = sshll.u32 %s709_s26, 4  ;;  %s11168_s18 = scalar_lea.hbm %s12687_s11, %s9254_s2  ;;  %s717_s20 = int_to_ptr.vmem [resolvable:$true] %s716_s20 }
  0xc9   : > { %s10491_s24 = scalar_lea.hbm %s11168_s18, 32768  ;;  %s10496_s17 = scalar_lea.hbm %s12687_s11, 131072 }
  0xca   : > { %p10492_p4 = scmp.ne.s32.totalorder %s11168_s18, %s10491_s24  ;;  %p10497_p10 = scmp.lt.s32.totalorder %s11168_s18, %s12687_s11 }
  0xcb   : > { %p10498_p12 = scmp.lt.s32.totalorder %s10496_s17, %s10491_s24 }
  0xcc   : > { %p10494_p9 = pnand %p10492_p4, %p11014_p5 }
  0xcd   : > { %p10499_p1 = por %p10498_p12, %p10497_p10 }
  0xce   : > { %p10495_p8 = pneg %p10494_p9 }
  0xd0   : > { %p10500_p13 = pnand %p10499_p1, %p10495_p8 }
  0xd2   : > { %10503 = shalt.err (!%p10500_p13)
}
  0xd3   : > { %s10504_s26 = scalar_lea.vmem %s717_s20, 32768  ;;  %s10800_s3 = smov [#allocation14]  }
  0xd4   : > { %p10505_p2 = scmp.ne.s32.totalorder %s717_s20, %s10504_s26  ;;  %s10509_s23 = sshll.u32 %s10800_s3, 4  ;;  %s10510_s23 = int_to_ptr.vmem [resolvable:$false] %s10509_s23 }
  0xd5   : > { %s10511_s5 = scalar_lea.vmem %s10510_s23, 65536  ;;  %p10512_p7 = scmp.lt.s32.totalorder %s717_s20, %s10510_s23 }
  0xd6   : > { %p10507_p3 = pnand %p10505_p2, %p11014_p5  ;;  %p10513_p11 = scmp.lt.s32.totalorder %s10511_s5, %s10504_s26 }
  0xd8   : > { %p10508_p6 = pneg %p10507_p3  ;;  %p10514_p4 = por %p10513_p11, %p10512_p7 }
  0xda   : > { %p10515_p9 = pnand %p10514_p4, %p10508_p6 }
  0xdc   : > { %10518 = shalt.err (!%p10515_p9)
}
  0xdd   : > { %s12756_s24 = smov 8   ;;  %s8494_s16 = sshll.u32 %s10995_s4, 4 }
  0xde   : > { %9534 = dma.hbm_to_vmem [thread:$0]  (!%p10977_p0), %s11168_s18, 32768, %s717_s20, %s11008_s28, %s12755_s15, %s12755_s15, %s12756_s24  }
  0xdf   : > { %s9255_s22 = sshll.u32 %s10787_s21, 8  ;;  %s730_s1 = scalar_lea.vmem [#allocation15], %s8494_s16 }
  0xe0   : > { %s11195_s5 = scalar_lea.hbm %s12688_s12, %s9255_s22  ;;  %s738_s26 = sshll.u32 %s730_s1, 4  ;;  %s739_s26 = int_to_ptr.vmem [resolvable:$true] %s738_s26 }
  0xe1   : > { %s11202_s6 = scalar_lea.hbm %s12689_s13, %s9254_s2  ;;  %s10519_s20 = scalar_lea.hbm %s11195_s5, 256 }
  0xe2   : > { %p10520_p8 = scmp.ne.s32.totalorder %s11195_s5, %s10519_s20  ;;  %s10524_s17 = scalar_lea.hbm %s12688_s12, 1024 }
  0xe3   : > { %p10525_p1 = scmp.lt.s32.totalorder %s11195_s5, %s12688_s12  ;;  %p10526_p13 = scmp.lt.s32.totalorder %s10524_s17, %s10519_s20 }
  0xe4   : > { %p10522_p10 = pnand %p10520_p8, %p11014_p5 }
  0xe5   : > { %p10527_p2 = por %p10526_p13, %p10525_p1 }
  0xe6   : > { %p10523_p12 = pneg %p10522_p10 }
  0xe8   : > { %p10528_p3 = pnand %p10527_p2, %p10523_p12 }
  0xea   : > { %10531 = shalt.err (!%p10528_p3)
}
  0xeb   : > { %s10532_s21 = scalar_lea.vmem %s739_s26, 256  ;;  %s10801_s2 = smov [#allocation15]  }
  0xec   : > { %p10533_p6 = scmp.ne.s32.totalorder %s739_s26, %s10532_s21  ;;  %s10537_s16 = sshll.u32 %s10801_s2, 4  ;;  %s10538_s16 = int_to_ptr.vmem [resolvable:$false] %s10537_s16 }
  0xed   : > { %s10539_s1 = scalar_lea.vmem %s10538_s16, 512  ;;  %p10540_p4 = scmp.lt.s32.totalorder %s739_s26, %s10538_s16 }
  0xee   : > { %p10535_p7 = pnand %p10533_p6, %p11014_p5  ;;  %p10541_p9 = scmp.lt.s32.totalorder %s10539_s1, %s10532_s21 }
  0xf0   : > { %p10536_p11 = pneg %p10535_p7  ;;  %p10542_p8 = por %p10541_p9, %p10540_p4 }
  0xf2   : > { %p10543_p10 = pnand %p10542_p8, %p10536_p11 }
  0xf4   : > { %10546 = shalt.err (!%p10543_p10)
}
  0xf5   : > { %9537 = dma.hbm_to_vmem [thread:$0]  (!%p10977_p0), %s11195_s5, 256, %s739_s26, %s11008_s28  }
  0xf6   : > { %s12757_s7 = sshll.u32 %s10995_s4, 11  ;;  %s10547_s20 = scalar_lea.hbm %s11202_s6, 32768 }
  0xf7   : > { %s749_s3 = scalar_lea.vmem [#allocation16], %s12757_s7  ;;  %p10548_p12 = scmp.ne.s32.totalorder %s11202_s6, %s10547_s20 }
  0xf8   : > { %s756_s23 = sshll.u32 %s749_s3, 4  ;;  %s10552_s17 = scalar_lea.hbm %s12689_s13, 131072  ;;  %s11223_s23 = int_to_ptr.vmem [resolvable:$true] %s756_s23 }
  0xf9   : > { %p10550_p1 = pnand %p10548_p12, %p11014_p5  ;;  %p10553_p2 = scmp.lt.s32.totalorder %s11202_s6, %s12689_s13 }
  0xfa   : > { %p10554_p3 = scmp.lt.s32.totalorder %s10552_s17, %s10547_s20 }
  0xfb   : > { %p10551_p13 = pneg %p10550_p1 }
  0xfc   : > { %p10555_p6 = por %p10554_p3, %p10553_p2 }
  0xfe   : > { %p10556_p7 = pnand %p10555_p6, %p10551_p13 }
 0x100   : > { %10559 = shalt.err (!%p10556_p7)
}
 0x101   : > { %s10560_s4 = scalar_lea.vmem %s11223_s23, 32768  ;;  %s10802_s5 = smov [#allocation16]  }
 0x102   : > { %p10561_p11 = scmp.ne.s32.totalorder %s11223_s23, %s10560_s4  ;;  %s10565_s26 = sshll.u32 %s10802_s5, 4  ;;  %s10566_s26 = int_to_ptr.vmem [resolvable:$false] %s10565_s26 }
 0x103   : > { %s10567_s2 = scalar_lea.vmem %s10566_s26, 65536  ;;  %p10568_p8 = scmp.lt.s32.totalorder %s11223_s23, %s10566_s26 }
 0x104   : > { %p10563_p4 = pnand %p10561_p11, %p11014_p5  ;;  %p10569_p10 = scmp.lt.s32.totalorder %s10567_s2, %s10560_s4 }
 0x106   : > { %p10564_p9 = pneg %p10563_p4  ;;  %p10570_p12 = por %p10569_p10, %p10568_p8 }
 0x108   : > { %p10571_p1 = pnand %p10570_p12, %p10564_p9 }
 0x10a   : > { %10574 = shalt.err (!%p10571_p1)
}
 0x10b   : > { %s10803_s16 = smov 1024   ;;  %s12758_s1 = smov 64  }
 0x10c   : > { %9540 = dma.hbm_to_vmem [thread:$0]  (!%p10977_p0), %s11202_s6, 32768, %s11223_s23, %s11008_s28, %s10803_s16, %s10803_s16, %s12758_s1  }
 0x10d   : > { %s776_s20 = scalar_lea.hbm %s12690_s14, %s11091_s25  ;;  %s770_s18 = scalar_lea.vmem [#allocation17], %s11068_s30 }
 0x10e   : > { %s778_s22 = sshll.u32 %s770_s18, 4  ;;  %s10575_s17 = scalar_lea.hbm %s776_s20, 32  ;;  %s779_s22 = int_to_ptr.vmem [resolvable:$true] %s778_s22 }
 0x10f   : > { %p10576_p13 = scmp.ne.s32.totalorder %s776_s20, %s10575_s17  ;;  %s10580_s4 = scalar_lea.hbm %s12690_s14, 128 }
 0x110   : > { %p10581_p6 = scmp.lt.s32.totalorder %s776_s20, %s12690_s14  ;;  %p10582_p7 = scmp.lt.s32.totalorder %s10580_s4, %s10575_s17 }
 0x111   : > { %p10578_p2 = pnand %p10576_p13, %p11014_p5 }
 0x112   : > { %p10583_p11 = por %p10582_p7, %p10581_p6 }
 0x113   : > { %p10579_p3 = pneg %p10578_p2 }
 0x115   : > { %p10584_p4 = pnand %p10583_p11, %p10579_p3 }
 0x117   : > { %10587 = shalt.err (!%p10584_p4)
}
 0x118   : > { %s10588_s6 = scalar_lea.vmem %s779_s22, 32  ;;  %s10804_s23 = smov [#allocation17]  }
 0x119   : > { %p10589_p9 = scmp.ne.s32.totalorder %s779_s22, %s10588_s6  ;;  %s10593_s2 = sshll.u32 %s10804_s23, 4  ;;  %s10594_s2 = int_to_ptr.vmem [resolvable:$false] %s10593_s2 }
 0x11a   : > { %s10595_s16 = scalar_lea.vmem %s10594_s2, 64  ;;  %p10596_p12 = scmp.lt.s32.totalorder %s779_s22, %s10594_s2 }
 0x11b   : > { %p10591_p8 = pnand %p10589_p9, %p11014_p5  ;;  %p10597_p1 = scmp.lt.s32.totalorder %s10595_s16, %s10588_s6 }
 0x11d   : > { %p10592_p10 = pneg %p10591_p8  ;;  %p10598_p13 = por %p10597_p1, %p10596_p12 }
 0x11f   : > { %p10599_p2 = pnand %p10598_p13, %p10592_p10 }
 0x121   : > { %10602 = shalt.err (!%p10599_p2)
}
 0x122   : > { %9543 = dma.hbm_to_vmem [thread:$0]  (!%p10977_p0), %s776_s20, 32, %s779_s22, %s11008_s28  }
 0x123   : > { %s10805_s1 = smov [#allocation6]   ;;  %s12759_s17 = sld [smem:[#allocation43_spill]] }
 0x124   : > { %s546_s7 = sshll.u32 %s10805_s1, 4  ;;  %p12760_p6 = scmp.ne.s32.totalorder %s12747_s29, 0  ;;  %s547_s7 = int_to_ptr.vmem [resolvable:$true] %s546_s7 }
 0x125   : > { %s10614_s21 = scalar_lea.vmem %s547_s7, 32  ;;  %p10622_p9 = scmp.lt.s32.totalorder %s547_s7, %s547_s7 }
 0x126   : > { %p10615_p3 = scmp.ne.s32.totalorder %s547_s7, %s10614_s21  ;;  %p12761_p7 = pneg %p12760_p6 }
 0x127   : > { %p10623_p8 = scmp.lt.s32.totalorder %s10614_s21, %s10614_s21 }
 0x128   : > { %p10617_p11 = pnand %p10615_p3, %p12761_p7 }
 0x129   : > { %s11269_s19 = scalar_lea.hbm %s12759_s17, %s11091_s25  ;;  %p10624_p10 = por %p10623_p8, %p10622_p9 }
 0x12a   : > { %p10618_p4 = pneg %p10617_p11 }
 0x12c   : > { %p10625_p12 = pnand %p10624_p10, %p10618_p4 }
 0x12e   : > { %10628 = shalt.err (!%p10625_p12)
}
 0x12f   : > { %s12762_s4 = sld [smem:[#allocation37_spill]]  ;;  %s789_s5 = scalar_lea.vmem [#allocation18], %s11068_s30 }
 0x130   : > { %s797_s26 = sshll.u32 %s789_s5, 4  ;;  %s10806_s6 = smov [#allocation20]   ;;  %s798_s26 = int_to_ptr.vmem [resolvable:$true] %s797_s26 }
 0x131   : > { %s562_s23 = sshll.u32 %s10806_s6, 4  ;;  %s10629_s2 = scalar_lea.hbm %s11269_s19, 32  ;;  %s563_s23 = int_to_ptr.vmem [resolvable:$true] %s562_s23 }
 0x132   : > { %p10630_p1 = scmp.ne.s32.totalorder %s11269_s19, %s10629_s2  ;;  %s10634_s3 = scalar_lea.hbm %s12759_s17, 128 }
 0x133   : > { %p10635_p3 = scmp.lt.s32.totalorder %s11269_s19, %s12759_s17  ;;  %p10636_p7 = scmp.lt.s32.totalorder %s10634_s3, %s10629_s2 }
 0x134   : > { %p10632_p13 = pnand %p10630_p1, %p11014_p5 }
 0x135   : > { %9506 = dma.hbm_to_vmem [thread:$0]  (!%p12760_p6), %s12762_s4, 32, %s547_s7, [#allocation7]  }
 0x136   : > { %p10633_p2 = pneg %p10632_p13  ;;  %p10637_p11 = por %p10636_p7, %p10635_p3 }
 0x138   : > { %p10638_p4 = pnand %p10637_p11, %p10633_p2 }
 0x13a   : > { %10641 = shalt.err (!%p10638_p4)
}
 0x13b   : > { %s10642_s7 = scalar_lea.vmem %s798_s26, 32  ;;  %s10807_s20 = smov [#allocation18]  }
 0x13c   : > { %p10643_p9 = scmp.ne.s32.totalorder %s798_s26, %s10642_s7  ;;  %s10647_s22 = sshll.u32 %s10807_s20, 4  ;;  %s10648_s22 = int_to_ptr.vmem [resolvable:$false] %s10647_s22 }
 0x13d   : > { %s10649_s4 = scalar_lea.vmem %s10648_s22, 64  ;;  %p10650_p12 = scmp.lt.s32.totalorder %s798_s26, %s10648_s22 }
 0x13e   : > { %p10645_p8 = pnand %p10643_p9, %p11014_p5  ;;  %p10651_p1 = scmp.lt.s32.totalorder %s10649_s4, %s10642_s7 }
 0x140   : > { %p10646_p10 = pneg %p10645_p8  ;;  %p10652_p13 = por %p10651_p1, %p10650_p12 }
 0x142   : > { %p10653_p6 = pnand %p10652_p13, %p10646_p10 }
 0x144   : > { %10656 = shalt.err (!%p10653_p6)
}
 0x145   : > { %9546 = dma.hbm_to_vmem [thread:$0]  (!%p10977_p0), %s11269_s19, 32, %s798_s26, %s11008_s28  }
 0x146   : > { %s10668_s5 = scalar_lea.vmem %s563_s23, 2048  ;;  %p12763_p3 = scmp.ne.s32.totalorder %s12747_s29, 0 }
 0x147   : > { %p10669_p2 = scmp.ne.s32.totalorder %s563_s23, %s10668_s5  ;;  %p10676_p9 = scmp.lt.s32.totalorder %s563_s23, %s563_s23 }
 0x148   : > { %p12764_p7 = pneg %p12763_p3  ;;  %p10677_p8 = scmp.lt.s32.totalorder %s10668_s5, %s10668_s5 }
 0x14a   : > { %p10671_p11 = pnand %p10669_p2, %p12764_p7  ;;  %p10678_p5 = por %p10677_p8, %p10676_p9 }
 0x14c   : > { %p10672_p4 = pneg %p10671_p11 }
 0x14e   : > { %p10679_p1 = pnand %p10678_p5, %p10672_p4 }
 0x150   : > { %10682 = shalt.err (!%p10679_p1)
}
 0x151   : > { %s12765_s19 = sld [smem:[#allocation45_spill]]  ;;  %s10808_s26 = smov [#allocation21]  }
 0x152   : > { %s576_s16 = sshll.u32 %s10808_s26, 4  ;;  %s12766_s18 = sld [smem:[#allocation44_spill]]  ;;  %s577_s16 = int_to_ptr.vmem [resolvable:$true] %s576_s16 }
 0x153   : > { %s10694_s7 = scalar_lea.vmem %s577_s16, 16  ;;  %p12767_p6 = pmov %p12764_p7 }
 0x154   : > { %p10695_p5 = scmp.ne.s32.totalorder %s577_s16, %s10694_s7  ;;  %s10701_s20 = scalar_lea.vmem %s577_s16, 32 }
 0x155   : > { %p10702_p13 = scmp.lt.s32.totalorder %s577_s16, %s577_s16  ;;  %p10703_p2 = scmp.lt.s32.totalorder %s10701_s20, %s10694_s7 }
 0x156   : > { %p10697_p10 = pnand %p10695_p5, %p12767_p6 }
 0x157   : > { %9509 = dma.hbm_to_vmem [thread:$0]  (!%p12763_p3), %s12765_s19, 2048, %s563_s23, [#allocation7], %s12755_s15, %s12755_s15, %s12756_s24  }
 0x158   : > { %s11312_s21 = scalar_lea.hbm %s12766_s18, %s11091_s25  ;;  %p10698_p12 = pneg %p10697_p10 }
 0x159   : > { %p10704_p7 = por %p10703_p2, %p10702_p13 }
 0x15b   : > { %p10705_p11 = pnand %p10704_p7, %p10698_p12 }
 0x15d   : > { %10708 = shalt.err (!%p10705_p11)
}
 0x15e   : > { %s12768_s23 = sld [smem:[#allocation46_spill]]  ;;  %s808_s25 = scalar_lea.vmem [#allocation19], %s11068_s30 }
 0x15f   : > { %s816_s22 = sshll.u32 %s808_s25, 4  ;;  %s10709_s4 = scalar_lea.hbm %s11312_s21, 32  ;;  %s817_s22 = int_to_ptr.vmem [resolvable:$true] %s816_s22 }
 0x160   : > { %p10710_p4 = scmp.ne.s32.totalorder %s11312_s21, %s10709_s4  ;;  %p12769_p9 = scmp.ne.s32.totalorder %s12751_s27, 0 }
 0x161   : > { %s10714_s29 = scalar_lea.hbm %s12766_s18, 128  ;;  %p10715_p5 = scmp.lt.s32.totalorder %s11312_s21, %s12766_s18 }
 0x162   : > { %p10712_p8 = pnand %p10710_p4, %p12769_p9  ;;  %p10716_p6 = scmp.lt.s32.totalorder %s10714_s29, %s10709_s4 }
 0x164   : > { %9512 = dma.hbm_to_vmem [thread:$0]  (!%p12763_p3), %s12768_s23, 16, %s577_s16, [#allocation22]  }
 0x165   : > { %p10713_p1 = pneg %p10712_p8  ;;  %p10717_p10 = por %p10716_p6, %p10715_p5 }
 0x167   : > { %p10718_p12 = pnand %p10717_p10, %p10713_p1 }
 0x169   : > { %10721 = shalt.err (!%p10718_p12)
}
 0x16a   : > { %s10722_s30 = scalar_lea.vmem %s817_s22, 32  ;;  %s10809_s26 = smov [#allocation19]  }
 0x16b   : > { %p10723_p3 = scmp.ne.s32.totalorder %s817_s22, %s10722_s30  ;;  %s10727_s16 = sshll.u32 %s10809_s26, 4  ;;  %s10728_s16 = int_to_ptr.vmem [resolvable:$false] %s10727_s16 }
 0x16c   : > { %s10729_s1 = scalar_lea.vmem %s10728_s16, 64  ;;  %p10730_p7 = scmp.lt.s32.totalorder %s817_s22, %s10728_s16 }
 0x16d   : > { %p10725_p13 = pnand %p10723_p3, %p12769_p9  ;;  %p10731_p11 = scmp.lt.s32.totalorder %s10729_s1, %s10722_s30 }
 0x16f   : > { %p10726_p2 = pneg %p10725_p13  ;;  %p10732_p4 = por %p10731_p11, %p10730_p7 }
 0x171   : > { %p10733_p8 = pnand %p10732_p4, %p10726_p2 }
 0x173   : > { %10736 = shalt.err (!%p10733_p8)
}
 0x174   : > { %9549 = dma.hbm_to_vmem [thread:$0]  (!%p10977_p0), %s11312_s21, 32, %s817_s22, %s11008_s28  }
 0x175   : > { %s12770_s3 = sld [smem:[#allocation34_spill]] }
 0x17b   : > { %p12771_p1 = scmp.ne.s32.totalorder %s12770_s3, 0 }
 0x17c   : > { %s12772_s27 = sld [smem:[#allocation30_spill]] (!%p12771_p1) }
 0x17d   : > { %825 = sbr.rel (%p12771_p1) target bundleno = 4916 (0x1334), region = 96 }
 0x182   : > { %p12773_p9 = scmp.eq.s32.totalorder %s12772_s27, 0 }
 0x184   : > { %10754 = dma.done.wait (%p12773_p9), [#allocation5], 2048   ;;  %p12774_p5 = pmov %p12773_p9 }
 0x186   : > { %10756 = vsyncadd (%p12774_p5), [#allocation5], 4294965248  ;;  %p12775_p6 = pmov %p12774_p5 }
 0x187   : > { %p12776_p10 = pmov %p12774_p5 }
 0x188   : > { %10758 = dma.done.wait (%p12775_p6), [#allocation7], 32  }
 0x189   : > { %10760 = vsyncadd (%p12776_p10), [#allocation7], 4294967264  ;;  %s12777_s0 = sld [smem:[#allocation28_spill]]  ;;  %s835_s20 = sand.u32 1, %s12772_s27  }
 0x18a   : > { %s12778_s7 = sld [smem:[#allocation33_spill]]  ;;  %s836_s15 = scalar_lea.sflag [#allocation5], %s835_s20 }
 0x18f   : > { %s837_s28 = sand.u32 1, %s12777_s0  }
 0x190   : > { %s9458_s21 = smul.u32 768, %s837_s28  ;;  %p12779_p0 = scmp.ne.s32.totalorder %s12778_s7, 0 }
 0x192   : > { %s11352_s24 = scalar_lea.vmem [#allocation8], %s9458_s21 }
 0x193   : > { %10762 = dma.done.wait (%p12779_p0), %s836_s15, 82464  }
 0x194   : > { %10764 = vsyncadd (%p12779_p0), %s836_s15, 4294884832  ;;  %s9459_s23 = smul.u32 6, %s837_s28  ;;  %s8512_s25 = sshll.u32 %s837_s28, 8 }
 0x195   : > { %s11358_s22 = sshll.u32 %s837_s28, 1  ;;  %s8516_s4 = sshll.u32 %s837_s28, 11 }
 0x196   : > { %s8517_s5 = sshll.u32 %s837_s28, 4  ;;  %s11360_s6 = scalar_lea.vmem [#allocation9], %s9459_s23 }
 0x197   : > { %s11362_s29 = scalar_lea.vmem [#allocation10], %s8512_s25  ;;  %s866_s2 = scalar_lea.vmem [#allocation11], %s11358_s22 }
 0x198   : > { %s875_s19 = scalar_lea.vmem [#allocation12], %s11358_s22  ;;  %s884_s30 = scalar_lea.vmem [#allocation13], %s11358_s22 }
 0x199   : > { %s11367_s26 = scalar_lea.vmem [#allocation14], %s8516_s4  ;;  %s11369_s16 = scalar_lea.vmem [#allocation15], %s8517_s5 }
 0x19a   : > { %s11371_s1 = scalar_lea.vmem [#allocation16], %s8516_s4  ;;  %s920_s3 = scalar_lea.vmem [#allocation17], %s11358_s22 }
 0x19b   : > { %s929_s0 = scalar_lea.vmem [#allocation18], %s11358_s22  ;;  %s938_s7 = scalar_lea.vmem [#allocation19], %s11358_s22 }
 0x19c   : > { %p12780_p12 = pmov %p12774_p5 }
 0x19d   : > { %p12781_p3 = pmov %p12774_p5 }
 0x19e   : > { %10766 = dma.done.wait (%p12780_p12), [#allocation7], 2048  }
 0x19f   : > { %10768 = vsyncadd (%p12781_p3), [#allocation7], 4294965248  ;;  %p12782_p13 = pmov %p12781_p3 }
 0x1a0   : > { %p12783_p2 = pmov %p12781_p3 }
 0x1a1   : > { %10770 = dma.done.wait (%p12782_p13), [#allocation22], 16  }
 0x1a2   : > { %10772 = vsyncadd (%p12783_p2), [#allocation22], 4294967280  ;;  %p12784_p7 = scmp.ne.s32.totalorder %s12772_s27, 0 }
 0x1a3   : > { %s12785_s21 = sld [smem:[#allocation35_spill]] (!%p12784_p7) }
 0x1a4   : > { %1055 = sbr.rel (%p12784_p7) target bundleno = 692 (0x2b4), region = 164 }
 0x1a9   : > { %v9604_v0 = vld [vmem:[#allocation4 + $0x78] sm:$0xff]   ;;  %v9606_v2 = vld [vmem:[#allocation4 + $0x70] sm:$0xff]   ;;  %v9608_v4 = vld [vmem:[#allocation4 + $0x68] sm:$0xff]   ;;  %s12786_s15 = smov %s12785_s21  ;;  %v1093_v19 = vlaneseq }
 0x1aa   : > { %v9605_v1 = vld [vmem:[#allocation4 + $0x38] sm:$0xff]   ;;  %9260 = vmatprep.subr.bf16.mxu0 %v9604_v0  ;;  %v9607_v3 = vld [vmem:[#allocation4 + $0x30] sm:$0xff]   ;;  %v9609_v5 = vld [vmem:[#allocation4 + $0x28] sm:$0xff]  }
 0x1ab   : > { %9261 = vmatpush3.bf16.xpose.msra.mxu0 %v9605_v1  ;;  %v9610_v6 = vld [vmem:[#allocation4 + $0x60] sm:$0xff]   ;;  %v1057_v8 = vld [vmem:[%s12786_s15 + $0x8] sm:$0xff]  ;;  %v9612_v11 = vld [vmem:[#allocation4 + $0x58] sm:$0xff]   ;;  %v1094_v20 = vshrl.u32 %v1093_v19, 7 }
 0x1ac   : > { %9262 = vmatprep.subr.bf16.mxu0 %v9606_v2  ;;  %v1056_v7 = vld [vmem:[%s12785_s21] sm:$0xff]  ;;  %v9613_v12 = vld [vmem:[#allocation4 + $0x18] sm:$0xff]   ;;  %v9614_v13 = vld [vmem:[#allocation4 + $0x50] sm:$0xff]  }
 0x1ad   : > { %v1090_v9 = vpack.c.bf16 %v1057_v8, %v1056_v7  ;;  %v9611_v10 = vld [vmem:[#allocation4 + $0x20] sm:$0xff]   ;;  %v9615_v14 = vld [vmem:[#allocation4 + $0x10] sm:$0xff]   ;;  %v9616_v15 = vld [vmem:[#allocation4 + $0x48] sm:$0xff]   ;;  %v1095_v21 = vsub.s32 0, %v1094_v20  ;;  %v1099_v23 = vsub.s32 1, %v1094_v20 }
 0x1ae   : > { %v9617_v16 = vld [vmem:[#allocation4 + $0x8] sm:$0xff]   ;;  %v9618_v17 = vld [vmem:[#allocation4 + $0x40] sm:$0xff]  }
 0x1af   : > { %9276 = vmatprep.mubr.bf16.mxu0 %v1090_v9  ;;  %v9619_v18 = vld [vmem:[#allocation4] sm:$0xff]  }
 0x1b0   : > { %v1091_v22 = vld [vmem:[#allocation6] sm:$0x3] }
 0x1b1   : > { %v1096_v24 = vrot.slane %v1091_v22, %v1095_v21  ;;  %v1100_v25 = vrot.slane %v1091_v22, %v1099_v23 }
 0x1b3   : > { %9263 = vmatpush3.bf16.xpose.msra.mxu0 %v9607_v3 }
 0x1b4   : > { %9264 = vmatprep.subr.bf16.mxu0 %v9608_v4 }
 0x1bb   : > { %9265 = vmatpush3.bf16.xpose.msra.mxu0 %v9609_v5 }
 0x1bc   : > { %9266 = vmatprep.subr.bf16.mxu0 %v9610_v6 }
 0x1c3   : > { %9267 = vmatpush3.bf16.xpose.msra.mxu0 %v9611_v10 }
 0x1c4   : > { %9268 = vmatprep.subr.bf16.mxu0 %v9612_v11 }
 0x1cb   : > { %9269 = vmatpush3.bf16.xpose.msra.mxu0 %v9613_v12 }
 0x1cc   : > { %9270 = vmatprep.subr.bf16.mxu0 %v9614_v13 }
 0x1d3   : > { %9271 = vmatpush3.bf16.xpose.msra.mxu0 %v9615_v14 }
 0x1d4   : > { %9272 = vmatprep.subr.bf16.mxu0 %v9616_v15 }
 0x1db   : > { %9273 = vmatpush3.bf16.xpose.msra.mxu0 %v9617_v16 }
 0x1dc   : > { %9274 = vmatprep.subr.bf16.mxu0 %v9618_v17 }
 0x1e3   : > { %9275 = vmatpush3.bf16.xpose.msra.mxu0 %v9619_v18 }
 0x1ea   : > { %9277 = vmatmul.mubr.bf16.vlgmr.msra.gmra.mxu0 %v1090_v9 }
 0x2aa   : > { %v1233_v26 = vpop.f32.mrf.mxu0 }
 0x2ab   : > { %v1234_v27 = vadd.f32 %v1233_v26, %v1096_v24 }
 0x2ac   : > { %v1235_v28 = vpop.f32.mrf.mxu0 }
 0x2ad   : > { %1242 = vst [vmem:[#allocation2 + $0x10] sm:$0xff] %v1234_v27  ;;  %v1236_v29 = vadd.f32 %v1235_v28, %v1100_v25 }
 0x2ae   : > { %v1237_v30 = vpop.f32.mrf.mxu0 }
 0x2af   : > { %1243 = vst [vmem:[#allocation2] sm:$0xff] %v1236_v29  ;;  %v1238_v31 = vadd.f32 %v1237_v30, %v1096_v24 }
 0x2b0   : > { %v1239_v32 = vpop.f32.mrf.mxu0 }
 0x2b1   : > { %1244 = vst [vmem:[#allocation2 + $0x18] sm:$0xff] %v1238_v31  ;;  %v1240_v33 = vadd.f32 %v1239_v32, %v1100_v25 }
 0x2b3   : > { %1245 = vst [vmem:[#allocation2 + $0x8] sm:$0xff] %v1240_v33 }
 0x2b4 PF: > { %v9620_v34 = vld [vmem:[%s11352_s24 + $0x74] ss:$8 sps:$4 sm:$0xff]   ;;  %v9624_v36 = vld [vmem:[%s11352_s24 + $0x70] ss:$8 sps:$4 sm:$0xff]   ;;  %v9626_v38 = vld [vmem:[%s11352_s24 + $0x64] ss:$8 sps:$4 sm:$0xff]  }
 0x2b5   : > { %v9622_v35 = vld [vmem:[%s11352_s24 + $0x174] ss:$8 sps:$4 sm:$0xff]   ;;  %1860 = vmatprep.subr.bf16.mxu0 %v9620_v34  ;;  %v9625_v37 = vld [vmem:[%s11352_s24 + $0x170] ss:$8 sps:$4 sm:$0xff]   ;;  %v9628_v39 = vld [vmem:[%s11352_s24 + $0x164] ss:$8 sps:$4 sm:$0xff]  }
 0x2b6   : > { %1903 = vmatprep.subr.bf16.mxu1 %v9622_v35  ;;  %1861 = vmatpush1.bf16.xpose.msra.mxu0 %v9624_v36  ;;  %v9630_v40 = vld [vmem:[%s11352_s24 + $0x60] ss:$8 sps:$4 sm:$0xff]   ;;  %v9632_v42 = vld [vmem:[%s11352_s24 + $0x54] ss:$8 sps:$4 sm:$0xff]   ;;  %v9636_v44 = vld [vmem:[%s11352_s24 + $0x50] ss:$8 sps:$4 sm:$0xff]  }
 0x2b7   : > { %1904 = vmatpush1.bf16.xpose.msra.mxu1 %v9625_v37  ;;  %1862 = vmatprep.subr.bf16.mxu0 %v9626_v38  ;;  %v9631_v41 = vld [vmem:[%s11352_s24 + $0x160] ss:$8 sps:$4 sm:$0xff]   ;;  %v9634_v43 = vld [vmem:[%s11352_s24 + $0x154] ss:$8 sps:$4 sm:$0xff]   ;;  %v9637_v45 = vld [vmem:[%s11352_s24 + $0x150] ss:$8 sps:$4 sm:$0xff]  }
 0x2b8   : > { %1905 = vmatprep.subr.bf16.mxu1 %v9628_v39  ;;  %v9638_v46 = vld [vmem:[%s11352_s24 + $0x44] ss:$8 sps:$4 sm:$0xff]   ;;  %v9642_v48 = vld [vmem:[%s11352_s24 + $0x40] ss:$8 sps:$4 sm:$0xff]   ;;  %v9644_v50 = vld [vmem:[%s11352_s24 + $0x34] ss:$8 sps:$4 sm:$0xff]  }
 0x2b9   : > { %v9640_v47 = vld [vmem:[%s11352_s24 + $0x144] ss:$8 sps:$4 sm:$0xff]   ;;  %v9643_v49 = vld [vmem:[%s11352_s24 + $0x140] ss:$8 sps:$4 sm:$0xff]   ;;  %v9646_v51 = vld [vmem:[%s11352_s24 + $0x134] ss:$8 sps:$4 sm:$0xff]  }
 0x2ba   : > { %v9648_v52 = vld [vmem:[%s11352_s24 + $0x30] ss:$8 sps:$4 sm:$0xff]   ;;  %v9650_v54 = vld [vmem:[%s11352_s24 + $0x24] ss:$8 sps:$4 sm:$0xff]   ;;  %v9654_v56 = vld [vmem:[%s11352_s24 + $0x20] ss:$8 sps:$4 sm:$0xff]  }
 0x2bb   : > { %v9649_v53 = vld [vmem:[%s11352_s24 + $0x130] ss:$8 sps:$4 sm:$0xff]   ;;  %v9652_v55 = vld [vmem:[%s11352_s24 + $0x124] ss:$8 sps:$4 sm:$0xff]   ;;  %v9655_v57 = vld [vmem:[%s11352_s24 + $0x120] ss:$8 sps:$4 sm:$0xff]  }
 0x2bc   : > { %v9656_v58 = vld [vmem:[%s11352_s24 + $0x14] ss:$8 sps:$4 sm:$0xff]   ;;  %v1249_v61 = vld [vmem:[#allocation2 + $0x8] sm:$0xff]  ;;  %v9660_v63 = vld [vmem:[%s11352_s24 + $0x10] ss:$8 sps:$4 sm:$0xff]   ;;  %vm1995_vm0 = vcmask 261120  }
 0x2bd   : > { %v9658_v59 = vld [vmem:[%s11352_s24 + $0x114] ss:$8 sps:$4 sm:$0xff]   ;;  %v9661_v0 = vld [vmem:[%s11352_s24 + $0x110] ss:$8 sps:$4 sm:$0xff]   ;;  %v9662_v1 = vld [vmem:[%s11352_s24 + $0x4] ss:$8 sps:$4 sm:$0xff]  }
 0x2be   : > { %1863 = vmatpush1.bf16.xpose.msra.mxu0 %v9630_v40  ;;  %v1247_v60 = vld [vmem:[#allocation2] sm:$0xff]  ;;  %v9672_v7 = vld [vmem:[%s11352_s24 + $0xf0] ss:$8 sps:$4 sm:$0xff]   ;;  %s10810_s27 = smov 96   ;;  %s10812_s4 = smov 32   ;;  %vm2083_vm1 = vcmask 130048  }
 0x2bf   : > { %1906 = vmatpush1.bf16.xpose.msra.mxu1 %v9631_v41  ;;  %1864 = vmatprep.subr.bf16.mxu0 %v9632_v42  ;;  %v11418_v62 = vpack.c.bf16 %v1249_v61, %v1247_v60  ;;  %v9664_v2 = vld [vmem:[%s11352_s24 + $0x104] ss:$8 sps:$4 sm:$0xff]   ;;  %v9666_v3 = vld [vmem:[%s11352_s24] ss:$8 sps:$4 sm:$0xff]   ;;  %v9668_v5 = vld [vmem:[%s11352_s24 + $0xf4] ss:$8 sps:$4 sm:$0xff]  }
 0x2c0   : > { %1907 = vmatprep.subr.bf16.mxu1 %v9634_v43  ;;  %v9667_v4 = vld [vmem:[%s11352_s24 + $0x100] ss:$8 sps:$4 sm:$0xff]   ;;  %v9670_v6 = vld [vmem:[%s11352_s24 + $0x1f4] ss:$8 sps:$4 sm:$0xff]   ;;  %v9673_v8 = vld [vmem:[%s11352_s24 + $0x1f0] ss:$8 sps:$4 sm:$0xff]  }
 0x2c1   : > { %1892 = vmatprep.mubr.bf16.mxu0 %v11418_v62  ;;  %1935 = vmatprep.mubr.bf16.mxu1 %v11418_v62  ;;  %v9674_v9 = vld [vmem:[%s11352_s24 + $0xe4] ss:$8 sps:$4 sm:$0xff]   ;;  %v9678_v11 = vld [vmem:[%s11352_s24 + $0xe0] ss:$8 sps:$4 sm:$0xff]   ;;  %v9680_v13 = vld [vmem:[%s11352_s24 + $0xd4] ss:$8 sps:$4 sm:$0xff]  }
 0x2c2   : > { %v9676_v10 = vld [vmem:[%s11352_s24 + $0x1e4] ss:$8 sps:$4 sm:$0xff]   ;;  %v9679_v12 = vld [vmem:[%s11352_s24 + $0x1e0] ss:$8 sps:$4 sm:$0xff]   ;;  %v9682_v14 = vld [vmem:[%s11352_s24 + $0x1d4] ss:$8 sps:$4 sm:$0xff]  }
 0x2c3   : > { %v9684_v15 = vld [vmem:[%s11352_s24 + $0xd0] ss:$8 sps:$4 sm:$0xff]   ;;  %v9686_v17 = vld [vmem:[%s11352_s24 + $0xc4] ss:$8 sps:$4 sm:$0xff]   ;;  %v9690_v19 = vld [vmem:[%s11352_s24 + $0xc0] ss:$8 sps:$4 sm:$0xff]  }
 0x2c4   : > { %v9685_v16 = vld [vmem:[%s11352_s24 + $0x1d0] ss:$8 sps:$4 sm:$0xff]   ;;  %v9688_v18 = vld [vmem:[%s11352_s24 + $0x1c4] ss:$8 sps:$4 sm:$0xff]   ;;  %v9691_v20 = vld [vmem:[%s11352_s24 + $0x1c0] ss:$8 sps:$4 sm:$0xff]  }
 0x2c5   : > { %v9692_v21 = vld [vmem:[%s11352_s24 + $0xb4] ss:$8 sps:$4 sm:$0xff]   ;;  %v9696_v23 = vld [vmem:[%s11352_s24 + $0xb0] ss:$8 sps:$4 sm:$0xff]   ;;  %v9698_v25 = vld [vmem:[%s11352_s24 + $0xa4] ss:$8 sps:$4 sm:$0xff]  }
 0x2c6   : > { %1865 = vmatpush1.bf16.xpose.msra.mxu0 %v9636_v44  ;;  %v9694_v22 = vld [vmem:[%s11352_s24 + $0x1b4] ss:$8 sps:$4 sm:$0xff]   ;;  %v9697_v24 = vld [vmem:[%s11352_s24 + $0x1b0] ss:$8 sps:$4 sm:$0xff]   ;;  %v9700_v26 = vld [vmem:[%s11352_s24 + $0x1a4] ss:$8 sps:$4 sm:$0xff]  }
 0x2c7   : > { %1908 = vmatpush1.bf16.xpose.msra.mxu1 %v9637_v45  ;;  %1866 = vmatprep.subr.bf16.mxu0 %v9638_v46  ;;  %v9702_v27 = vld [vmem:[%s11352_s24 + $0xa0] ss:$8 sps:$4 sm:$0xff]   ;;  %v9704_v29 = vld [vmem:[%s11352_s24 + $0x94] ss:$8 sps:$4 sm:$0xff]   ;;  %v9708_v31 = vld [vmem:[%s11352_s24 + $0x90] ss:$8 sps:$4 sm:$0xff]  }
 0x2c8   : > { %1909 = vmatprep.subr.bf16.mxu1 %v9640_v47  ;;  %v9703_v28 = vld [vmem:[%s11352_s24 + $0x1a0] ss:$8 sps:$4 sm:$0xff]   ;;  %v9706_v30 = vld [vmem:[%s11352_s24 + $0x194] ss:$8 sps:$4 sm:$0xff]   ;;  %v9709_v32 = vld [vmem:[%s11352_s24 + $0x190] ss:$8 sps:$4 sm:$0xff]  }
 0x2c9   : > { %v9710_v33 = vld [vmem:[%s11352_s24 + $0x84] ss:$8 sps:$4 sm:$0xff]   ;;  %v9714_v35 = vld [vmem:[%s11352_s24 + $0x80] ss:$8 sps:$4 sm:$0xff]   ;;  %v9718_v37 = vld [vmem:[%s11352_s24 + $0x274] ss:$8 sps:$4 sm:$0xff]  }
 0x2ca   : > { %v9712_v34 = vld [vmem:[%s11352_s24 + $0x184] ss:$8 sps:$4 sm:$0xff]   ;;  %v9715_v36 = vld [vmem:[%s11352_s24 + $0x180] ss:$8 sps:$4 sm:$0xff]   ;;  %v1248_v39 = vld [vmem:[#allocation2 + $0x18] sm:$0xff]  ;;  %s12787_s20 = sld [smem:[#allocation38_spill]] }
 0x2cb   : > { %v1246_v38 = vld [vmem:[#allocation2 + $0x10] sm:$0xff]  ;;  %v9719_v43 = vld [vmem:[%s11352_s24 + $0x260] ss:$8 sps:$4 sm:$0xff]   ;;  %vm2399_vm2 = vcmask 523520   ;;  %vm2610_vm3 = vcmask 785920   ;;  %vm2821_vm4 = vcmask 1048320  }
 0x2cc   : > { %v9716_v40 = vld [vmem:[%s11352_s24 + $0x270] ss:$8 sps:$4 sm:$0xff]   ;;  %v11462_v41 = vpack.c.bf16 %v1248_v39, %v1246_v38  ;;  %v9721_v42 = vld [vmem:[%s11352_s24 + $0x264] ss:$8 sps:$4 sm:$0xff]   ;;  %v9724_v44 = vld [vmem:[%s11352_s24 + $0x254] ss:$8 sps:$4 sm:$0xff]  }
 0x2cd   : > { %v9722_v45 = vld [vmem:[%s11352_s24 + $0x250] ss:$8 sps:$4 sm:$0xff]   ;;  %v9727_v46 = vld [vmem:[%s11352_s24 + $0x244] ss:$8 sps:$4 sm:$0xff]   ;;  %v9725_v47 = vld [vmem:[%s11352_s24 + $0x240] ss:$8 sps:$4 sm:$0xff]  }
 0x2ce   : > { %1867 = vmatpush1.bf16.xpose.msra.mxu0 %v9642_v48  ;;  %v9730_v48 = vld [vmem:[%s11352_s24 + $0x234] ss:$8 sps:$4 sm:$0xff]   ;;  %v9746_v61 = vld [vmem:[%s11352_s24 + $0x2d0] ss:$8 sps:$4 sm:$0xff]   ;;  %s12789_s22 = sld [smem:[#allocation30_spill]] }
 0x2cf   : > { %1910 = vmatpush1.bf16.xpose.msra.mxu1 %v9643_v49  ;;  %1868 = vmatprep.subr.bf16.mxu0 %v9644_v50  ;;  %v9728_v49 = vld [vmem:[%s11352_s24 + $0x230] ss:$8 sps:$4 sm:$0xff]   ;;  %v9733_v50 = vld [vmem:[%s11352_s24 + $0x224] ss:$8 sps:$4 sm:$0xff]   ;;  %v9748_v60 = vld [vmem:[%s11352_s24 + $0x2d4] ss:$8 sps:$4 sm:$0xff]  }
 0x2d0   : > { %1911 = vmatprep.subr.bf16.mxu1 %v9646_v51  ;;  %v9731_v51 = vld [vmem:[%s11352_s24 + $0x220] ss:$8 sps:$4 sm:$0xff]   ;;  %s12788_s28 = smov %s12787_s20 }
 0x2d4   : > { %p9229_p11 = scmp.ne.s32.totalorder %s12789_s22, 3 }
 0x2d6   : > { %1869 = vmatpush1.bf16.xpose.msra.mxu0 %v9648_v52  ;;  %v9736_v52 = vld [vmem:[%s11352_s24 + $0x214] ss:$8 sps:$4 sm:$0xff]  }
 0x2d7   : > { %1912 = vmatpush1.bf16.xpose.msra.mxu1 %v9649_v53  ;;  %1870 = vmatprep.subr.bf16.mxu0 %v9650_v54  ;;  %v9734_v53 = vld [vmem:[%s11352_s24 + $0x210] ss:$8 sps:$4 sm:$0xff]   ;;  %v9739_v54 = vld [vmem:[%s11352_s24 + $0x204] ss:$8 sps:$4 sm:$0xff]  }
 0x2d8   : > { %1913 = vmatprep.subr.bf16.mxu1 %v9652_v55  ;;  %v9737_v55 = vld [vmem:[%s11352_s24 + $0x200] ss:$8 sps:$4 sm:$0xff]  }
 0x2de   : > { %1871 = vmatpush1.bf16.xpose.msra.mxu0 %v9654_v56  ;;  %v9742_v56 = vld [vmem:[%s11352_s24 + $0x2f4] ss:$8 sps:$4 sm:$0xff]  }
 0x2df   : > { %1914 = vmatpush1.bf16.xpose.msra.mxu1 %v9655_v57  ;;  %1872 = vmatprep.subr.bf16.mxu0 %v9656_v58  ;;  %v9740_v57 = vld [vmem:[%s11352_s24 + $0x2f0] ss:$8 sps:$4 sm:$0xff]   ;;  %v9745_v58 = vld [vmem:[%s11352_s24 + $0x2e4] ss:$8 sps:$4 sm:$0xff]  }
 0x2e0   : > { %1915 = vmatprep.subr.bf16.mxu1 %v9658_v59  ;;  %v9743_v59 = vld [vmem:[%s11352_s24 + $0x2e0] ss:$8 sps:$4 sm:$0xff]  }
 0x2e6   : > { %1873 = vmatpush1.bf16.xpose.msra.mxu0 %v9660_v63  ;;  %v9749_v63 = vld [vmem:[%s11352_s24 + $0x2c0] ss:$8 sps:$4 sm:$0xff]  }
 0x2e7   : > { %1916 = vmatpush1.bf16.xpose.msra.mxu1 %v9661_v0  ;;  %1874 = vmatprep.subr.bf16.mxu0 %v9662_v1  ;;  %v9754_v0 = vld [vmem:[%s11352_s24 + $0x2b4] ss:$8 sps:$4 sm:$0xff]   ;;  %v9752_v1 = vld [vmem:[%s11352_s24 + $0x2b0] ss:$8 sps:$4 sm:$0xff]  }
 0x2e8   : > { %1917 = vmatprep.subr.bf16.mxu1 %v9664_v2  ;;  %v9757_v2 = vld [vmem:[%s11352_s24 + $0x2a4] ss:$8 sps:$4 sm:$0xff]  }
 0x2ee   : > { %1875 = vmatpush1.bf16.xpose.msra.mxu0 %v9666_v3  ;;  %v9755_v3 = vld [vmem:[%s11352_s24 + $0x2a0] ss:$8 sps:$4 sm:$0xff]  }
 0x2ef   : > { %1918 = vmatpush1.bf16.xpose.msra.mxu1 %v9667_v4  ;;  %1876 = vmatprep.subr.bf16.mxu0 %v9668_v5  ;;  %v9760_v4 = vld [vmem:[%s11352_s24 + $0x294] ss:$8 sps:$4 sm:$0xff]   ;;  %v9758_v5 = vld [vmem:[%s11352_s24 + $0x290] ss:$8 sps:$4 sm:$0xff]  }
 0x2f0   : > { %1919 = vmatprep.subr.bf16.mxu1 %v9670_v6  ;;  %v9763_v6 = vld [vmem:[%s11352_s24 + $0x284] ss:$8 sps:$4 sm:$0xff]  }
 0x2f6   : > { %1877 = vmatpush2.bf16.xpose.msra.mxu0 %v9672_v7  ;;  %v9761_v7 = vld [vmem:[%s11352_s24 + $0x280] ss:$8 sps:$4 sm:$0xff]  }
 0x2f7   : > { %1920 = vmatpush2.bf16.xpose.msra.mxu1 %v9673_v8  ;;  %1878 = vmatprep.subr.bf16.mxu0 %v9674_v9  ;;  %v1350_v8 = vlaneseq }
 0x2f8   : > { %1921 = vmatprep.subr.bf16.mxu1 %v9676_v10 }
 0x2f9   : > { %v11498_v9 = vshrl.u32 %v1350_v8, 7 }
 0x2fb   : > { %v11501_v10 = vsub.s32 0, %v11498_v9 }
 0x2fe   : > { %1879 = vmatpush2.bf16.xpose.msra.mxu0 %v9678_v11  ;;  %v11504_v11 = vld [vmem:[%s11360_s6] sm:$0x3f] }
 0x2ff   : > { %1922 = vmatpush2.bf16.xpose.msra.mxu1 %v9679_v12  ;;  %1880 = vmatprep.subr.bf16.mxu0 %v9680_v13  ;;  %v1353_v12 = vrot.slane %v11504_v11, %v11501_v10  ;;  %v11509_v13 = vsub.s32 2, %v11498_v9 }
 0x300   : > { %1923 = vmatprep.subr.bf16.mxu1 %v9682_v14 }
 0x306   : > { %1881 = vmatpush2.bf16.xpose.msra.mxu0 %v9684_v15 }
 0x307   : > { %1924 = vmatpush2.bf16.xpose.msra.mxu1 %v9685_v16  ;;  %1882 = vmatprep.subr.bf16.mxu0 %v9686_v17 }
 0x308   : > { %1925 = vmatprep.subr.bf16.mxu1 %v9688_v18 }
 0x30e   : > { %1883 = vmatpush2.bf16.xpose.msra.mxu0 %v9690_v19  ;;  %v1361_v19 = vrot.slane %v11504_v11, %v11509_v13 }
 0x30f   : > { %1926 = vmatpush2.bf16.xpose.msra.mxu1 %v9691_v20  ;;  %1884 = vmatprep.subr.bf16.mxu0 %v9692_v21 }
 0x310   : > { %1927 = vmatprep.subr.bf16.mxu1 %v9694_v22 }
 0x316   : > { %1885 = vmatpush2.bf16.xpose.msra.mxu0 %v9696_v23 }
 0x317   : > { %1928 = vmatpush2.bf16.xpose.msra.mxu1 %v9697_v24  ;;  %1886 = vmatprep.subr.bf16.mxu0 %v9698_v25 }
 0x318   : > { %1929 = vmatprep.subr.bf16.mxu1 %v9700_v26 }
 0x31e   : > { %1887 = vmatpush2.bf16.xpose.msra.mxu0 %v9702_v27  ;;  %v11527_v27 = vsub.s32 3, %v11498_v9 }
 0x31f   : > { %1930 = vmatpush2.bf16.xpose.msra.mxu1 %v9703_v28  ;;  %1888 = vmatprep.subr.bf16.mxu0 %v9704_v29  ;;  %v11531_v28 = vsub.s32 1, %v11498_v9 }
 0x320   : > { %1931 = vmatprep.subr.bf16.mxu1 %v9706_v30  ;;  %v1365_v29 = vrot.slane %v11504_v11, %v11527_v27 }
 0x321   : > { %v1357_v30 = vrot.slane %v11504_v11, %v11531_v28 }
 0x326   : > { %1889 = vmatpush2.bf16.xpose.msra.mxu0 %v9708_v31 }
 0x327   : > { %1932 = vmatpush2.bf16.xpose.msra.mxu1 %v9709_v32  ;;  %1890 = vmatprep.subr.bf16.mxu0 %v9710_v33 }
 0x328   : > { %1933 = vmatprep.subr.bf16.mxu1 %v9712_v34 }
 0x32e   : > { %1891 = vmatpush2.bf16.xpose.msra.mxu0 %v9714_v35 }
 0x32f   : > { %1934 = vmatpush2.bf16.xpose.msra.mxu1 %v9715_v36  ;;  %1946 = vmatprep.subr.bf16.mxu0 %v9718_v37 }
 0x335   : > { %1893 = vmatmul.mubr.bf16.vlgmr.msra.gmra.mxu0 %v11462_v41 }
 0x336   : > { %1936 = vmatmul.mubr.bf16.vlgmr.msra.gmra.mxu1 %v11462_v41  ;;  %1947 = vmatpush1.bf16.xpose.msra.mxu0 %v9716_v40 }
 0x337   : > { %1978 = vmatprep.mubr.bf16.mxu0 %v11418_v62  ;;  %1948 = vmatprep.subr.bf16.mxu0 %v9721_v42  ;;  %v9751_v62 = vld [vmem:[%s11352_s24 + $0x2c4] ss:$8 sps:$4 sm:$0xff]   ;;  %s10811_s24 = smov 64  }
 0x33e   : > { %1949 = vmatpush1.bf16.xpose.msra.mxu0 %v9719_v43  ;;  %v11569_v43 = vsub.s32 4, %v11498_v9 }
 0x33f   : > { %1950 = vmatprep.subr.bf16.mxu0 %v9724_v44 }
 0x346   : > { %1951 = vmatpush1.bf16.xpose.msra.mxu0 %v9722_v45 }
 0x347   : > { %1952 = vmatprep.subr.bf16.mxu0 %v9727_v46 }
 0x34e   : > { %1953 = vmatpush1.bf16.xpose.msra.mxu0 %v9725_v47  ;;  %v1369_v47 = vrot.slane %v11504_v11, %v11569_v43 }
 0x34f   : > { %1954 = vmatprep.subr.bf16.mxu0 %v9730_v48 }
 0x356   : > { %1955 = vmatpush1.bf16.xpose.msra.mxu0 %v9728_v49 }
 0x357   : > { %1956 = vmatprep.subr.bf16.mxu0 %v9733_v50 }
 0x35e   : > { %1957 = vmatpush1.bf16.xpose.msra.mxu0 %v9731_v51 }
 0x35f   : > { %1958 = vmatprep.subr.bf16.mxu0 %v9736_v52 }
 0x366   : > { %1959 = vmatpush1.bf16.xpose.msra.mxu0 %v9734_v53 }
 0x367   : > { %1960 = vmatprep.subr.bf16.mxu0 %v9739_v54 }
 0x36e   : > { %1961 = vmatpush1.bf16.xpose.msra.mxu0 %v9737_v55 }
 0x36f   : > { %1962 = vmatprep.subr.bf16.mxu0 %v9742_v56 }
 0x376   : > { %1963 = vmatpush2.bf16.xpose.msra.mxu0 %v9740_v57 }
 0x377   : > { %1964 = vmatprep.subr.bf16.mxu0 %v9745_v58 }
 0x37e   : > { %1965 = vmatpush2.bf16.xpose.msra.mxu0 %v9743_v59 }
 0x37f   : > { %1966 = vmatprep.subr.bf16.mxu0 %v9748_v60 }
 0x386   : > { %1967 = vmatpush2.bf16.xpose.msra.mxu0 %v9746_v61 }
 0x387   : > { %1968 = vmatprep.subr.bf16.mxu0 %v9751_v62 }
 0x38e   : > { %1969 = vmatpush2.bf16.xpose.msra.mxu0 %v9749_v63 }
 0x38f   : > { %1970 = vmatprep.subr.bf16.mxu0 %v9754_v0 }
 0x396   : > { %1971 = vmatpush2.bf16.xpose.msra.mxu0 %v9752_v1 }
 0x397   : > { %1972 = vmatprep.subr.bf16.mxu0 %v9757_v2  ;;  %v11627_v2 = vld [vmem:[%s12787_s20 + $0x8] sm:$0xff] }
 0x39e   : > { %1973 = vmatpush2.bf16.xpose.msra.mxu0 %v9755_v3 }
 0x39f   : > { %1974 = vmatprep.subr.bf16.mxu0 %v9760_v4  ;;  %v11632_v4 = vld [vmem:[%s12788_s28] sm:$0xff] }
 0x3a6   : > { %1975 = vmatpush2.bf16.xpose.msra.mxu0 %v9758_v5 }
 0x3a7   : > { %1976 = vmatprep.subr.bf16.mxu0 %v9763_v6 }
 0x3ae   : > { %1977 = vmatpush2.bf16.xpose.msra.mxu0 %v9761_v7 }
 0x3b5   : > { %1979 = vmatmul.mubr.bf16.vlgmr.msra.gmra.mxu0 %v11462_v41 }
 0x3f5   : > { %v1894_v14 = vpop.f32.mrf.mxu0 }
 0x3f6   : > { %v1937_v15 = vpop.f32.mrf.mxu1  ;;  %v1895_v16 = vadd.f32 %v1894_v14, %v1353_v12 }
 0x3f7   : > { %v1896_v20 = vpop.f32.mrf.mxu0  ;;  %v1938_v23 = vadd.f32 %v1937_v15, %v1361_v19 }
 0x3f8   : > { %v1939_v17 = vpop.f32.mrf.mxu1  ;;  %v1989_v18 = vmul.f32 0.17677669, %v1895_v16  ;;  %v1897_v33 = vadd.f32 %v1896_v20, %v1357_v30 }
 0x3f9   : > { %v1898_v24 = vpop.f32.mrf.mxu0  ;;  %v11540_v32 = vadd.f32 %v1939_v17, %v1365_v29 }
 0x3fa   : > { %v1941_v21 = vpop.f32.mrf.mxu1  ;;  %2189 = vrot.lane.b32.xlu1 %v1989_v18, %s10810_s27  ;;  %9346 = vmatprep.mubr.msk.f32.mxu1 %vm1995_vm0, %v1989_v18  ;;  %v1899_v25 = vadd.f32 %v1898_v24, %v1353_v12  ;;  %v11549_v36 = vmul.f32 0.17677669, %v1897_v33 }
 0x3fb   : > { %v1942_v22 = vadd.f32 %v1941_v21, %v1361_v19  ;;  %v1900_v35 = vpop.f32.mrf.mxu0 }
 0x3fc   : > { %v1991_v26 = vmul.f32 0.17677669, %v1899_v25  ;;  %v1943_v31 = vpop.f32.mrf.mxu1  ;;  %v1901_v37 = vadd.f32 %v1900_v35, %v1357_v30 }
 0x3fd   : > { %2195 = vrot.lane.b32.xlu0 %v1942_v22, %s10810_s27  ;;  %9342 = vmatprep.subr.msk.mxu1 %vm1995_vm0, %v1942_v22  ;;  %v11543_v34 = vadd.f32 %v1943_v31, %v1365_v29 }
 0x3fe   : > { %9343 = vmatpush3.xpose.msk.msra.mxu1 %vm1995_vm0, %v1942_v22  ;;  %2408 = vrot.lane.b32.xlu1 %v1942_v22, %s10811_s24  ;;  %v11555_v38 = vmul.f32 0.17677669, %v1901_v37 }
 0x3ff   : > { %9344 = vmatprep.subr.msk.mxu1 %vm1995_vm0, %v1938_v23 }
 0x401   : > { %2193 = vrot.lane.b32.xlu0 %v1938_v23, %s10810_s27 }
 0x402   : > { %9345 = vmatpush3.xpose.msk.msra.mxu1 %vm1995_vm0, %v1938_v23  ;;  %2406 = vrot.lane.b32.xlu1 %v1938_v23, %s10811_s24 }
 0x405   : > { %2191 = vrot.lane.b32.xlu0 %v1991_v26, %s10810_s27  ;;  %9347 = vmatmul.mubr.msk.f32.vlgmr.msra.gmra.mxu1 %vm1995_vm0, %v1991_v26 }
 0x406   : > { %2619 = vrot.lane.b32.xlu1 %v1942_v22, %s10812_s4 }
 0x409   : > { %2402 = vrot.lane.b32.xlu0 %v1989_v18, %s10811_s24 }
 0x40a   : > { %2617 = vrot.lane.b32.xlu1 %v1938_v23, %s10812_s4 }
 0x40d   : > { %2404 = vrot.lane.b32.xlu0 %v1991_v26, %s10811_s24 }
 0x40e   : > { %2615 = vrot.lane.b32.xlu1 %v1991_v26, %s10812_s4 }
 0x411   : > { %2613 = vrot.lane.b32.xlu0 %v1989_v18, %s10812_s4 }
 0x412   : > { %3020 = vrot.lane.b32.xlu1 %v11540_v32, %s10810_s27 }
 0x415   : > { %3022 = vrot.lane.b32.xlu0 %v11543_v34, %s10810_s27 }
 0x416   : > { %3234 = vrot.lane.b32.xlu1 %v11543_v34, %s10811_s24 }
 0x419   : > { %3016 = vrot.lane.b32.xlu0 %v11549_v36, %s10810_s27 }
 0x41a   : > { %3232 = vrot.lane.b32.xlu1 %v11540_v32, %s10811_s24 }
 0x41d   : > { %3018 = vrot.lane.b32.xlu0 %v11555_v38, %s10810_s27 }
 0x41e   : > { %3230 = vrot.lane.b32.xlu1 %v11555_v38, %s10811_s24 }
 0x421   : > { %3228 = vrot.lane.b32.xlu0 %v11549_v36, %s10811_s24 }
 0x46c   : > { %v2190_v39 = vpop.permute.xlu1 %2189 }
 0x46d   : > { %9360 = vmatprep.mubr.msk.f32.mxu0 %vm1995_vm0, %v2190_v39 }
 0x46f   : > { %v2196_v40 = vpop.permute.xlu0 %2195 }
 0x470   : > { %9356 = vmatprep.subr.msk.mxu0 %vm1995_vm0, %v2196_v40  ;;  %v2409_v41 = vpop.permute.xlu1 %2408 }
 0x471   : > { %9357 = vmatpush3.xpose.msk.msra.mxu0 %vm1995_vm0, %v2196_v40 }
 0x473   : > { %v2194_v42 = vpop.permute.xlu0 %2193 }
 0x474   : > { %9358 = vmatprep.subr.msk.mxu0 %vm1995_vm0, %v2194_v42  ;;  %v2407_v44 = vpop.permute.xlu1 %2406 }
 0x475   : > { %9359 = vmatpush3.xpose.msk.msra.mxu0 %vm1995_vm0, %v2194_v42  ;;  %v1980_v45 = vpop.f32.mrf.mxu0 }
 0x476   : > { %9370 = vmatprep.subr.msk.mxu0 %vm1995_vm0, %v2409_v41  ;;  %v11584_v53 = vadd.f32 %v1980_v45, %v1369_v47  ;;  %v11684_v45 = vsub.s32 5, %v11498_v9 }
 0x477   : > { %v2192_v46 = vpop.permute.xlu0 %2191  ;;  %v11577_v48 = vpop.f32.mrf.mxu0 }
 0x478   : > { %9361 = vmatmul.mubr.msk.f32.vlgmr.msra.gmra.mxu0 %vm1995_vm0, %v2192_v46  ;;  %v2620_v50 = vpop.permute.xlu1 %2619  ;;  %v1373_v46 = vrot.slane %v11504_v11, %v11684_v45 }
 0x479   : > { %9371 = vmatpush3.xpose.msk.msra.mxu0 %vm1995_vm0, %v2409_v41  ;;  %v1984_v49 = vpop.f32.mrf.mxu0 }
 0x47a   : > { %9372 = vmatprep.subr.msk.mxu0 %vm1995_vm0, %v2407_v44  ;;  %v11581_v52 = vadd.f32 %v1984_v49, %v1369_v47  ;;  %v11694_v49 = vadd.f32 %v11577_v48, %v1373_v46 }
 0x47b   : > { %v2403_v51 = vpop.permute.xlu0 %2402  ;;  %v1986_v15 = vpop.f32.mrf.mxu0 }
 0x47c   : > { %9374 = vmatprep.mubr.msk.f32.mxu0 %vm1995_vm0, %v2403_v51  ;;  %2306 = vrot.lane.b32.xlu1 %v11581_v52, %s10810_s27  ;;  %v2618_v55 = vpop.permute.xlu1 %2617 }
 0x47d   : > { %9373 = vmatpush3.xpose.msk.msra.mxu0 %vm1995_vm0, %v2407_v44  ;;  %9349 = vmatprep.subr.mxu1 %v11581_v52 }
 0x47e   : > { %9384 = vmatprep.subr.msk.mxu0 %vm1995_vm0, %v2620_v50  ;;  %9350 = vmatpush3.msra.mxu1 %v11581_v52 }
 0x47f   : > { %v2405_v54 = vpop.permute.xlu0 %2404  ;;  %9351 = vmatprep.subr.mxu1 %v11584_v53 }
 0x480   : > { %9375 = vmatmul.mubr.msk.f32.vlgmr.msra.gmra.mxu0 %vm1995_vm0, %v2405_v54  ;;  %9352 = vmatpush3.msra.mxu1 %v11584_v53  ;;  %v2616_v57 = vpop.permute.xlu1 %2615 }
 0x481   : > { %9385 = vmatpush3.xpose.msk.msra.mxu0 %vm1995_vm0, %v2620_v50 }
 0x482   : > { %9386 = vmatprep.subr.msk.mxu0 %vm1995_vm0, %v2618_v55 }
 0x483   : > { %v2614_v56 = vpop.permute.xlu0 %2613 }
 0x484   : > { %9388 = vmatprep.mubr.msk.f32.mxu0 %vm1995_vm0, %v2614_v56  ;;  %v3021_v60 = vpop.permute.xlu1 %3020 }
 0x485   : > { %9387 = vmatpush3.xpose.msk.msra.mxu0 %vm1995_vm0, %v2618_v55 }
 0x486   : > { %9398 = vmatprep.subr.msk.mxu0 %vm1995_vm0, %v11543_v34 }
 0x487   : > { %v3023_v58 = vpop.permute.xlu0 %3022 }
 0x488   : > { %9389 = vmatmul.mubr.msk.f32.vlgmr.msra.gmra.mxu0 %vm1995_vm0, %v2616_v57  ;;  %v3235_v62 = vpop.permute.xlu1 %3234 }
 0x489   : > { %9399 = vmatpush3.xpose.msk.msra.mxu0 %vm1995_vm0, %v11543_v34  ;;  %9402 = vmatprep.mubr.msk.f32.mxu0 %vm1995_vm0, %v11549_v36 }
 0x48a   : > { %9400 = vmatprep.subr.msk.mxu0 %vm1995_vm0, %v11540_v32 }
 0x48b   : > { %v3017_v59 = vpop.permute.xlu0 %3016 }
 0x48c   : > { %v3233_v0 = vpop.permute.xlu1 %3232 }
 0x48d   : > { %9401 = vmatpush3.xpose.msk.msra.mxu0 %vm1995_vm0, %v11540_v32 }
 0x48e   : > { %9412 = vmatprep.subr.msk.mxu0 %vm1995_vm0, %v3023_v58 }
 0x48f   : > { %v3019_v61 = vpop.permute.xlu0 %3018 }
 0x490   : > { %9403 = vmatmul.mubr.msk.f32.vlgmr.msra.gmra.mxu0 %vm1995_vm0, %v11555_v38  ;;  %v3231_v1 = vpop.permute.xlu1 %3230 }
 0x491   : > { %9413 = vmatpush3.xpose.msk.msra.mxu0 %vm1995_vm0, %v3023_v58  ;;  %9416 = vmatprep.mubr.msk.f32.mxu0 %vm1995_vm0, %v3017_v59 }
 0x492   : > { %9414 = vmatprep.subr.msk.mxu0 %vm1995_vm0, %v3021_v60 }
 0x493   : > { %v3229_v63 = vpop.permute.xlu0 %3228 }
 0x495   : > { %9415 = vmatpush3.xpose.msk.msra.mxu0 %vm1995_vm0, %v3021_v60 }
 0x496   : > { %9426 = vmatprep.subr.msk.mxu0 %vm1995_vm0, %v3235_v62 }
 0x498   : > { %9417 = vmatmul.mubr.msk.f32.vlgmr.msra.gmra.mxu0 %vm1995_vm0, %v3019_v61 }
 0x499   : > { %9427 = vmatpush3.xpose.msk.msra.mxu0 %vm1995_vm0, %v3235_v62  ;;  %9430 = vmatprep.mubr.msk.f32.mxu0 %vm1995_vm0, %v3229_v63  ;;  %v11727_v62 = vadd.f32 %v1986_v15, %v1373_v46 }
 0x49a   : > { %9428 = vmatprep.subr.msk.mxu0 %vm1995_vm0, %v3233_v0 }
 0x49d   : > { %9429 = vmatpush3.xpose.msk.msra.mxu0 %vm1995_vm0, %v3233_v0 }
 0x4a0   : > { %9431 = vmatmul.mubr.msk.f32.vlgmr.msra.gmra.mxu0 %vm1995_vm0, %v3231_v1 }
 0x4c5   : > { %v9348_v3 = vpop.f32.mrf.mxu1 }
 0x4c6   : > { %v11635_v5 = vadd.f32 %v9348_v3, %v11627_v2 }
 0x4c7   : > { %v2074_v6 = vpop.f32.mrf.mxu1 }
 0x4c8   : > { %v11638_v7 = vadd.f32 %v2074_v6, %v11632_v4  ;;  %v2087_v8 = vsel %vm2083_vm1, %v11635_v5, -inf }
 0x4c9   : > { %2088 = vmax.xlane.f32.xlu1 %v2087_v8 }
 0x4ca   : > { %v2084_v12 = vsel %vm2083_vm1, %v11638_v7, -inf }
 0x4cb   : > { %2085 = vmax.xlane.f32.xlu0 %v2084_v12 }
 0x4da   : > { %2517 = vrot.lane.b32.xlu1 %v11581_v52, %s10811_s24 }
 0x4de   : > { %2515 = vrot.lane.b32.xlu1 %v11584_v53, %s10811_s24 }
 0x4ee   : > { %v11648_v14 = vpop.permute.xlu1 %2306 }
 0x4ef   : > { %9363 = vmatprep.subr.mxu1 %v11648_v14 }
 0x538   : > { %v9362_v16 = vpop.f32.mrf.mxu0 }
 0x539   : > { %v11652_v17 = vadd.f32 %v9362_v16, %v11627_v2 }
 0x53a   : > { %v2271_v18 = vpop.f32.mrf.mxu0 }
 0x53b   : > { %v11655_v19 = vadd.f32 %v2271_v18, %v11632_v4  ;;  %v2283_v20 = vsel %vm2083_vm1, %v11652_v17, -inf }
 0x53c   : > { %2284 = vmax.xlane.f32.xlu0 %v2283_v20 }
 0x53d   : > { %v2280_v21 = vsel %vm2083_vm1, %v11655_v19, -inf }
 0x540   : > { %v9376_v22 = vpop.f32.mrf.mxu0  ;;  %2281 = vmax.xlane.f32.xlu0 %v2280_v21 }
 0x541   : > { %v11691_v47 = vadd.f32 %v9376_v22, %v11627_v2 }
 0x542   : > { %v2484_v23 = vpop.f32.mrf.mxu0 }
 0x543   : > { %v11662_v24 = vadd.f32 %v2484_v23, %v11632_v4  ;;  %v2496_v51 = vsel %vm2083_vm1, %v11691_v47, -inf }
 0x545   : > { %v2493_v25 = vsel %vm2083_vm1, %v11662_v24, -inf }
 0x546   : > { %2494 = vmax.xlane.f32.xlu1 %v2493_v25 }
 0x548   : > { %v9390_v26 = vpop.f32.mrf.mxu0 }
 0x549   : > { %v11699_v50 = vadd.f32 %v9390_v26, %v11627_v2 }
 0x54a   : > { %v2695_v29 = vpop.f32.mrf.mxu0 }
 0x54b   : > { %v11667_v30 = vadd.f32 %v2695_v29, %v11632_v4 }
 0x54d   : > { %v2704_v31 = vsel %vm2083_vm1, %v11667_v30, -inf }
 0x54e   : > { %2705 = vmax.xlane.f32.xlu1 %v2704_v31 }
 0x550   : > { %v9404_v33 = vpop.f32.mrf.mxu0 }
 0x551   : > { %v11704_v11 = vadd.f32 %v9404_v33, %v11627_v2 }
 0x552   : > { %v2902_v35 = vpop.f32.mrf.mxu0  ;;  %v2089_v63 = vpop.xlane.xlu1 %2088 }
 0x553   : > { %v11672_v37 = vadd.f32 %v2902_v35, %v11632_v4  ;;  %v2914_v54 = vsel %vm2083_vm1, %v11704_v11, -inf  ;;  %v2091_v0 = vsub.f32 %v11635_v5, %v2089_v63 }
 0x554   : > { %v2086_v3 = vpop.xlane.xlu0 %2085 }
 0x555   : > { %v2911_v39 = vsel %vm2083_vm1, %v11672_v37, -inf  ;;  %v2094_v1 = vmul.f32 1.442695, %v2091_v0  ;;  %v2090_v6 = vsub.f32 %v11638_v7, %v2086_v3 }
 0x556   : > { %2912 = vmax.xlane.f32.xlu1 %v2911_v39  ;;  %2304 = vrot.lane.b32.xlu0 %v11584_v53, %s10810_s27  ;;  %v11741_v15 = vpop.permute.xlu1 %2517 }
 0x557   : > { %10196 = vpow2.f32 %v2094_v1 }
 0x558   : > { %v9418_v40 = vpop.f32.mrf.mxu0 }
 0x559   : > { %v11709_v48 = vadd.f32 %v9418_v40, %v11627_v2 }
 0x55a   : > { %v3098_v41 = vpop.f32.mrf.mxu0  ;;  %v11747_v22 = vpop.permute.xlu1 %2515 }
 0x55b   : > { %v11679_v42 = vadd.f32 %v3098_v41, %v11632_v4  ;;  %v3110_v57 = vsel %vm2083_vm1, %v11709_v48, -inf }
 0x55d   : > { %v3107_v44 = vsel %vm2083_vm1, %v11679_v42, -inf }
 0x55e   : > { %3108 = vmax.xlane.f32.xlu1 %v3107_v44 }
 0x560   : > { %v9432_v55 = vpop.f32.mrf.mxu0 }
 0x561   : > { %v11714_v56 = vadd.f32 %v9432_v55, %v11627_v2 }
 0x562   : > { %v3310_v59 = vpop.f32.mrf.mxu0 }
 0x563   : > { %v3322_v58 = vsel %vm2083_vm1, %v11714_v56, -inf  ;;  %v11721_v60 = vadd.f32 %v3310_v59, %v11632_v4 }
 0x564   : > { %v11737_v8 = vpop.eup %10196 }
 0x565   : > { %v3319_v61 = vsel %vm2083_vm1, %v11721_v60, -inf  ;;  %v2099_v12 = vsel %vm2083_vm1, %v11737_v8, 0.0 }
 0x56f   : > { %2726 = vrot.lane.b32.xlu1 %v11584_v53, %s10812_s4  ;;  %v2707_v53 = vsel %vm2083_vm1, %v11699_v50, -inf }
 0x573   : > { %3131 = vrot.lane.b32.xlu1 %v11694_v49, %s10810_s27 }
 0x575   : > { %2497 = vmax.xlane.f32.xlu0 %v2496_v51 }
 0x579   : > { %2708 = vmax.xlane.f32.xlu0 %v2707_v53 }
 0x57d   : > { %2915 = vmax.xlane.f32.xlu0 %v2914_v54 }
 0x581   : > { %3111 = vmax.xlane.f32.xlu0 %v3110_v57 }
 0x585   : > { %3323 = vmax.xlane.f32.xlu0 %v3322_v58 }
 0x597   : > { %3320 = vmax.xlane.f32.xlu1 %v3319_v61 }
 0x59b   : > { %2728 = vrot.lane.b32.xlu0 %v11581_v52, %s10812_s4  ;;  %v2092_v52 = vmul.f32 1.442695, %v2090_v6 }
 0x59d   : > { %10198 = vpow2.f32 %v2092_v52 }
 0x59f   : > { %3133 = vrot.lane.b32.xlu0 %v11727_v62, %s10810_s27 }
 0x5a3   : > { %3343 = vrot.lane.b32.xlu0 %v11727_v62, %s10811_s24 }
 0x5a8   : > { %3341 = vrot.lane.b32.xlu1 %v11694_v49, %s10811_s24 }
 0x5aa   : > { %v11744_v20 = vpop.eup %10198 }
 0x5ab   : > { %v2096_v23 = vsel %vm2083_vm1, %v11744_v20, 0.0 }
 0x5c2   : > { %2100 = vadd.xlane.f32.xlu0 %v2099_v12 }
 0x5c5   : > { %v2285_v16 = vpop.xlane.xlu0 %2284 }
 0x5c6   : > { %v2287_v18 = vsub.f32 %v11652_v17, %v2285_v16 }
 0x5c8   : > { %v2290_v5 = vmul.f32 1.442695, %v2287_v18 }
 0x5c9   : > { %v2282_v21 = vpop.xlane.xlu0 %2281 }
 0x5ca   : > { %10200 = vpow2.f32 %v2290_v5  ;;  %v2286_v7 = vsub.f32 %v11655_v19, %v2282_v21 }
 0x5cc   : > { %v2288_v25 = vmul.f32 1.442695, %v2286_v7  ;;  %2097 = vadd.xlane.f32.xlu1 %v2096_v23 }
 0x5cd   : > { %v11777_v63 = vpop.permute.xlu0 %2304 }
 0x5ce   : > { %10202 = vpow2.f32 %v2288_v25 }
 0x5cf   : > { %v2495_v26 = vpop.xlane.xlu1 %2494 }
 0x5d0   : > { %v2499_v29 = vsub.f32 %v11662_v24, %v2495_v26 }
 0x5d2   : > { %v2501_v31 = vmul.f32 1.442695, %v2499_v29 }
 0x5d4   : > { %10204 = vpow2.f32 %v2501_v31 }
 0x5d7   : > { %v11752_v17 = vpop.eup %10200  ;;  %v2706_v33 = vpop.xlane.xlu1 %2705 }
 0x5d8   : > { %v2710_v35 = vsub.f32 %v11667_v30, %v2706_v33  ;;  %v2295_v19 = vsel %vm2083_vm1, %v11752_v17, 0.0 }
 0x5d9   : > { %2296 = vadd.xlane.f32.xlu0 %v2295_v19 }
 0x5da   : > { %v2712_v39 = vmul.f32 1.442695, %v2710_v35 }
 0x5db   : > { %v11757_v40 = vpop.eup %10202 }
 0x5dc   : > { %10206 = vpow2.f32 %v2712_v39  ;;  %v2292_v41 = vsel %vm2083_vm1, %v11757_v40, 0.0 }
 0x5dd   : > { %2293 = vadd.xlane.f32.xlu1 %v2292_v41 }
 0x5df   : > { %v2913_v24 = vpop.xlane.xlu1 %2912 }
 0x5e0   : > { %v2917_v44 = vsub.f32 %v11672_v37, %v2913_v24 }
 0x5e1   : > { %v11762_v46 = vpop.eup %10204 }
 0x5e2   : > { %v2919_v51 = vmul.f32 1.442695, %v2917_v44  ;;  %v2505_v30 = vsel %vm2083_vm1, %v11762_v46, 0.0 }
 0x5e3   : > { %2506 = vadd.xlane.f32.xlu1 %v2505_v30 }
 0x5e4   : > { %10208 = vpow2.f32 %v2919_v51 }
 0x5e7   : > { %v3109_v53 = vpop.xlane.xlu1 %3108 }
 0x5e8   : > { %v3113_v54 = vsub.f32 %v11679_v42, %v3109_v53 }
 0x5e9   : > { %v11767_v55 = vpop.eup %10206 }
 0x5ea   : > { %v3115_v57 = vmul.f32 1.442695, %v3113_v54  ;;  %v2716_v58 = vsel %vm2083_vm1, %v11767_v55, 0.0 }
 0x5eb   : > { %2717 = vadd.xlane.f32.xlu1 %v2716_v58  ;;  %v11796_v31 = vpop.permute.xlu1 %2726 }
 0x5ec   : > { %10210 = vpow2.f32 %v3115_v57 }
 0x5ef   : > { %v11804_v35 = vpop.permute.xlu1 %3131 }
 0x5f1   : > { %v11771_v37 = vpop.eup %10208 }
 0x5f2   : > { %v2923_v59 = vsel %vm2083_vm1, %v11771_v37, 0.0 }
 0x5f3   : > { %2924 = vadd.xlane.f32.xlu1 %v2923_v59 }
 0x5f9   : > { %v11775_v61 = vpop.eup %10210 }
 0x5fa   : > { %v3119_v42 = vsel %vm2083_vm1, %v11775_v61, 0.0 }
 0x5fb   : > { %3120 = vadd.xlane.f32.xlu1 %v3119_v42 }
 0x5fe   : > { %v2498_v0 = vpop.xlane.xlu0 %2497 }
 0x5ff   : > { %v2500_v1 = vsub.f32 %v11691_v47, %v2498_v0 }
 0x601   : > { %v2503_v3 = vmul.f32 1.442695, %v2500_v1 }
 0x602   : > { %v2709_v6 = vpop.xlane.xlu0 %2708 }
 0x603   : > { %10212 = vpow2.f32 %v2503_v3  ;;  %v2711_v52 = vsub.f32 %v11699_v50, %v2709_v6 }
 0x605   : > { %v2714_v12 = vmul.f32 1.442695, %v2711_v52 }
 0x606   : > { %v2916_v16 = vpop.xlane.xlu0 %2915 }
 0x607   : > { %10214 = vpow2.f32 %v2714_v12  ;;  %v2918_v18 = vsub.f32 %v11704_v11, %v2916_v16 }
 0x609   : > { %v2921_v5 = vmul.f32 1.442695, %v2918_v18 }
 0x60a   : > { %v3112_v21 = vpop.xlane.xlu0 %3111 }
 0x60b   : > { %10216 = vpow2.f32 %v2921_v5  ;;  %v3114_v7 = vsub.f32 %v11709_v48, %v3112_v21 }
 0x60c   : > { %3442 = vrot.lane.b32.xlu1 %v11540_v32, %s10812_s4 }
 0x60d   : > { %v3117_v23 = vmul.f32 1.442695, %v3114_v7 }
 0x60e   : > { %v3324_v47 = vpop.xlane.xlu0 %3323 }
 0x60f   : > { %10218 = vpow2.f32 %v3117_v23  ;;  %v3326_v25 = vsub.f32 %v11714_v56, %v3324_v47 }
 0x610   : > { %v11788_v26 = vpop.eup %10212 }
 0x611   : > { %v3329_v50 = vmul.f32 1.442695, %v3326_v25  ;;  %v2508_v29 = vsel %vm2083_vm1, %v11788_v26, 0.0 }
 0x612   : > { %2509 = vadd.xlane.f32.xlu0 %v2508_v29  ;;  %v2729_v54 = vpop.permute.xlu0 %2728 }
 0x613   : > { %10220 = vpow2.f32 %v3329_v50 }
 0x614   : > { %v11792_v11 = vpop.eup %10214 }
 0x615   : > { %v2719_v48 = vsel %vm2083_vm1, %v11792_v11, 0.0 }
 0x616   : > { %2720 = vadd.xlane.f32.xlu0 %v2719_v48 }
 0x618   : > { %v11798_v32 = vpop.eup %10216 }
 0x619   : > { %v2926_v56 = vsel %vm2083_vm1, %v11798_v32, 0.0 }
 0x61a   : > { %2927 = vadd.xlane.f32.xlu0 %v2926_v56 }
 0x61c   : > { %v11802_v33 = vpop.eup %10218 }
 0x61d   : > { %v3122_v19 = vsel %vm2083_vm1, %v11802_v33, 0.0 }
 0x61e   : > { %3123 = vadd.xlane.f32.xlu0 %v3122_v19 }
 0x620   : > { %v11808_v39 = vpop.eup %10220  ;;  %v3321_v41 = vpop.xlane.xlu1 %3320 }
 0x621   : > { %v3325_v24 = vsub.f32 %v11721_v60, %v3321_v41  ;;  %v3334_v44 = vsel %vm2083_vm1, %v11808_v39, 0.0  ;;  %v11823_v60 = vpop.permute.xlu0 %3133 }
 0x622   : > { %3335 = vadd.xlane.f32.xlu0 %v3334_v44 }
 0x623   : > { %v3327_v51 = vmul.f32 1.442695, %v3325_v24 }
 0x624   : > { %v11827_v58 = vpop.permute.xlu1 %3341 }
 0x625   : > { %10222 = vpow2.f32 %v3327_v51  ;;  %v11825_v57 = vpop.permute.xlu0 %3343 }
 0x632   : > { %v11813_v30 = vpop.eup %10222 }
 0x633   : > { %v3331_v53 = vsel %vm2083_vm1, %v11813_v30, 0.0 }
 0x634   : > { %3332 = vadd.xlane.f32.xlu1 %v3331_v53 }
 0x638   : > { %3444 = vrot.lane.b32.xlu0 %v11543_v34, %s10812_s4 }
 0x63c   : > { %3438 = vrot.lane.b32.xlu0 %v11549_v36, %s10812_s4 }
 0x645   : > { %3440 = vrot.lane.b32.xlu1 %v11555_v38, %s10812_s4 }
 0x64b   : > { %v2101_v59 = vpop.xlane.xlu0 %2100 }
 0x64c   : > { %10224 = vrcp.f32 %v2101_v59 }
 0x655   : > { %v2098_v42 = vpop.xlane.xlu1 %2097 }
 0x656   : > { %10226 = vrcp.f32 %v2098_v42 }
 0x659   : > { %v10225_v0 = vpop.eup %10224 }
 0x65a   : > { %v2105_v36 = vmul.f32 %v10225_v0, %v11737_v8 }
 0x662   : > { %v2297_v34 = vpop.xlane.xlu0 %2296 }
 0x663   : > { %v10227_v1 = vpop.eup %10226  ;;  %10228 = vrcp.f32 %v2297_v34 }
 0x664   : > { %v2104_v3 = vmul.f32 %v10227_v1, %v11744_v20 }
 0x666   : > { %9353 = vmatprep.mubr.msk.f32.mxu1 %vm2083_vm1, %v2104_v3  ;;  %v2294_v38 = vpop.xlane.xlu1 %2293 }
 0x667   : > { %10230 = vrcp.f32 %v2294_v38  ;;  %9354 = vmatmul.mubr.msk.f32.vlgmr.msra.gmra.mxu1 %vm2083_vm1, %v2105_v36 }
 0x668   : > { %9364 = vmatpush3.msra.mxu1 %v11648_v14 }
 0x669   : > { %9365 = vmatprep.subr.mxu1 %v11777_v63 }
 0x66a   : > { %9366 = vmatpush3.msra.mxu1 %v11777_v63 }
 0x66b   : > { %9377 = vmatprep.subr.mxu1 %v11741_v15 }
 0x66c   : > { %v2507_v6 = vpop.xlane.xlu1 %2506 }
 0x66d   : > { %10232 = vrcp.f32 %v2507_v6 }
 0x670   : > { %v10229_v20 = vpop.eup %10228 }
 0x671   : > { %v2301_v12 = vmul.f32 %v10229_v20, %v11752_v17 }
 0x674   : > { %v10231_v52 = vpop.eup %10230  ;;  %v2718_v16 = vpop.xlane.xlu1 %2717 }
 0x675   : > { %v2300_v8 = vmul.f32 %v10231_v52, %v11757_v40  ;;  %10234 = vrcp.f32 %v2718_v16 }
 0x677   : > { %9367 = vmatprep.mubr.msk.f32.mxu1 %vm2083_vm1, %v2300_v8 }
 0x678   : > { %9368 = vmatmul.mubr.msk.f32.vlgmr.msra.gmra.mxu1 %vm2083_vm1, %v2301_v12 }
 0x679   : > { %9378 = vmatpush3.msra.mxu1 %v11741_v15 }
 0x67a   : > { %v10233_v14 = vpop.eup %10232  ;;  %9379 = vmatprep.subr.mxu1 %v11747_v22 }
 0x67b   : > { %9380 = vmatpush3.msra.mxu1 %v11747_v22  ;;  %v2513_v63 = vmul.f32 %v10233_v14, %v11762_v46 }
 0x67c   : > { %9391 = vmatprep.subr.mxu1 %v2729_v54  ;;  %v2925_v17 = vpop.xlane.xlu1 %2924 }
 0x67d   : > { %9381 = vmatprep.mubr.msk.f32.mxu1 %vm2083_vm1, %v2513_v63 }
 0x682   : > { %v10235_v7 = vpop.eup %10234 }
 0x683   : > { %v2724_v23 = vmul.f32 %v10235_v7, %v11767_v55 }
 0x684   : > { %v3121_v5 = vpop.xlane.xlu1 %3120 }
 0x69b   : > { %v2510_v40 = vpop.xlane.xlu0 %2509 }
 0x69c   : > { %10236 = vrcp.f32 %v2510_v40 }
 0x69d   : > { %10238 = vrcp.f32 %v2925_v17 }
 0x69f   : > { %v2721_v18 = vpop.xlane.xlu0 %2720 }
 0x6a0   : > { %10240 = vrcp.f32 %v2721_v18 }
 0x6a1   : > { %10242 = vrcp.f32 %v3121_v5 }
 0x6a3   : > { %v2928_v15 = vpop.xlane.xlu0 %2927 }
 0x6a4   : > { %10244 = vrcp.f32 %v2928_v15 }
 0x6a7   : > { %v3124_v21 = vpop.xlane.xlu0 %3123 }
 0x6a8   : > { %10246 = vrcp.f32 %v3124_v21 }
 0x6a9   : > { %v10237_v22 = vpop.eup %10236 }
 0x6aa   : > { %v2514_v46 = vmul.f32 %v10237_v22, %v11788_v26  ;;  %v10239_v47 = vpop.eup %10238 }
 0x6ab   : > { %v2931_v29 = vmul.f32 %v10239_v47, %v11771_v37 }
 0x6ac   : > { %9382 = vmatmul.mubr.msk.f32.vlgmr.msra.gmra.mxu1 %vm2083_vm1, %v2514_v46 }
 0x6ad   : > { %v10241_v25 = vpop.eup %10240  ;;  %9392 = vmatpush3.msra.mxu1 %v2729_v54  ;;  %9395 = vmatprep.mubr.msk.f32.mxu1 %vm2083_vm1, %v2724_v23 }
 0x6ae   : > { %9393 = vmatprep.subr.mxu1 %v11796_v31  ;;  %v2725_v50 = vmul.f32 %v10241_v25, %v11792_v11  ;;  %v10243_v48 = vpop.eup %10242 }
 0x6af   : > { %9394 = vmatpush3.msra.mxu1 %v11796_v31  ;;  %v3127_v11 = vmul.f32 %v10243_v48, %v11775_v61  ;;  %v3336_v31 = vpop.xlane.xlu0 %3335  ;;  %v3443_v61 = vpop.permute.xlu1 %3442 }
 0x6b0   : > { %9405 = vmatprep.subr.mxu1 %v11727_v62  ;;  %9396 = vmatmul.mubr.msk.f32.vlgmr.msra.gmra.mxu1 %vm2083_vm1, %v2725_v50  ;;  %10248 = vrcp.f32 %v3336_v31  ;;  %v9766_v31 = vld [vmem:[%s11362_s29 + $0x74] ss:$8 sps:$4 sm:$0xff]  }
 0x6b1   : > { %v10245_v55 = vpop.eup %10244  ;;  %9406 = vmatpush3.msra.mxu1 %v11727_v62  ;;  %9409 = vmatprep.mubr.msk.f32.mxu1 %vm2083_vm1, %v2931_v29 }
 0x6b2   : > { %9407 = vmatprep.subr.mxu1 %v11694_v49  ;;  %v2932_v26 = vmul.f32 %v10245_v55, %v11798_v32 }
 0x6b3   : > { %9408 = vmatpush3.msra.mxu1 %v11694_v49  ;;  %v3445_v32 = vpop.permute.xlu0 %3444 }
 0x6b4   : > { %9419 = vmatprep.subr.mxu1 %v11823_v60  ;;  %9410 = vmatmul.mubr.msk.f32.vlgmr.msra.gmra.mxu1 %vm2083_vm1, %v2932_v26 }
 0x6b5   : > { %v10247_v37 = vpop.eup %10246  ;;  %9420 = vmatpush3.msra.mxu1 %v11823_v60  ;;  %9423 = vmatprep.mubr.msk.f32.mxu1 %vm2083_vm1, %v3127_v11 }
 0x6b6   : > { %9421 = vmatprep.subr.mxu1 %v11804_v35  ;;  %v3128_v56 = vmul.f32 %v10247_v37, %v11802_v33 }
 0x6b7   : > { %9422 = vmatpush3.msra.mxu1 %v11804_v35  ;;  %v3439_v44 = vpop.permute.xlu0 %3438 }
 0x6b8   : > { %9433 = vmatprep.subr.mxu1 %v11825_v57  ;;  %9424 = vmatmul.mubr.msk.f32.vlgmr.msra.gmra.mxu1 %vm2083_vm1, %v3128_v56  ;;  %v9764_v56 = vld [vmem:[%s11362_s29 + $0x70] ss:$8 sps:$4 sm:$0xff]  }
 0x6b9   : > { %9434 = vmatpush3.msra.mxu1 %v11825_v57 }
 0x6ba   : > { %9435 = vmatprep.subr.mxu1 %v11827_v58 }
 0x6bb   : > { %9436 = vmatpush3.msra.mxu1 %v11827_v58 }
 0x6bc   : > { %9440 = vmatprep.subr.msk.mxu1 %vm1995_vm0, %v3445_v32 }
 0x6bd   : > { %v3333_v19 = vpop.xlane.xlu1 %3332  ;;  %v10249_v33 = vpop.eup %10248 }
 0x6be   : > { %10250 = vrcp.f32 %v3333_v19  ;;  %v3340_v24 = vmul.f32 %v10249_v33, %v11808_v39  ;;  %v9772_v19 = vld [vmem:[%s11362_s29 + $0x54] ss:$8 sps:$4 sm:$0xff]   ;;  %v9770_v33 = vld [vmem:[%s11362_s29 + $0x50] ss:$8 sps:$4 sm:$0xff]  }
 0x6c1   : > { %v3441_v51 = vpop.permute.xlu1 %3440 }
 0x6cb   : > { %v10251_v41 = vpop.eup %10250 }
 0x6cc   : > { %v3339_v35 = vmul.f32 %v10251_v41, %v11813_v30  ;;  %v9775_v41 = vld [vmem:[%s11362_s29 + $0x44] ss:$8 sps:$4 sm:$0xff]  }
 0x6ce   : > { %9437 = vmatprep.mubr.msk.f32.mxu1 %vm2083_vm1, %v3339_v35  ;;  %v9773_v35 = vld [vmem:[%s11362_s29 + $0x40] ss:$8 sps:$4 sm:$0xff]  }
 0x6cf   : > { %9438 = vmatmul.mubr.msk.f32.vlgmr.msra.gmra.mxu1 %vm2083_vm1, %v3340_v24  ;;  %v9778_v24 = vld [vmem:[%s11362_s29 + $0x34] ss:$8 sps:$4 sm:$0xff]  }
 0x6d0   : > { %9441 = vmatpush3.xpose.msk.msra.mxu1 %vm1995_vm0, %v3445_v32  ;;  %9444 = vmatprep.mubr.msk.f32.mxu1 %vm1995_vm0, %v3439_v44  ;;  %v9767_v32 = vld [vmem:[%s11362_s29 + $0x60] ss:$8 sps:$4 sm:$0xff]   ;;  %v9776_v44 = vld [vmem:[%s11362_s29 + $0x30] ss:$8 sps:$4 sm:$0xff]  }
 0x6d1   : > { %9442 = vmatprep.subr.msk.mxu1 %vm1995_vm0, %v3443_v61 }
 0x6d4   : > { %9443 = vmatpush3.xpose.msk.msra.mxu1 %vm1995_vm0, %v3443_v61  ;;  %v9769_v61 = vld [vmem:[%s11362_s29 + $0x64] ss:$8 sps:$4 sm:$0xff]  }
 0x6d7   : > { %9445 = vmatmul.mubr.msk.f32.vlgmr.msra.gmra.mxu1 %vm1995_vm0, %v3441_v51  ;;  %v9781_v51 = vld [vmem:[%s11362_s29 + $0x24] ss:$8 sps:$4 sm:$0xff]  }
 0x727   : > { %v9355_v53 = vpop.f32.mrf.mxu1 }
 0x728   : > { %2188 = vst.msk [vmem:[#allocation3 + $0x10] sm:$0xff] %vm1995_vm0, %v9355_v53  ;;  %v9779_v53 = vld [vmem:[%s11362_s29 + $0x20] ss:$8 sps:$4 sm:$0xff]  }
 0x729   : > { %v2178_v39 = vpop.f32.mrf.mxu1 }
 0x72a   : > { %2187 = vst.msk [vmem:[#allocation3] sm:$0xff] %vm1995_vm0, %v2178_v39  ;;  %v9784_v39 = vld [vmem:[%s11362_s29 + $0x14] ss:$8 sps:$4 sm:$0xff]  }
 0x738   : > { %v9369_v30 = vpop.f32.mrf.mxu1 }
 0x73a   : > { %v2382_v54 = vpop.f32.mrf.mxu1 }
 0x76c   : > { %v9383_v60 = vpop.f32.mrf.mxu1 }
 0x76e   : > { %v2593_v57 = vpop.f32.mrf.mxu1 }
 0x770   : > { %v11886_v58 = vpop.f32.mrf.mxu1 }
 0x772   : > { %v11888_v59 = vpop.f32.mrf.mxu1 }
 0x774   : > { %v9411_v42 = vpop.f32.mrf.mxu1 }
 0x775   : > { %3015 = vst.msk [vmem:[#allocation3 + $0x18] sm:$0xff] %vm1995_vm0, %v9411_v42  ;;  %v9788_v42 = vld [vmem:[%s11362_s29 + $0xf0] ss:$8 sps:$4 sm:$0xff]  }
 0x776   : > { %v3005_v0 = vpop.f32.mrf.mxu1 }
 0x777   : > { %3014 = vst.msk [vmem:[#allocation3 + $0x8] sm:$0xff] %vm1995_vm0, %v3005_v0  ;;  %v9793_v0 = vld [vmem:[%s11362_s29 + $0xe4] ss:$8 sps:$4 sm:$0xff]  }
 0x778   : > { %v9425_v1 = vpop.f32.mrf.mxu1 }
 0x77a   : > { %v3209_v34 = vpop.f32.mrf.mxu1 }
 0x78f   : > { %v9439_v3 = vpop.f32.mrf.mxu1 }
 0x791   : > { %v3419_v36 = vpop.f32.mrf.mxu1 }
 0x797   : > { %v9446_v38 = vpop.f32.mrf.mxu1 }
 0x798   : > { %v3526_v6 = vadd.f32 %v9446_v38, %v11627_v2  ;;  %v9797_v38 = vld [vmem:[%s11362_s29 + $0xc0] ss:$8 sps:$4 sm:$0xff]  }
 0x799   : > { %v3520_v20 = vpop.f32.mrf.mxu1 }
 0x79a   : > { %v3521_v52 = vadd.f32 %v3520_v20, %v11632_v4  ;;  %v3532_v8 = vsel %vm2083_vm1, %v3526_v6, -inf  ;;  %v9800_v20 = vld [vmem:[%s11362_s29 + $0xb0] ss:$8 sps:$4 sm:$0xff]  }
 0x79b   : > { %3533 = vmax.xlane.f32.xlu1 %v3532_v8  ;;  %v9803_v8 = vld [vmem:[%s11362_s29 + $0xa0] ss:$8 sps:$4 sm:$0xff]  }
 0x79c   : > { %v3529_v12 = vsel %vm2083_vm1, %v3521_v52, -inf }
 0x79d   : > { %3530 = vmax.xlane.f32.xlu0 %v3529_v12  ;;  %v9808_v12 = vld [vmem:[%s11362_s29 + $0x94] ss:$8 sps:$4 sm:$0xff]  }
 0x7ac   : > { %3553 = vrot.lane.b32.xlu1 %v11727_v62, %s10812_s4 }
 0x7b0   : > { %3220 = vrot.lane.b32.xlu1 %v3209_v34, %s10812_s4  ;;  %v9796_v34 = vld [vmem:[%s11362_s29 + $0xd4] ss:$8 sps:$4 sm:$0xff]  }
 0x7b4   : > { %3222 = vrot.lane.b32.xlu1 %v9425_v1, %s10812_s4  ;;  %v9791_v1 = vld [vmem:[%s11362_s29 + $0xe0] ss:$8 sps:$4 sm:$0xff]  }
 0x7b8   : > { %2395 = vrot.lane.b32.xlu1 %v9369_v30, %s10812_s4  ;;  %v9782_v30 = vld [vmem:[%s11362_s29 + $0x10] ss:$8 sps:$4 sm:$0xff]  }
 0x7bc   : > { %3432 = vrot.lane.b32.xlu1 %v9439_v3, %s10811_s24  ;;  %v9794_v3 = vld [vmem:[%s11362_s29 + $0xd0] ss:$8 sps:$4 sm:$0xff]  }
 0x7c0   : > { %2606 = vrot.lane.b32.xlu1 %v9383_v60, %s10811_s24  ;;  %v9785_v60 = vld [vmem:[%s11362_s29] ss:$8 sps:$4 sm:$0xff]  }
 0x824   : > { %v3534_v2 = vpop.xlane.xlu1 %3533 }
 0x825   : > { %v3536_v4 = vsub.f32 %v3526_v6, %v3534_v2  ;;  %v9802_v6 = vld [vmem:[%s11362_s29 + $0xb4] ss:$8 sps:$4 sm:$0xff]   ;;  %v9806_v2 = vld [vmem:[%s11362_s29 + $0x90] ss:$8 sps:$4 sm:$0xff]  }
 0x826   : > { %v3531_v14 = vpop.xlane.xlu0 %3530 }
 0x827   : > { %v3539_v63 = vmul.f32 1.442695, %v3536_v4  ;;  %v3535_v16 = vsub.f32 %v3521_v52, %v3531_v14  ;;  %v9805_v52 = vld [vmem:[%s11362_s29 + $0xa4] ss:$8 sps:$4 sm:$0xff]   ;;  %v9809_v4 = vld [vmem:[%s11362_s29 + $0x80] ss:$8 sps:$4 sm:$0xff]  }
 0x828   : > { %v3554_v40 = vpop.permute.xlu1 %3553  ;;  %v9811_v14 = vld [vmem:[%s11362_s29 + $0x84] ss:$8 sps:$4 sm:$0xff]  }
 0x829   : > { %10252 = vpow2.f32 %v3539_v63  ;;  %v3537_v17 = vmul.f32 1.442695, %v3535_v16  ;;  %9447 = vmatprep.subr.mxu1 %v3554_v40 }
 0x82a   : > { %9448 = vmatpush3.msra.mxu1 %v3554_v40 }
 0x82b   : > { %10254 = vpow2.f32 %v3537_v17 }
 0x82c   : > { %v3221_v62 = vpop.permute.xlu1 %3220 }
 0x82d   : > { %3226 = vst.msk [vmem:[#allocation3 + $0x8] sm:$0xff] %vm2399_vm2, %v3221_v62 }
 0x830   : > { %v3223_v18 = vpop.permute.xlu1 %3222 }
 0x831   : > { %3227 = vst.msk [vmem:[#allocation3 + $0x18] sm:$0xff] %vm2399_vm2, %v3223_v18 }
 0x834   : > { %v2396_v5 = vpop.permute.xlu1 %2395 }
 0x835   : > { %2401 = vst.msk [vmem:[#allocation3 + $0x10] sm:$0xff] %vm2399_vm2, %v2396_v5 }
 0x836   : > { %v10253_v15 = vpop.eup %10252 }
 0x837   : > { %v3544_v21 = vsel %vm2083_vm1, %v10253_v15, 0.0 }
 0x838   : > { %v10255_v7 = vpop.eup %10254  ;;  %v3433_v22 = vpop.permute.xlu1 %3432  ;;  %3545 = vadd.xlane.f32.xlu0 %v3544_v21 }
 0x839   : > { %3437 = vst.msk [vmem:[#allocation3 + $0x18] sm:$0xff] %vm2610_vm3, %v3433_v22  ;;  %v3541_v46 = vsel %vm2083_vm1, %v10255_v7, 0.0 }
 0x83c   : > { %v2607_v23 = vpop.permute.xlu1 %2606  ;;  %3542 = vadd.xlane.f32.xlu0 %v3541_v46 }
 0x83d   : > { %2612 = vst.msk [vmem:[#allocation3 + $0x10] sm:$0xff] %vm2610_vm3, %v2607_v23 }
 0x852   : > { %3551 = vrot.lane.b32.xlu0 %v11694_v49, %s10812_s4 }
 0x856   : > { %2393 = vrot.lane.b32.xlu0 %v2382_v54, %s10812_s4  ;;  %v9787_v54 = vld [vmem:[%s11362_s29 + $0x4] ss:$8 sps:$4 sm:$0xff]  }
 0x85a   : > { %3430 = vrot.lane.b32.xlu0 %v3419_v36, %s10811_s24  ;;  %v9799_v36 = vld [vmem:[%s11362_s29 + $0xc4] ss:$8 sps:$4 sm:$0xff]  }
 0x85e   : > { %2604 = vrot.lane.b32.xlu0 %v2593_v57, %s10811_s24  ;;  %v9790_v57 = vld [vmem:[%s11362_s29 + $0xf4] ss:$8 sps:$4 sm:$0xff]  }
 0x8c1   : > { %v3546_v47 = vpop.xlane.xlu0 %3545 }
 0x8c2   : > { %10256 = vrcp.f32 %v3546_v47 }
 0x8c5   : > { %v3543_v25 = vpop.xlane.xlu0 %3542 }
 0x8c6   : > { %10258 = vrcp.f32 %v3543_v25 }
 0x8c9   : > { %v3552_v50 = vpop.permute.xlu0 %3551 }
 0x8ca   : > { %9449 = vmatprep.subr.mxu1 %v3552_v50 }
 0x8cb   : > { %9450 = vmatpush3.msra.mxu1 %v3552_v50 }
 0x8cc   : > { %3858 = vmatprep.subr.bf16.mxu1 %v9766_v31 }
 0x8cd   : > { %v2394_v29 = vpop.permute.xlu0 %2393 }
 0x8ce   : > { %2400 = vst.msk [vmem:[#allocation3] sm:$0xff] %vm2399_vm2, %v2394_v29 }
 0x8cf   : > { %v10257_v48 = vpop.eup %10256 }
 0x8d0   : > { %v3550_v37 = vmul.f32 %v10257_v48, %v10253_v15  ;;  %v10268_v48 = vld [vmem:[#allocation2 + $0x10] sm:$0xff] }
 0x8d1   : > { %v3431_v49 = vpop.permute.xlu0 %3430 }
 0x8d2   : > { %3436 = vst.msk [vmem:[#allocation3 + $0x8] sm:$0xff] %vm2610_vm3, %v3431_v49 }
 0x8d3   : > { %v10259_v55 = vpop.eup %10258 }
 0x8d4   : > { %v3549_v26 = vmul.f32 %v10259_v55, %v10255_v7 }
 0x8d5   : > { %v2605_v11 = vpop.permute.xlu0 %2604 }
 0x8d6   : > { %2611 = vst.msk [vmem:[#allocation3] sm:$0xff] %vm2610_vm3, %v2605_v11  ;;  %9451 = vmatprep.mubr.msk.f32.mxu1 %vm2083_vm1, %v3549_v26  ;;  %v10269_v26 = vld [vmem:[#allocation2] sm:$0xff] }
 0x8d7   : > { %9452 = vmatmul.mubr.msk.f32.vlgmr.msra.gmra.mxu1 %vm2083_vm1, %v3550_v37 }
 0x8d8   : > { %3859 = vmatpush1.bf16.xpose.msra.mxu1 %v9764_v56 }
 0x8d9   : > { %3860 = vmatprep.subr.bf16.mxu1 %v9769_v61 }
 0x8e0   : > { %3861 = vmatpush1.bf16.xpose.msra.mxu1 %v9767_v32  ;;  %v10270_v32 = vld [vmem:[#allocation2 + $0x18] sm:$0xff] }
 0x8e1   : > { %3862 = vmatprep.subr.bf16.mxu1 %v9772_v19 }
 0x8e8   : > { %3863 = vmatpush1.bf16.xpose.msra.mxu1 %v9770_v33  ;;  %v10271_v33 = vld [vmem:[#allocation2 + $0x8] sm:$0xff] }
 0x8e9   : > { %3864 = vmatprep.subr.bf16.mxu1 %v9775_v41 }
 0x8f0   : > { %3865 = vmatpush1.bf16.xpose.msra.mxu1 %v9773_v35 }
 0x8f1   : > { %3866 = vmatprep.subr.bf16.mxu1 %v9778_v24  ;;  %v9812_v24 = vld [vmem:[%s11367_s26 + $0x70] ss:$8 sps:$4 sm:$0xff]  }
 0x8f8   : > { %3867 = vmatpush1.bf16.xpose.msra.mxu1 %v9776_v44  ;;  %v9814_v44 = vld [vmem:[%s11367_s26 + $0x74] ss:$8 sps:$4 sm:$0xff]  }
 0x8f9   : > { %3868 = vmatprep.subr.bf16.mxu1 %v9781_v51  ;;  %v9815_v51 = vld [vmem:[%s11367_s26 + $0x170] ss:$8 sps:$4 sm:$0xff]   ;;  %5592 = vmatprep.subr.bf16.mxu0 %v9814_v44 }
 0x8fa   : > { %5593 = vmatpush1.bf16.xpose.msra.mxu0 %v9812_v24 }
 0x900   : > { %3869 = vmatpush1.bf16.xpose.msra.mxu1 %v9779_v53  ;;  %v9817_v53 = vld [vmem:[%s11367_s26 + $0x174] ss:$8 sps:$4 sm:$0xff]  }
 0x901   : > { %3870 = vmatprep.subr.bf16.mxu1 %v9784_v39  ;;  %v9820_v39 = vld [vmem:[%s11367_s26 + $0x64] ss:$8 sps:$4 sm:$0xff]  }
 0x902   : > { %5594 = vmatprep.subr.bf16.mxu0 %v9820_v39 }
 0x908   : > { %3871 = vmatpush1.bf16.xpose.msra.mxu1 %v9782_v30  ;;  %v9823_v30 = vld [vmem:[%s11367_s26 + $0x164] ss:$8 sps:$4 sm:$0xff]  }
 0x909   : > { %3872 = vmatprep.subr.bf16.mxu1 %v9787_v54  ;;  %v9818_v54 = vld [vmem:[%s11367_s26 + $0x60] ss:$8 sps:$4 sm:$0xff]  }
 0x90a   : > { %5595 = vmatpush1.bf16.xpose.msra.mxu0 %v9818_v54 }
 0x910   : > { %3873 = vmatpush1.bf16.xpose.msra.mxu1 %v9785_v60  ;;  %v9821_v60 = vld [vmem:[%s11367_s26 + $0x160] ss:$8 sps:$4 sm:$0xff]  }
 0x911   : > { %3874 = vmatprep.subr.bf16.mxu1 %v9790_v57  ;;  %v9826_v57 = vld [vmem:[%s11367_s26 + $0x54] ss:$8 sps:$4 sm:$0xff]  }
 0x912   : > { %5596 = vmatprep.subr.bf16.mxu0 %v9826_v57 }
 0x918   : > { %3875 = vmatpush2.bf16.xpose.msra.mxu1 %v9788_v42  ;;  %v9829_v42 = vld [vmem:[%s11367_s26 + $0x154] ss:$8 sps:$4 sm:$0xff]  }
 0x919   : > { %3876 = vmatprep.subr.bf16.mxu1 %v9793_v0  ;;  %v9824_v0 = vld [vmem:[%s11367_s26 + $0x50] ss:$8 sps:$4 sm:$0xff]  }
 0x91a   : > { %5597 = vmatpush1.bf16.xpose.msra.mxu0 %v9824_v0 }
 0x920   : > { %3877 = vmatpush2.bf16.xpose.msra.mxu1 %v9791_v1  ;;  %v9827_v1 = vld [vmem:[%s11367_s26 + $0x150] ss:$8 sps:$4 sm:$0xff]  }
 0x921   : > { %3878 = vmatprep.subr.bf16.mxu1 %v9796_v34  ;;  %v9832_v34 = vld [vmem:[%s11367_s26 + $0x44] ss:$8 sps:$4 sm:$0xff]  }
 0x922   : > { %5598 = vmatprep.subr.bf16.mxu0 %v9832_v34  ;;  %v9895_v34 = vld [vmem:[%s11367_s26 + $0x1a4] ss:$8 sps:$4 sm:$0xff]  }
 0x928   : > { %3879 = vmatpush2.bf16.xpose.msra.mxu1 %v9794_v3  ;;  %v9835_v3 = vld [vmem:[%s11367_s26 + $0x144] ss:$8 sps:$4 sm:$0xff]  }
 0x929   : > { %3880 = vmatprep.subr.bf16.mxu1 %v9799_v36  ;;  %v9830_v36 = vld [vmem:[%s11367_s26 + $0x40] ss:$8 sps:$4 sm:$0xff]  }
 0x92a   : > { %5599 = vmatpush1.bf16.xpose.msra.mxu0 %v9830_v36  ;;  %v9893_v36 = vld [vmem:[%s11367_s26 + $0x1a0] ss:$8 sps:$4 sm:$0xff]  }
 0x930   : > { %3881 = vmatpush2.bf16.xpose.msra.mxu1 %v9797_v38  ;;  %v9833_v38 = vld [vmem:[%s11367_s26 + $0x140] ss:$8 sps:$4 sm:$0xff]  }
 0x931   : > { %3882 = vmatprep.subr.bf16.mxu1 %v9802_v6  ;;  %v9838_v6 = vld [vmem:[%s11367_s26 + $0x34] ss:$8 sps:$4 sm:$0xff]  }
 0x932   : > { %5600 = vmatprep.subr.bf16.mxu0 %v9838_v6  ;;  %v9899_v6 = vld [vmem:[%s11367_s26 + $0x190] ss:$8 sps:$4 sm:$0xff]  }
 0x938   : > { %3883 = vmatpush2.bf16.xpose.msra.mxu1 %v9800_v20  ;;  %v9841_v20 = vld [vmem:[%s11367_s26 + $0x134] ss:$8 sps:$4 sm:$0xff]  }
 0x939   : > { %3884 = vmatprep.subr.bf16.mxu1 %v9805_v52  ;;  %v9836_v52 = vld [vmem:[%s11367_s26 + $0x30] ss:$8 sps:$4 sm:$0xff]  }
 0x93a   : > { %5601 = vmatpush1.bf16.xpose.msra.mxu0 %v9836_v52  ;;  %v9907_v52 = vld [vmem:[%s11367_s26 + $0x184] ss:$8 sps:$4 sm:$0xff]  }
 0x940   : > { %3885 = vmatpush2.bf16.xpose.msra.mxu1 %v9803_v8  ;;  %v9839_v8 = vld [vmem:[%s11367_s26 + $0x130] ss:$8 sps:$4 sm:$0xff]  }
 0x941   : > { %3886 = vmatprep.subr.bf16.mxu1 %v9808_v12  ;;  %v9844_v12 = vld [vmem:[%s11367_s26 + $0x24] ss:$8 sps:$4 sm:$0xff]  }
 0x942   : > { %5602 = vmatprep.subr.bf16.mxu0 %v9844_v12  ;;  %v9905_v12 = vld [vmem:[%s11367_s26 + $0x180] ss:$8 sps:$4 sm:$0xff]  }
 0x948   : > { %3887 = vmatpush2.bf16.xpose.msra.mxu1 %v9806_v2  ;;  %v9847_v2 = vld [vmem:[%s11367_s26 + $0x124] ss:$8 sps:$4 sm:$0xff]  }
 0x949   : > { %3888 = vmatprep.subr.bf16.mxu1 %v9811_v14  ;;  %v9845_v14 = vld [vmem:[%s11367_s26 + $0x120] ss:$8 sps:$4 sm:$0xff]  }
 0x950   : > { %3889 = vmatpush2.bf16.xpose.msra.mxu1 %v9809_v4  ;;  %v9842_v4 = vld [vmem:[%s11367_s26 + $0x20] ss:$8 sps:$4 sm:$0xff]  }
 0x951   : > { %5635 = vmatprep.subr.bf16.mxu1 %v9817_v53  ;;  %5603 = vmatpush1.bf16.xpose.msra.mxu0 %v9842_v4  ;;  %v9913_v4 = vld [vmem:[%s11367_s26 + $0x374] ss:$8 sps:$4 sm:$0xff]  }
 0x997   : > { %v9453_v63 = vpop.f32.mrf.mxu1 }
 0x998   : > { %3642 = vrot.lane.b32.xlu1 %v9453_v63, %s10810_s27  ;;  %v9850_v63 = vld [vmem:[%s11367_s26 + $0x14] ss:$8 sps:$4 sm:$0xff]  }
 0x999   : > { %v3629_v16 = vpop.f32.mrf.mxu1  ;;  %5604 = vmatprep.subr.bf16.mxu0 %v9850_v63 }
 0x99a   : > { %3640 = vrot.lane.b32.xlu0 %v3629_v16, %s10810_s27  ;;  %v9853_v16 = vld [vmem:[%s11367_s26 + $0x114] ss:$8 sps:$4 sm:$0xff]  }
 0x99c   : > { %2817 = vrot.lane.b32.xlu1 %v11886_v58, %s10810_s27 }
 0x99e   : > { %2815 = vrot.lane.b32.xlu0 %v11888_v59, %s10810_s27  ;;  %v3686_v59 = vld [vmem:[%s866_s2] sm:$0x3] }
 0x99f   : > { %v3691_v46 = vrot.slane %v3686_v59, %v11501_v10  ;;  %v3695_v23 = vrot.slane %v3686_v59, %v11531_v28  ;;  %v9868_v59 = vld [vmem:[%s11367_s26 + $0xe4] ss:$8 sps:$4 sm:$0xff]  }
 0xa0a   : > { %v3643_v40 = vpop.permute.xlu1 %3642 }
 0xa0b   : > { %3647 = vst.msk [vmem:[#allocation3 + $0x18] sm:$0xff] %vm2821_vm4, %v3643_v40  ;;  %v9848_v40 = vld [vmem:[%s11367_s26 + $0x10] ss:$8 sps:$4 sm:$0xff]  }
 0xa0c   : > { %v3641_v17 = vpop.permute.xlu0 %3640  ;;  %5605 = vmatpush1.bf16.xpose.msra.mxu0 %v9848_v40 }
 0xa0d   : > { %3646 = vst.msk [vmem:[#allocation3 + $0x8] sm:$0xff] %vm2821_vm4, %v3641_v17  ;;  %v9851_v17 = vld [vmem:[%s11367_s26 + $0x110] ss:$8 sps:$4 sm:$0xff]  }
 0xa0e   : > { %v2818_v62 = vpop.permute.xlu1 %2817 }
 0xa0f   : > { %2823 = vst.msk [vmem:[#allocation3 + $0x10] sm:$0xff] %vm2821_vm4, %v2818_v62  ;;  %v9856_v62 = vld [vmem:[%s11367_s26 + $0x4] ss:$8 sps:$4 sm:$0xff]  }
 0xa10   : > { %v2816_v18 = vpop.permute.xlu0 %2815  ;;  %5606 = vmatprep.subr.bf16.mxu0 %v9856_v62 }
 0xa11   : > { %2822 = vst.msk [vmem:[#allocation3] sm:$0xff] %vm2821_vm4, %v2816_v18  ;;  %v9859_v18 = vld [vmem:[%s11367_s26 + $0x104] ss:$8 sps:$4 sm:$0xff]  }
 0xa12   : > { %v3651_v15 = vld [vmem:[#allocation3 + $0x18] sm:$0xff] }
 0xa14   : > { %v3649_v5 = vld [vmem:[#allocation3 + $0x8] sm:$0xff] }
 0xa15   : > { %v3685_v21 = vpack.c.bf16 %v3651_v15, %v3649_v5  ;;  %v9854_v5 = vld [vmem:[%s11367_s26] ss:$8 sps:$4 sm:$0xff]  }
 0xa16   : > { %v3650_v22 = vld [vmem:[#allocation3 + $0x10] sm:$0xff]  ;;  %v9857_v15 = vld [vmem:[%s11367_s26 + $0x100] ss:$8 sps:$4 sm:$0xff]   ;;  %5607 = vmatpush1.bf16.xpose.msra.mxu0 %v9854_v5 }
 0xa17   : > { %3890 = vmatprep.mubr.bf16.mxu1 %v3685_v21  ;;  %v9862_v21 = vld [vmem:[%s11367_s26 + $0xf4] ss:$8 sps:$4 sm:$0xff]  }
 0xa18   : > { %v3648_v7 = vld [vmem:[#allocation3] sm:$0xff]  ;;  %5608 = vmatprep.subr.bf16.mxu0 %v9862_v21 }
 0xa19   : > { %v3684_v58 = vpack.c.bf16 %v3650_v22, %v3648_v7  ;;  %v9865_v7 = vld [vmem:[%s11367_s26 + $0x1f4] ss:$8 sps:$4 sm:$0xff]   ;;  %v9860_v22 = vld [vmem:[%s11367_s26 + $0xf0] ss:$8 sps:$4 sm:$0xff]  }
 0xa1b   : > { %3891 = vmatmul.mubr.bf16.vlgmr.msra.gmra.mxu1 %v3684_v58  ;;  %v9863_v58 = vld [vmem:[%s11367_s26 + $0x1f0] ss:$8 sps:$4 sm:$0xff]  }
 0xa1c   : > { %5636 = vmatpush1.bf16.xpose.msra.mxu1 %v9815_v51 }
 0xa1d   : > { %5637 = vmatprep.subr.bf16.mxu1 %v9823_v30 }
 0xa1e   : > { %5609 = vmatpush2.bf16.xpose.msra.mxu0 %v9860_v22 }
 0xa1f   : > { %5610 = vmatprep.subr.bf16.mxu0 %v9868_v59 }
 0xa24   : > { %5638 = vmatpush1.bf16.xpose.msra.mxu1 %v9821_v60 }
 0xa25   : > { %5639 = vmatprep.subr.bf16.mxu1 %v9829_v42 }
 0xa2c   : > { %5640 = vmatpush1.bf16.xpose.msra.mxu1 %v9827_v1 }
 0xa2d   : > { %5641 = vmatprep.subr.bf16.mxu1 %v9835_v3  ;;  %v9890_v3 = vld [vmem:[%s11367_s26 + $0xa0] ss:$8 sps:$4 sm:$0xff]  }
 0xa34   : > { %5642 = vmatpush1.bf16.xpose.msra.mxu1 %v9833_v38  ;;  %v9896_v38 = vld [vmem:[%s11367_s26 + $0x90] ss:$8 sps:$4 sm:$0xff]  }
 0xa35   : > { %5643 = vmatprep.subr.bf16.mxu1 %v9841_v20  ;;  %v9904_v20 = vld [vmem:[%s11367_s26 + $0x84] ss:$8 sps:$4 sm:$0xff]  }
 0xa3c   : > { %5644 = vmatpush1.bf16.xpose.msra.mxu1 %v9839_v8  ;;  %v9902_v8 = vld [vmem:[%s11367_s26 + $0x80] ss:$8 sps:$4 sm:$0xff]  }
 0xa3d   : > { %5645 = vmatprep.subr.bf16.mxu1 %v9847_v2  ;;  %v9910_v2 = vld [vmem:[%s11367_s26 + $0x274] ss:$8 sps:$4 sm:$0xff]  }
 0xa44   : > { %5646 = vmatpush1.bf16.xpose.msra.mxu1 %v9845_v14 }
 0xa45   : > { %5647 = vmatprep.subr.bf16.mxu1 %v9853_v16 }
 0xa4c   : > { %5648 = vmatpush1.bf16.xpose.msra.mxu1 %v9851_v17 }
 0xa4d   : > { %5649 = vmatprep.subr.bf16.mxu1 %v9859_v18  ;;  %v3905_v18 = vld [vmem:[%s875_s19] sm:$0x3]  ;;  %s12790_s19 = sld [smem:[#allocation39_spill]] (!%p9229_p11) }
 0xa4e   : > { %v3944_v21 = vrot.slane %v3905_v18, %v11501_v10 }
 0xa54   : > { %5650 = vmatpush1.bf16.xpose.msra.mxu1 %v9857_v15  ;;  %v3906_v15 = vld [vmem:[%s884_s30] sm:$0x3] }
 0xa55   : > { %5651 = vmatprep.subr.bf16.mxu1 %v9865_v7  ;;  %v3948_v7 = vrot.slane %v3905_v18, %v11531_v28  ;;  %v9967_v18 = vld [vmem:[%s11367_s26 + $0x3e4] ss:$8 sps:$4 sm:$0xff]  }
 0xa5c   : > { %5652 = vmatpush2.bf16.xpose.msra.mxu1 %v9863_v58 }
 0xadb   : > { %v3892_v47 = vpop.f32.mrf.mxu1 }
 0xadc   : > { %v3893_v25 = vadd.f32 %v3892_v47, %v3691_v46  ;;  %v9869_v47 = vld [vmem:[%s11367_s26 + $0x1e0] ss:$8 sps:$4 sm:$0xff]  }
 0xadd   : > { %v3894_v50 = vpop.f32.mrf.mxu1 }
 0xade   : > { %v3895_v29 = vadd.f32 %v3894_v50, %v3695_v23  ;;  %v11962_v55 = vadd.f32 %v10268_v48, %v3893_v25  ;;  %v9874_v25 = vld [vmem:[%s11367_s26 + $0xd4] ss:$8 sps:$4 sm:$0xff]   ;;  %v9880_v48 = vld [vmem:[%s11367_s26 + $0xc4] ss:$8 sps:$4 sm:$0xff]  }
 0xadf   : > { %v3896_v49 = vpop.f32.mrf.mxu1  ;;  %v9877_v50 = vld [vmem:[%s11367_s26 + $0x1d4] ss:$8 sps:$4 sm:$0xff]  }
 0xae0   : > { %v11964_v11 = vadd.f32 %v10269_v26, %v3895_v29  ;;  %v3897_v37 = vadd.f32 %v3896_v49, %v3691_v46  ;;  %v9871_v46 = vld [vmem:[%s11367_s26 + $0x1e4] ss:$8 sps:$4 sm:$0xff]   ;;  %v9872_v29 = vld [vmem:[%s11367_s26 + $0xd0] ss:$8 sps:$4 sm:$0xff]  }
 0xae1   : > { %v3898_v31 = vpop.f32.mrf.mxu1  ;;  %5653 = vmatprep.subr.bf16.mxu1 %v9871_v46  ;;  %v9875_v49 = vld [vmem:[%s11367_s26 + $0x1d0] ss:$8 sps:$4 sm:$0xff]   ;;  %v9883_v26 = vld [vmem:[%s11367_s26 + $0x1c4] ss:$8 sps:$4 sm:$0xff]   ;;  %v3959_v46 = vrot.slane %v3906_v15, %v11501_v10 }
 0xae2   : > { %v3899_v56 = vadd.f32 %v3898_v31, %v3695_v23  ;;  %v3907_v61 = vadd.f32 %v11964_v11, %v11962_v55  ;;  %v11968_v19 = vadd.f32 %v10270_v32, %v3897_v37  ;;  %v9866_v23 = vld [vmem:[%s11367_s26 + $0xe0] ss:$8 sps:$4 sm:$0xff]   ;;  %5654 = vmatpush2.bf16.xpose.msra.mxu1 %v9869_v47  ;;  %v9884_v32 = vld [vmem:[%s11367_s26 + $0xb0] ss:$8 sps:$4 sm:$0xff]  }
 0xae3   : > { %5611 = vmatpush2.bf16.xpose.msra.mxu0 %v9866_v23  ;;  %5655 = vmatprep.subr.bf16.mxu1 %v9877_v50  ;;  %v9878_v37 = vld [vmem:[%s11367_s26 + $0xc0] ss:$8 sps:$4 sm:$0xff]   ;;  %v3963_v23 = vrot.slane %v3906_v15, %v11531_v28 }
 0xae4   : > { %v11970_v41 = vadd.f32 %v10271_v33, %v3899_v56  ;;  %3908 = vadd.xlane.f32.xlu0 %v3907_v61  ;;  %5612 = vmatprep.subr.bf16.mxu0 %v9874_v25  ;;  %v9881_v31 = vld [vmem:[%s11367_s26 + $0x1c0] ss:$8 sps:$4 sm:$0xff]   ;;  %v9886_v56 = vld [vmem:[%s11367_s26 + $0xb4] ss:$8 sps:$4 sm:$0xff]   ;;  %v9887_v33 = vld [vmem:[%s11367_s26 + $0x1b0] ss:$8 sps:$4 sm:$0xff]  }
 0xae5   : > { %v9889_v61 = vld [vmem:[%s11367_s26 + $0x1b4] ss:$8 sps:$4 sm:$0xff]   ;;  %v9965_v15 = vld [vmem:[%s11367_s26 + $0x3e0] ss:$8 sps:$4 sm:$0xff]  }
 0xae6   : > { %v3910_v35 = vadd.f32 %v11970_v41, %v11968_v19 }
 0xae8   : > { %3911 = vadd.xlane.f32.xlu1 %v3910_v35 }
 0xaea   : > { %5656 = vmatpush2.bf16.xpose.msra.mxu1 %v9875_v49 }
 0xaeb   : > { %5613 = vmatpush2.bf16.xpose.msra.mxu0 %v9872_v29  ;;  %5657 = vmatprep.subr.bf16.mxu1 %v9883_v26 }
 0xaec   : > { %5614 = vmatprep.subr.bf16.mxu0 %v9880_v48 }
 0xaf2   : > { %5658 = vmatpush2.bf16.xpose.msra.mxu1 %v9881_v31 }
 0xaf3   : > { %5615 = vmatpush2.bf16.xpose.msra.mxu0 %v9878_v37  ;;  %5659 = vmatprep.subr.bf16.mxu1 %v9889_v61 }
 0xaf4   : > { %5616 = vmatprep.subr.bf16.mxu0 %v9886_v56 }
 0xafa   : > { %5660 = vmatpush2.bf16.xpose.msra.mxu1 %v9887_v33  ;;  %v9908_v33 = vld [vmem:[%s11367_s26 + $0x270] ss:$8 sps:$4 sm:$0xff]  }
 0xafb   : > { %5617 = vmatpush2.bf16.xpose.msra.mxu0 %v9884_v32  ;;  %5661 = vmatprep.subr.bf16.mxu1 %v9895_v34  ;;  %v9932_v34 = vld [vmem:[%s11367_s26 + $0x230] ss:$8 sps:$4 sm:$0xff]  }
 0xb02   : > { %5662 = vmatpush2.bf16.xpose.msra.mxu1 %v9893_v36  ;;  %v9940_v36 = vld [vmem:[%s11367_s26 + $0x224] ss:$8 sps:$4 sm:$0xff]  }
 0xb6d   : > { %v3909_v35 = vpop.xlane.xlu0 %3908 }
 0xb6e   : > { %v3914_v24 = vmul.f32 0.00390625, %v3909_v35  ;;  %v9911_v35 = vld [vmem:[%s11367_s26 + $0x370] ss:$8 sps:$4 sm:$0xff]  }
 0xb70   : > { %v3916_v44 = vsub.f32 %v11962_v55, %v3914_v24  ;;  %v3917_v51 = vsub.f32 %v11964_v11, %v3914_v24  ;;  %v9892_v11 = vld [vmem:[%s11367_s26 + $0xa4] ss:$8 sps:$4 sm:$0xff]  }
 0xb71   : > { %v3912_v53 = vpop.xlane.xlu1 %3911  ;;  %5618 = vmatprep.subr.bf16.mxu0 %v9892_v11  ;;  %v9916_v24 = vld [vmem:[%s11367_s26 + $0x264] ss:$8 sps:$4 sm:$0xff]   ;;  %v9937_v11 = vld [vmem:[%s11367_s26 + $0x334] ss:$8 sps:$4 sm:$0xff]  }
 0xb72   : > { %v3915_v39 = vmul.f32 0.00390625, %v3912_v53  ;;  %v3920_v30 = vmul.f32 %v3916_v44, %v3916_v44  ;;  %v3921_v54 = vmul.f32 %v3917_v51, %v3917_v51  ;;  %5619 = vmatpush2.bf16.xpose.msra.mxu0 %v9890_v3  ;;  %v9917_v53 = vld [vmem:[%s11367_s26 + $0x360] ss:$8 sps:$4 sm:$0xff]   ;;  %v9935_v3 = vld [vmem:[%s11367_s26 + $0x330] ss:$8 sps:$4 sm:$0xff]  }
 0xb74   : > { %v3918_v60 = vsub.f32 %v11968_v19, %v3915_v39  ;;  %v3919_v57 = vsub.f32 %v11970_v41, %v3915_v39  ;;  %v3924_v42 = vadd.f32 %v3921_v54, %v3920_v30  ;;  %v9898_v19 = vld [vmem:[%s11367_s26 + $0x94] ss:$8 sps:$4 sm:$0xff]   ;;  %v9920_v54 = vld [vmem:[%s11367_s26 + $0x250] ss:$8 sps:$4 sm:$0xff]  }
 0xb75   : > { %v9901_v41 = vld [vmem:[%s11367_s26 + $0x194] ss:$8 sps:$4 sm:$0xff]   ;;  %5620 = vmatprep.subr.bf16.mxu0 %v9898_v19  ;;  %v9943_v19 = vld [vmem:[%s11367_s26 + $0x324] ss:$8 sps:$4 sm:$0xff]  }
 0xb76   : > { %3925 = vadd.xlane.f32.xlu0 %v3924_v42  ;;  %v3922_v0 = vmul.f32 %v3918_v60, %v3918_v60  ;;  %v3923_v55 = vmul.f32 %v3919_v57, %v3919_v57  ;;  %5663 = vmatprep.subr.bf16.mxu1 %v9901_v41  ;;  %v9922_v39 = vld [vmem:[%s11367_s26 + $0x254] ss:$8 sps:$4 sm:$0xff]   ;;  %v9931_v42 = vld [vmem:[%s11367_s26 + $0x344] ss:$8 sps:$4 sm:$0xff]   ;;  %v9938_v41 = vld [vmem:[%s11367_s26 + $0x220] ss:$8 sps:$4 sm:$0xff]  }
 0xb77   : > { %5664 = vmatpush2.bf16.xpose.msra.mxu1 %v9899_v6  ;;  %v9925_v30 = vld [vmem:[%s11367_s26 + $0x354] ss:$8 sps:$4 sm:$0xff]  }
 0xb78   : > { %v3927_v1 = vadd.f32 %v3923_v55, %v3922_v0  ;;  %5665 = vmatprep.subr.bf16.mxu1 %v9907_v52  ;;  %v9926_v0 = vld [vmem:[%s11367_s26 + $0x240] ss:$8 sps:$4 sm:$0xff]   ;;  %v9946_v6 = vld [vmem:[%s11367_s26 + $0x214] ss:$8 sps:$4 sm:$0xff]   ;;  %v9944_v52 = vld [vmem:[%s11367_s26 + $0x210] ss:$8 sps:$4 sm:$0xff]  }
 0xb79   : > { %v9929_v55 = vld [vmem:[%s11367_s26 + $0x340] ss:$8 sps:$4 sm:$0xff]  }
 0xb7a   : > { %3928 = vadd.xlane.f32.xlu0 %v3927_v1  ;;  %5621 = vmatpush2.bf16.xpose.msra.mxu0 %v9896_v38  ;;  %v9934_v1 = vld [vmem:[%s11367_s26 + $0x234] ss:$8 sps:$4 sm:$0xff]   ;;  %v9941_v38 = vld [vmem:[%s11367_s26 + $0x320] ss:$8 sps:$4 sm:$0xff]  }
 0xb7b   : > { %5622 = vmatprep.subr.bf16.mxu0 %v9904_v20  ;;  %v9949_v20 = vld [vmem:[%s11367_s26 + $0x314] ss:$8 sps:$4 sm:$0xff]  }
 0xb7f   : > { %5666 = vmatpush2.bf16.xpose.msra.mxu1 %v9905_v12  ;;  %v9952_v12 = vld [vmem:[%s11367_s26 + $0x204] ss:$8 sps:$4 sm:$0xff]  }
 0xb80   : > { %5721 = vmatprep.subr.bf16.mxu1 %v9913_v4  ;;  %v9950_v4 = vld [vmem:[%s11367_s26 + $0x200] ss:$8 sps:$4 sm:$0xff]  }
 0xb82   : > { %5623 = vmatpush2.bf16.xpose.msra.mxu0 %v9902_v8  ;;  %v9947_v8 = vld [vmem:[%s11367_s26 + $0x310] ss:$8 sps:$4 sm:$0xff]  }
 0xb83   : > { %5678 = vmatprep.subr.bf16.mxu0 %v9910_v2  ;;  %v9955_v2 = vld [vmem:[%s11367_s26 + $0x304] ss:$8 sps:$4 sm:$0xff]  }
 0xbff   : > { %v3926_v14 = vpop.xlane.xlu0 %3925 }
 0xc00   : > { %v3930_v63 = vmul.f32 0.00390625, %v3926_v14  ;;  %v9953_v14 = vld [vmem:[%s11367_s26 + $0x300] ss:$8 sps:$4 sm:$0xff]  }
 0xc02   : > { %v3932_v16 = vadd.f32 1e-05, %v3930_v63  ;;  %v9958_v63 = vld [vmem:[%s11367_s26 + $0x2f4] ss:$8 sps:$4 sm:$0xff]  }
 0xc03   : > { %v3929_v40 = vpop.xlane.xlu0 %3928 }
 0xc04   : > { %10260 = vrsqrt.f32 %v3932_v16  ;;  %v3931_v17 = vmul.f32 0.00390625, %v3929_v40  ;;  %v9961_v16 = vld [vmem:[%s11367_s26 + $0x3f4] ss:$8 sps:$4 sm:$0xff]   ;;  %v9956_v40 = vld [vmem:[%s11367_s26 + $0x2f0] ss:$8 sps:$4 sm:$0xff]  }
 0xc06   : > { %v3933_v62 = vadd.f32 1e-05, %v3931_v17  ;;  %v9959_v17 = vld [vmem:[%s11367_s26 + $0x3f0] ss:$8 sps:$4 sm:$0xff]  }
 0xc08   : > { %10262 = vrsqrt.f32 %v3933_v62  ;;  %v9964_v62 = vld [vmem:[%s11367_s26 + $0x2e4] ss:$8 sps:$4 sm:$0xff]  }
 0xc11   : > { %v10261_v5 = vpop.eup %10260 }
 0xc12   : > { %v3936_v22 = vmul.f32 %v10261_v5, %v3916_v44  ;;  %v3937_v58 = vmul.f32 %v10261_v5, %v3917_v51  ;;  %v9919_v44 = vld [vmem:[%s11367_s26 + $0x364] ss:$8 sps:$4 sm:$0xff]   ;;  %v9914_v51 = vld [vmem:[%s11367_s26 + $0x260] ss:$8 sps:$4 sm:$0xff]  }
 0xc13   : > { %v9962_v5 = vld [vmem:[%s11367_s26 + $0x2e0] ss:$8 sps:$4 sm:$0xff]  }
 0xc14   : > { %v3951_v47 = vmul.f32 %v3944_v21, %v3936_v22  ;;  %v3952_v25 = vmul.f32 %v3948_v7, %v3937_v58  ;;  %v9968_v22 = vld [vmem:[%s11367_s26 + $0x2d0] ss:$8 sps:$4 sm:$0xff]  }
 0xc15   : > { %v10263_v59 = vpop.eup %10262  ;;  %v9971_v58 = vld [vmem:[%s11367_s26 + $0x3d0] ss:$8 sps:$4 sm:$0xff]  }
 0xc16   : > { %v3938_v50 = vmul.f32 %v10263_v59, %v3918_v60  ;;  %v3939_v29 = vmul.f32 %v10263_v59, %v3919_v57  ;;  %v12052_v26 = vadd.f32 %v3959_v46, %v3951_v47  ;;  %v12054_v37 = vadd.f32 %v3963_v23, %v3952_v25  ;;  %v9923_v60 = vld [vmem:[%s11367_s26 + $0x350] ss:$8 sps:$4 sm:$0xff]   ;;  %v9928_v57 = vld [vmem:[%s11367_s26 + $0x244] ss:$8 sps:$4 sm:$0xff]   ;;  %v9977_v47 = vld [vmem:[%s11367_s26 + $0x3c0] ss:$8 sps:$4 sm:$0xff]  }
 0xc17   : > { %v9976_v59 = vld [vmem:[%s11367_s26 + $0x2c4] ss:$8 sps:$4 sm:$0xff]   ;;  %v9982_v25 = vld [vmem:[%s11367_s26 + $0x2b4] ss:$8 sps:$4 sm:$0xff]  }
 0xc18   : > { %v3953_v49 = vmul.f32 %v3944_v21, %v3938_v50  ;;  %v3954_v48 = vmul.f32 %v3948_v7, %v3939_v29  ;;  %v9970_v21 = vld [vmem:[%s11367_s26 + $0x2d4] ss:$8 sps:$4 sm:$0xff]   ;;  %v9980_v29 = vld [vmem:[%s11367_s26 + $0x2b0] ss:$8 sps:$4 sm:$0xff]  }
 0xc19   : > { %v9973_v7 = vld [vmem:[%s11367_s26 + $0x3d4] ss:$8 sps:$4 sm:$0xff]  }
 0xc1a   : > { %v12056_v31 = vadd.f32 %v3959_v46, %v3953_v49  ;;  %v12058_v56 = vadd.f32 %v3963_v23, %v3954_v48  ;;  %v9979_v46 = vld [vmem:[%s11367_s26 + $0x3c4] ss:$8 sps:$4 sm:$0xff]   ;;  %v9974_v23 = vld [vmem:[%s11367_s26 + $0x2c0] ss:$8 sps:$4 sm:$0xff]   ;;  %v9985_v50 = vld [vmem:[%s11367_s26 + $0x3b4] ss:$8 sps:$4 sm:$0xff]  }
 0xc1b   : > { %v9983_v49 = vld [vmem:[%s11367_s26 + $0x3b0] ss:$8 sps:$4 sm:$0xff]   ;;  %v9988_v48 = vld [vmem:[%s11367_s26 + $0x2a4] ss:$8 sps:$4 sm:$0xff]  }
 0xc1c   : > { %v12062_v61 = vpack.c.bf16 %v12056_v31, %v12052_v26  ;;  %v12066_v32 = vpack.c.bf16 %v12058_v56, %v12054_v37 }
 0xc1e   : > { %5624 = vmatprep.mubr.bf16.mxu0 %v12066_v32  ;;  %5667 = vmatprep.mubr.bf16.mxu1 %v12066_v32 }
 0xc1f   : > { %5625 = vmatmul.mubr.bf16.vlgmr.msra.gmra.mxu0 %v12062_v61  ;;  %5668 = vmatmul.mubr.bf16.vlgmr.msra.gmra.mxu1 %v12062_v61 }
 0xc20   : > { %5679 = vmatpush1.bf16.xpose.msra.mxu0 %v9908_v33  ;;  %5722 = vmatpush1.bf16.xpose.msra.mxu1 %v9911_v35  ;;  %v9991_v33 = vld [vmem:[%s11367_s26 + $0x3a4] ss:$8 sps:$4 sm:$0xff]   ;;  %v9986_v35 = vld [vmem:[%s11367_s26 + $0x2a0] ss:$8 sps:$4 sm:$0xff]  }
 0xc21   : > { %5710 = vmatprep.mubr.bf16.mxu0 %v12066_v32  ;;  %5753 = vmatprep.mubr.bf16.mxu1 %v12066_v32 }
 0xc22   : > { %5680 = vmatprep.subr.bf16.mxu0 %v9916_v24  ;;  %5723 = vmatprep.subr.bf16.mxu1 %v9919_v44  ;;  %v9989_v24 = vld [vmem:[%s11367_s26 + $0x3a0] ss:$8 sps:$4 sm:$0xff]   ;;  %v9994_v44 = vld [vmem:[%s11367_s26 + $0x294] ss:$8 sps:$4 sm:$0xff]  }
 0xc28   : > { %5681 = vmatpush1.bf16.xpose.msra.mxu0 %v9914_v51  ;;  %5724 = vmatpush1.bf16.xpose.msra.mxu1 %v9917_v53  ;;  %v9997_v51 = vld [vmem:[%s11367_s26 + $0x394] ss:$8 sps:$4 sm:$0xff]   ;;  %v9992_v53 = vld [vmem:[%s11367_s26 + $0x290] ss:$8 sps:$4 sm:$0xff]  }
 0xc29   : > { %5682 = vmatprep.subr.bf16.mxu0 %v9922_v39  ;;  %5725 = vmatprep.subr.bf16.mxu1 %v9925_v30  ;;  %v9995_v39 = vld [vmem:[%s11367_s26 + $0x390] ss:$8 sps:$4 sm:$0xff]   ;;  %v10000_v30 = vld [vmem:[%s11367_s26 + $0x284] ss:$8 sps:$4 sm:$0xff]  }
 0xc30   : > { %5683 = vmatpush1.bf16.xpose.msra.mxu0 %v9920_v54  ;;  %5726 = vmatpush1.bf16.xpose.msra.mxu1 %v9923_v60  ;;  %v10003_v54 = vld [vmem:[%s11367_s26 + $0x384] ss:$8 sps:$4 sm:$0xff]   ;;  %v9998_v60 = vld [vmem:[%s11367_s26 + $0x280] ss:$8 sps:$4 sm:$0xff]  }
 0xc31   : > { %5684 = vmatprep.subr.bf16.mxu0 %v9928_v57  ;;  %5727 = vmatprep.subr.bf16.mxu1 %v9931_v42  ;;  %v10001_v57 = vld [vmem:[%s11367_s26 + $0x380] ss:$8 sps:$4 sm:$0xff]   ;;  %v10006_v42 = vld [vmem:[%s11367_s26 + $0x474] ss:$8 sps:$4 sm:$0xff]  }
 0xc38   : > { %5685 = vmatpush1.bf16.xpose.msra.mxu0 %v9926_v0  ;;  %5728 = vmatpush1.bf16.xpose.msra.mxu1 %v9929_v55  ;;  %v10009_v0 = vld [vmem:[%s11367_s26 + $0x574] ss:$8 sps:$4 sm:$0xff]   ;;  %v10004_v55 = vld [vmem:[%s11367_s26 + $0x470] ss:$8 sps:$4 sm:$0xff]  }
 0xc39   : > { %5686 = vmatprep.subr.bf16.mxu0 %v9934_v1  ;;  %5729 = vmatprep.subr.bf16.mxu1 %v9937_v11  ;;  %v10007_v1 = vld [vmem:[%s11367_s26 + $0x570] ss:$8 sps:$4 sm:$0xff]   ;;  %v10012_v11 = vld [vmem:[%s11367_s26 + $0x464] ss:$8 sps:$4 sm:$0xff]  }
 0xc40   : > { %5687 = vmatpush1.bf16.xpose.msra.mxu0 %v9932_v34  ;;  %5730 = vmatpush1.bf16.xpose.msra.mxu1 %v9935_v3  ;;  %v10015_v34 = vld [vmem:[%s11367_s26 + $0x564] ss:$8 sps:$4 sm:$0xff]   ;;  %v10010_v3 = vld [vmem:[%s11367_s26 + $0x460] ss:$8 sps:$4 sm:$0xff]  }
 0xc41   : > { %5688 = vmatprep.subr.bf16.mxu0 %v9940_v36  ;;  %5731 = vmatprep.subr.bf16.mxu1 %v9943_v19  ;;  %v10013_v36 = vld [vmem:[%s11367_s26 + $0x560] ss:$8 sps:$4 sm:$0xff]   ;;  %v10018_v19 = vld [vmem:[%s11367_s26 + $0x454] ss:$8 sps:$4 sm:$0xff]  }
 0xc48   : > { %5689 = vmatpush1.bf16.xpose.msra.mxu0 %v9938_v41  ;;  %5732 = vmatpush1.bf16.xpose.msra.mxu1 %v9941_v38  ;;  %v10021_v41 = vld [vmem:[%s11367_s26 + $0x554] ss:$8 sps:$4 sm:$0xff]   ;;  %v10016_v38 = vld [vmem:[%s11367_s26 + $0x450] ss:$8 sps:$4 sm:$0xff]  }
 0xc49   : > { %5690 = vmatprep.subr.bf16.mxu0 %v9946_v6  ;;  %5733 = vmatprep.subr.bf16.mxu1 %v9949_v20  ;;  %v10019_v6 = vld [vmem:[%s11367_s26 + $0x550] ss:$8 sps:$4 sm:$0xff]   ;;  %v10024_v20 = vld [vmem:[%s11367_s26 + $0x444] ss:$8 sps:$4 sm:$0xff]  }
 0xc50   : > { %5691 = vmatpush1.bf16.xpose.msra.mxu0 %v9944_v52  ;;  %5734 = vmatpush1.bf16.xpose.msra.mxu1 %v9947_v8  ;;  %v10027_v52 = vld [vmem:[%s11367_s26 + $0x544] ss:$8 sps:$4 sm:$0xff]   ;;  %v10022_v8 = vld [vmem:[%s11367_s26 + $0x440] ss:$8 sps:$4 sm:$0xff]  }
 0xc51   : > { %5692 = vmatprep.subr.bf16.mxu0 %v9952_v12  ;;  %5735 = vmatprep.subr.bf16.mxu1 %v9955_v2  ;;  %v10025_v12 = vld [vmem:[%s11367_s26 + $0x540] ss:$8 sps:$4 sm:$0xff]   ;;  %v10030_v2 = vld [vmem:[%s11367_s26 + $0x434] ss:$8 sps:$4 sm:$0xff]  }
 0xc58   : > { %5693 = vmatpush1.bf16.xpose.msra.mxu0 %v9950_v4  ;;  %5736 = vmatpush1.bf16.xpose.msra.mxu1 %v9953_v14  ;;  %v10033_v4 = vld [vmem:[%s11367_s26 + $0x534] ss:$8 sps:$4 sm:$0xff]   ;;  %v10028_v14 = vld [vmem:[%s11367_s26 + $0x430] ss:$8 sps:$4 sm:$0xff]  }
 0xc59   : > { %5694 = vmatprep.subr.bf16.mxu0 %v9958_v63  ;;  %5737 = vmatprep.subr.bf16.mxu1 %v9961_v16  ;;  %v10031_v63 = vld [vmem:[%s11367_s26 + $0x530] ss:$8 sps:$4 sm:$0xff]   ;;  %v10036_v16 = vld [vmem:[%s11367_s26 + $0x424] ss:$8 sps:$4 sm:$0xff]  }
 0xc60   : > { %5695 = vmatpush2.bf16.xpose.msra.mxu0 %v9956_v40  ;;  %5738 = vmatpush2.bf16.xpose.msra.mxu1 %v9959_v17  ;;  %v10039_v40 = vld [vmem:[%s11367_s26 + $0x524] ss:$8 sps:$4 sm:$0xff]   ;;  %v10034_v17 = vld [vmem:[%s11367_s26 + $0x420] ss:$8 sps:$4 sm:$0xff]  }
 0xc61   : > { %5696 = vmatprep.subr.bf16.mxu0 %v9964_v62  ;;  %5739 = vmatprep.subr.bf16.mxu1 %v9967_v18  ;;  %v10037_v62 = vld [vmem:[%s11367_s26 + $0x520] ss:$8 sps:$4 sm:$0xff]   ;;  %v10042_v18 = vld [vmem:[%s11367_s26 + $0x414] ss:$8 sps:$4 sm:$0xff]  }
 0xc68   : > { %5697 = vmatpush2.bf16.xpose.msra.mxu0 %v9962_v5  ;;  %5740 = vmatpush2.bf16.xpose.msra.mxu1 %v9965_v15  ;;  %v10045_v5 = vld [vmem:[%s11367_s26 + $0x514] ss:$8 sps:$4 sm:$0xff]   ;;  %v10040_v15 = vld [vmem:[%s11367_s26 + $0x410] ss:$8 sps:$4 sm:$0xff]  }
 0xc69   : > { %5698 = vmatprep.subr.bf16.mxu0 %v9970_v21  ;;  %5741 = vmatprep.subr.bf16.mxu1 %v9973_v7  ;;  %v10043_v21 = vld [vmem:[%s11367_s26 + $0x510] ss:$8 sps:$4 sm:$0xff]   ;;  %v10048_v7 = vld [vmem:[%s11367_s26 + $0x404] ss:$8 sps:$4 sm:$0xff]  }
 0xc70   : > { %5699 = vmatpush2.bf16.xpose.msra.mxu0 %v9968_v22  ;;  %5742 = vmatpush2.bf16.xpose.msra.mxu1 %v9971_v58  ;;  %v10051_v22 = vld [vmem:[%s11367_s26 + $0x504] ss:$8 sps:$4 sm:$0xff]   ;;  %v10046_v58 = vld [vmem:[%s11367_s26 + $0x400] ss:$8 sps:$4 sm:$0xff]  }
 0xc71   : > { %5700 = vmatprep.subr.bf16.mxu0 %v9976_v59  ;;  %5743 = vmatprep.subr.bf16.mxu1 %v9979_v46  ;;  %v10049_v59 = vld [vmem:[%s11367_s26 + $0x500] ss:$8 sps:$4 sm:$0xff]   ;;  %v10054_v46 = vld [vmem:[%s11367_s26 + $0x4f4] ss:$8 sps:$4 sm:$0xff]  }
 0xc78   : > { %5701 = vmatpush2.bf16.xpose.msra.mxu0 %v9974_v23  ;;  %5744 = vmatpush2.bf16.xpose.msra.mxu1 %v9977_v47  ;;  %v10057_v23 = vld [vmem:[%s11367_s26 + $0x5f4] ss:$8 sps:$4 sm:$0xff]  }
 0xc79   : > { %5702 = vmatprep.subr.bf16.mxu0 %v9982_v25  ;;  %5745 = vmatprep.subr.bf16.mxu1 %v9985_v50  ;;  %v12175_v47 = vld [vmem:[%s11369_s16] sm:$0xff] }
 0xc7a   : > { %v10052_v25 = vld [vmem:[%s11367_s26 + $0x4f0] ss:$8 sps:$4 sm:$0xff]  }
 0xc7b   : > { %v10055_v50 = vld [vmem:[%s11367_s26 + $0x5f0] ss:$8 sps:$4 sm:$0xff]  }
 0xc80   : > { %5703 = vmatpush2.bf16.xpose.msra.mxu0 %v9980_v29  ;;  %5746 = vmatpush2.bf16.xpose.msra.mxu1 %v9983_v49  ;;  %v10060_v29 = vld [vmem:[%s11367_s26 + $0x4e4] ss:$8 sps:$4 sm:$0xff]   ;;  %v4235_v49 = vrot.slane %v12175_v47, %v11501_v10 }
 0xc81   : > { %5704 = vmatprep.subr.bf16.mxu0 %v9988_v48  ;;  %5747 = vmatprep.subr.bf16.mxu1 %v9991_v33  ;;  %v4243_v48 = vrot.slane %v12175_v47, %v11509_v13  ;;  %v10063_v33 = vld [vmem:[%s11367_s26 + $0x5e4] ss:$8 sps:$4 sm:$0xff]  }
 0xc88   : > { %5705 = vmatpush2.bf16.xpose.msra.mxu0 %v9986_v35  ;;  %5748 = vmatpush2.bf16.xpose.msra.mxu1 %v9989_v24 }
 0xc89   : > { %5706 = vmatprep.subr.bf16.mxu0 %v9994_v44  ;;  %5749 = vmatprep.subr.bf16.mxu1 %v9997_v51 }
 0xc90   : > { %5707 = vmatpush2.bf16.xpose.msra.mxu0 %v9992_v53  ;;  %5750 = vmatpush2.bf16.xpose.msra.mxu1 %v9995_v39 }
 0xc91   : > { %5708 = vmatprep.subr.bf16.mxu0 %v10000_v30  ;;  %5751 = vmatprep.subr.bf16.mxu1 %v10003_v54 }
 0xc98   : > { %5709 = vmatpush2.bf16.xpose.msra.mxu0 %v9998_v60  ;;  %5752 = vmatpush2.bf16.xpose.msra.mxu1 %v10001_v57 }
 0xc99   : > { %5764 = vmatprep.subr.bf16.mxu0 %v10006_v42  ;;  %5807 = vmatprep.subr.bf16.mxu1 %v10009_v0  ;;  %v10058_v42 = vld [vmem:[%s11367_s26 + $0x4e0] ss:$8 sps:$4 sm:$0xff]  }
 0xc9a   : > { %v10061_v0 = vld [vmem:[%s11367_s26 + $0x5e0] ss:$8 sps:$4 sm:$0xff]  }
 0xc9f   : > { %5711 = vmatmul.mubr.bf16.vlgmr.msra.gmra.mxu0 %v12062_v61  ;;  %5754 = vmatmul.mubr.bf16.vlgmr.msra.gmra.mxu1 %v12062_v61 }
 0xca0   : > { %5765 = vmatpush1.bf16.xpose.msra.mxu0 %v10004_v55  ;;  %5796 = vmatprep.mubr.bf16.mxu0 %v12066_v32  ;;  %v10066_v55 = vld [vmem:[%s11367_s26 + $0x4d4] ss:$8 sps:$4 sm:$0xff]  }
 0xca1   : > { %5808 = vmatpush1.bf16.xpose.msra.mxu1 %v10007_v1  ;;  %5839 = vmatprep.mubr.bf16.mxu1 %v12066_v32 }
 0xca2   : > { %5766 = vmatprep.subr.bf16.mxu0 %v10012_v11  ;;  %5809 = vmatprep.subr.bf16.mxu1 %v10015_v34 }
 0xca8   : > { %5767 = vmatpush1.bf16.xpose.msra.mxu0 %v10010_v3 }
 0xca9   : > { %5810 = vmatpush1.bf16.xpose.msra.mxu1 %v10013_v36  ;;  %5768 = vmatprep.subr.bf16.mxu0 %v10018_v19  ;;  %v10069_v36 = vld [vmem:[%s11367_s26 + $0x5d4] ss:$8 sps:$4 sm:$0xff]  }
 0xcaa   : > { %5811 = vmatprep.subr.bf16.mxu1 %v10021_v41 }
 0xcb0   : > { %5769 = vmatpush1.bf16.xpose.msra.mxu0 %v10016_v38  ;;  %v10064_v38 = vld [vmem:[%s11367_s26 + $0x4d0] ss:$8 sps:$4 sm:$0xff]  }
 0xcb1   : > { %5812 = vmatpush1.bf16.xpose.msra.mxu1 %v10019_v6  ;;  %5770 = vmatprep.subr.bf16.mxu0 %v10024_v20  ;;  %v10067_v6 = vld [vmem:[%s11367_s26 + $0x5d0] ss:$8 sps:$4 sm:$0xff]   ;;  %v10072_v20 = vld [vmem:[%s11367_s26 + $0x4c4] ss:$8 sps:$4 sm:$0xff]  }
 0xcb2   : > { %5813 = vmatprep.subr.bf16.mxu1 %v10027_v52  ;;  %v10075_v52 = vld [vmem:[%s11367_s26 + $0x5c4] ss:$8 sps:$4 sm:$0xff]  }
 0xcb8   : > { %5771 = vmatpush1.bf16.xpose.msra.mxu0 %v10022_v8  ;;  %v10070_v8 = vld [vmem:[%s11367_s26 + $0x4c0] ss:$8 sps:$4 sm:$0xff]  }
 0xcb9   : > { %5814 = vmatpush1.bf16.xpose.msra.mxu1 %v10025_v12  ;;  %5772 = vmatprep.subr.bf16.mxu0 %v10030_v2  ;;  %v10073_v12 = vld [vmem:[%s11367_s26 + $0x5c0] ss:$8 sps:$4 sm:$0xff]   ;;  %v10078_v2 = vld [vmem:[%s11367_s26 + $0x4b4] ss:$8 sps:$4 sm:$0xff]  }
 0xcba   : > { %5815 = vmatprep.subr.bf16.mxu1 %v10033_v4  ;;  %v10081_v4 = vld [vmem:[%s11367_s26 + $0x5b4] ss:$8 sps:$4 sm:$0xff]  }
 0xcc0   : > { %5773 = vmatpush1.bf16.xpose.msra.mxu0 %v10028_v14  ;;  %v10076_v14 = vld [vmem:[%s11367_s26 + $0x4b0] ss:$8 sps:$4 sm:$0xff]  }
 0xcc1   : > { %5816 = vmatpush1.bf16.xpose.msra.mxu1 %v10031_v63  ;;  %5774 = vmatprep.subr.bf16.mxu0 %v10036_v16  ;;  %v10079_v63 = vld [vmem:[%s11367_s26 + $0x5b0] ss:$8 sps:$4 sm:$0xff]   ;;  %v10084_v16 = vld [vmem:[%s11367_s26 + $0x4a4] ss:$8 sps:$4 sm:$0xff]  }
 0xcc2   : > { %5817 = vmatprep.subr.bf16.mxu1 %v10039_v40  ;;  %v10087_v40 = vld [vmem:[%s11367_s26 + $0x5a4] ss:$8 sps:$4 sm:$0xff]  }
 0xcc8   : > { %5775 = vmatpush1.bf16.xpose.msra.mxu0 %v10034_v17  ;;  %v10082_v17 = vld [vmem:[%s11367_s26 + $0x4a0] ss:$8 sps:$4 sm:$0xff]  }
 0xcc9   : > { %5818 = vmatpush1.bf16.xpose.msra.mxu1 %v10037_v62  ;;  %5776 = vmatprep.subr.bf16.mxu0 %v10042_v18  ;;  %v10085_v62 = vld [vmem:[%s11367_s26 + $0x5a0] ss:$8 sps:$4 sm:$0xff]   ;;  %v10090_v18 = vld [vmem:[%s11367_s26 + $0x494] ss:$8 sps:$4 sm:$0xff]  }
 0xcca   : > { %5819 = vmatprep.subr.bf16.mxu1 %v10045_v5  ;;  %v10093_v5 = vld [vmem:[%s11367_s26 + $0x594] ss:$8 sps:$4 sm:$0xff]  }
 0xcd0   : > { %5777 = vmatpush1.bf16.xpose.msra.mxu0 %v10040_v15  ;;  %v10088_v15 = vld [vmem:[%s11367_s26 + $0x490] ss:$8 sps:$4 sm:$0xff]  }
 0xcd1   : > { %5820 = vmatpush1.bf16.xpose.msra.mxu1 %v10043_v21  ;;  %5778 = vmatprep.subr.bf16.mxu0 %v10048_v7  ;;  %v10091_v21 = vld [vmem:[%s11367_s26 + $0x590] ss:$8 sps:$4 sm:$0xff]   ;;  %v10096_v7 = vld [vmem:[%s11367_s26 + $0x484] ss:$8 sps:$4 sm:$0xff]  }
 0xcd2   : > { %5821 = vmatprep.subr.bf16.mxu1 %v10051_v22  ;;  %v10099_v22 = vld [vmem:[%s11367_s26 + $0x584] ss:$8 sps:$4 sm:$0xff]  }
 0xcd8   : > { %5779 = vmatpush1.bf16.xpose.msra.mxu0 %v10046_v58  ;;  %v10094_v58 = vld [vmem:[%s11367_s26 + $0x480] ss:$8 sps:$4 sm:$0xff]  }
 0xcd9   : > { %5822 = vmatpush1.bf16.xpose.msra.mxu1 %v10049_v59  ;;  %5780 = vmatprep.subr.bf16.mxu0 %v10054_v46  ;;  %v10097_v59 = vld [vmem:[%s11367_s26 + $0x580] ss:$8 sps:$4 sm:$0xff]   ;;  %v10102_v46 = vld [vmem:[%s11367_s26 + $0x674] ss:$8 sps:$4 sm:$0xff]  }
 0xcda   : > { %5823 = vmatprep.subr.bf16.mxu1 %v10057_v23  ;;  %v10105_v23 = vld [vmem:[%s11367_s26 + $0x774] ss:$8 sps:$4 sm:$0xff]  }
 0xcdf   : > { %v5626_v35 = vpop.f32.mrf.mxu0  ;;  %v5669_v24 = vpop.f32.mrf.mxu1 }
 0xce0   : > { %5781 = vmatpush2.bf16.xpose.msra.mxu0 %v10052_v25  ;;  %v5627_v53 = vadd.f32 %v5626_v35, %v4235_v49  ;;  %v5670_v39 = vadd.f32 %v5669_v24, %v4243_v48  ;;  %v10100_v25 = vld [vmem:[%s11367_s26 + $0x670] ss:$8 sps:$4 sm:$0xff]   ;;  %v10114_v35 = vld [vmem:[%s11367_s26 + $0x654] ss:$8 sps:$4 sm:$0xff]  }
 0xce1   : > { %5824 = vmatpush2.bf16.xpose.msra.mxu1 %v10055_v50  ;;  %v12185_v44 = vpop.f32.mrf.mxu0  ;;  %v12187_v51 = vpop.f32.mrf.mxu1  ;;  %5782 = vmatprep.subr.bf16.mxu0 %v10060_v29  ;;  %v10103_v50 = vld [vmem:[%s11367_s26 + $0x770] ss:$8 sps:$4 sm:$0xff]   ;;  %v10108_v29 = vld [vmem:[%s11367_s26 + $0x664] ss:$8 sps:$4 sm:$0xff]   ;;  %v10117_v24 = vld [vmem:[%s11367_s26 + $0x754] ss:$8 sps:$4 sm:$0xff]  }
 0xce2   : > { %5825 = vmatprep.subr.bf16.mxu1 %v10063_v33  ;;  %v5936_v1 = vmax.f32 %v5627_v53, 0.0  ;;  %v5938_v11 = vmax.f32 %v5670_v39, 0.0  ;;  %v10109_v33 = vld [vmem:[%s11367_s26 + $0x760] ss:$8 sps:$4 sm:$0xff]   ;;  %v10112_v53 = vld [vmem:[%s11367_s26 + $0x650] ss:$8 sps:$4 sm:$0xff]  }
 0xce3   : > { %v5630_v30 = vpop.f32.mrf.mxu0  ;;  %v5673_v54 = vpop.f32.mrf.mxu1  ;;  %v10115_v39 = vld [vmem:[%s11367_s26 + $0x750] ss:$8 sps:$4 sm:$0xff]  }
 0xce4   : > { %v5631_v60 = vadd.f32 %v5630_v30, %v4235_v49  ;;  %v5674_v57 = vadd.f32 %v5673_v54, %v4243_v48  ;;  %v10111_v49 = vld [vmem:[%s11367_s26 + $0x764] ss:$8 sps:$4 sm:$0xff]   ;;  %v10106_v48 = vld [vmem:[%s11367_s26 + $0x660] ss:$8 sps:$4 sm:$0xff]  }
 0xce5   : > { %v10120_v30 = vld [vmem:[%s11367_s26 + $0x644] ss:$8 sps:$4 sm:$0xff]   ;;  %v10118_v54 = vld [vmem:[%s11367_s26 + $0x640] ss:$8 sps:$4 sm:$0xff]  }
 0xce6   : > { %v5952_v34 = vmax.f32 %v5631_v60, 0.0  ;;  %v5954_v3 = vmax.f32 %v5674_v57, 0.0  ;;  %v10121_v60 = vld [vmem:[%s11367_s26 + $0x740] ss:$8 sps:$4 sm:$0xff]   ;;  %v10126_v57 = vld [vmem:[%s11367_s26 + $0x634] ss:$8 sps:$4 sm:$0xff]  }
 0xce8   : > { %v12193_v19 = vpack.c.bf16 %v5952_v34, %v5936_v1  ;;  %v12195_v41 = vpack.c.bf16 %v5954_v3, %v5938_v11  ;;  %5783 = vmatpush2.bf16.xpose.msra.mxu0 %v10058_v42  ;;  %v10129_v42 = vld [vmem:[%s11367_s26 + $0x734] ss:$8 sps:$4 sm:$0xff]   ;;  %v10132_v1 = vld [vmem:[%s11367_s26 + $0x624] ss:$8 sps:$4 sm:$0xff]   ;;  %v10130_v34 = vld [vmem:[%s11367_s26 + $0x620] ss:$8 sps:$4 sm:$0xff]  }
 0xce9   : > { %5826 = vmatpush2.bf16.xpose.msra.mxu1 %v10061_v0  ;;  %5784 = vmatprep.subr.bf16.mxu0 %v10066_v55  ;;  %v10124_v0 = vld [vmem:[%s11367_s26 + $0x630] ss:$8 sps:$4 sm:$0xff]   ;;  %v10135_v11 = vld [vmem:[%s11367_s26 + $0x724] ss:$8 sps:$4 sm:$0xff]   ;;  %v10133_v3 = vld [vmem:[%s11367_s26 + $0x720] ss:$8 sps:$4 sm:$0xff]  }
 0xcea   : > { %5827 = vmatprep.subr.bf16.mxu1 %v10069_v36  ;;  %v10127_v55 = vld [vmem:[%s11367_s26 + $0x730] ss:$8 sps:$4 sm:$0xff]   ;;  %v10138_v36 = vld [vmem:[%s11367_s26 + $0x614] ss:$8 sps:$4 sm:$0xff]  }
 0xcf0   : > { %5785 = vmatpush2.bf16.xpose.msra.mxu0 %v10064_v38  ;;  %v10141_v38 = vld [vmem:[%s11367_s26 + $0x714] ss:$8 sps:$4 sm:$0xff]  }
 0xcf1   : > { %5828 = vmatpush2.bf16.xpose.msra.mxu1 %v10067_v6  ;;  %5786 = vmatprep.subr.bf16.mxu0 %v10072_v20  ;;  %v10136_v6 = vld [vmem:[%s11367_s26 + $0x610] ss:$8 sps:$4 sm:$0xff]  }
 0xcf2   : > { %5829 = vmatprep.subr.bf16.mxu1 %v10075_v52  ;;  %v10139_v20 = vld [vmem:[%s11367_s26 + $0x710] ss:$8 sps:$4 sm:$0xff]   ;;  %v10144_v52 = vld [vmem:[%s11367_s26 + $0x604] ss:$8 sps:$4 sm:$0xff]  }
 0xcf8   : > { %5787 = vmatpush2.bf16.xpose.msra.mxu0 %v10070_v8  ;;  %v10147_v8 = vld [vmem:[%s11367_s26 + $0x704] ss:$8 sps:$4 sm:$0xff]  }
 0xcf9   : > { %5830 = vmatpush2.bf16.xpose.msra.mxu1 %v10073_v12  ;;  %5788 = vmatprep.subr.bf16.mxu0 %v10078_v2  ;;  %v10142_v12 = vld [vmem:[%s11367_s26 + $0x600] ss:$8 sps:$4 sm:$0xff]  }
 0xcfa   : > { %5831 = vmatprep.subr.bf16.mxu1 %v10081_v4  ;;  %v10145_v2 = vld [vmem:[%s11367_s26 + $0x700] ss:$8 sps:$4 sm:$0xff]   ;;  %v10150_v4 = vld [vmem:[%s11367_s26 + $0x6f4] ss:$8 sps:$4 sm:$0xff]  }
 0xd00   : > { %5789 = vmatpush2.bf16.xpose.msra.mxu0 %v10076_v14  ;;  %v10153_v14 = vld [vmem:[%s11367_s26 + $0x7f4] ss:$8 sps:$4 sm:$0xff]  }
 0xd01   : > { %5832 = vmatpush2.bf16.xpose.msra.mxu1 %v10079_v63  ;;  %5790 = vmatprep.subr.bf16.mxu0 %v10084_v16  ;;  %v4258_v63 = vsub.s32 6, %v11498_v9  ;;  %v10148_v16 = vld [vmem:[%s11367_s26 + $0x6f0] ss:$8 sps:$4 sm:$0xff]  }
 0xd02   : > { %5833 = vmatprep.subr.bf16.mxu1 %v10087_v40  ;;  %v12259_v40 = vpop.f32.mrf.mxu0 }
 0xd08   : > { %5791 = vmatpush2.bf16.xpose.msra.mxu0 %v10082_v17  ;;  %v12261_v17 = vpop.f32.mrf.mxu1 }
 0xd09   : > { %5834 = vmatpush2.bf16.xpose.msra.mxu1 %v10085_v62  ;;  %5792 = vmatprep.subr.bf16.mxu0 %v10090_v18  ;;  %v10151_v62 = vld [vmem:[%s11367_s26 + $0x7f0] ss:$8 sps:$4 sm:$0xff]   ;;  %v10156_v18 = vld [vmem:[%s11367_s26 + $0x6e4] ss:$8 sps:$4 sm:$0xff]  }
 0xd0a   : > { %5835 = vmatprep.subr.bf16.mxu1 %v10093_v5  ;;  %v4251_v5 = vrot.slane %v12175_v47, %v11569_v43 }
 0xd10   : > { %5793 = vmatpush2.bf16.xpose.msra.mxu0 %v10088_v15  ;;  %v4259_v15 = vrot.slane %v12175_v47, %v4258_v63 }
 0xd11   : > { %5836 = vmatpush2.bf16.xpose.msra.mxu1 %v10091_v21  ;;  %5794 = vmatprep.subr.bf16.mxu0 %v10096_v7  ;;  %v10159_v21 = vld [vmem:[%s11367_s26 + $0x7e4] ss:$8 sps:$4 sm:$0xff]  }
 0xd12   : > { %5837 = vmatprep.subr.bf16.mxu1 %v10099_v22 }
 0xd18   : > { %5795 = vmatpush2.bf16.xpose.msra.mxu0 %v10094_v58 }
 0xd19   : > { %5838 = vmatpush2.bf16.xpose.msra.mxu1 %v10097_v59  ;;  %5850 = vmatprep.subr.bf16.mxu0 %v10102_v46 }
 0xd1a   : > { %5893 = vmatprep.subr.bf16.mxu1 %v10105_v23 }
 0xd1f   : > { %5797 = vmatmul.mubr.bf16.vlgmr.msra.gmra.mxu0 %v12062_v61 }
 0xd20   : > { %5840 = vmatmul.mubr.bf16.vlgmr.msra.gmra.mxu1 %v12062_v61  ;;  %5851 = vmatpush1.bf16.xpose.msra.mxu0 %v10100_v25 }
 0xd21   : > { %5882 = vmatprep.mubr.bf16.mxu0 %v12066_v32  ;;  %5894 = vmatpush1.bf16.xpose.msra.mxu1 %v10103_v50 }
 0xd22   : > { %5925 = vmatprep.mubr.bf16.mxu1 %v12066_v32  ;;  %5852 = vmatprep.subr.bf16.mxu0 %v10108_v29  ;;  %v10123_v32 = vld [vmem:[%s11367_s26 + $0x744] ss:$8 sps:$4 sm:$0xff]  }
 0xd23   : > { %5895 = vmatprep.subr.bf16.mxu1 %v10111_v49 }
 0xd28   : > { %5853 = vmatpush1.bf16.xpose.msra.mxu0 %v10106_v48  ;;  %v10154_v48 = vld [vmem:[%s11367_s26 + $0x6e0] ss:$8 sps:$4 sm:$0xff]  }
 0xd29   : > { %5896 = vmatpush1.bf16.xpose.msra.mxu1 %v10109_v33  ;;  %5854 = vmatprep.subr.bf16.mxu0 %v10114_v35  ;;  %v10157_v33 = vld [vmem:[%s11367_s26 + $0x7e0] ss:$8 sps:$4 sm:$0xff]   ;;  %v10162_v35 = vld [vmem:[%s11367_s26 + $0x6d4] ss:$8 sps:$4 sm:$0xff]  }
 0xd2a   : > { %5897 = vmatprep.subr.bf16.mxu1 %v10117_v24 }
 0xd30   : > { %5855 = vmatpush1.bf16.xpose.msra.mxu0 %v10112_v53 }
 0xd31   : > { %5898 = vmatpush1.bf16.xpose.msra.mxu1 %v10115_v39  ;;  %5856 = vmatprep.subr.bf16.mxu0 %v10120_v30 }
 0xd32   : > { %5899 = vmatprep.subr.bf16.mxu1 %v10123_v32  ;;  %v10165_v32 = vld [vmem:[%s11367_s26 + $0x7d4] ss:$8 sps:$4 sm:$0xff]  }
 0xd38   : > { %5857 = vmatpush1.bf16.xpose.msra.mxu0 %v10118_v54 }
 0xd39   : > { %5900 = vmatpush1.bf16.xpose.msra.mxu1 %v10121_v60  ;;  %5858 = vmatprep.subr.bf16.mxu0 %v10126_v57  ;;  %v10160_v57 = vld [vmem:[%s11367_s26 + $0x6d0] ss:$8 sps:$4 sm:$0xff]  }
 0xd3a   : > { %5901 = vmatprep.subr.bf16.mxu1 %v10129_v42  ;;  %v10163_v42 = vld [vmem:[%s11367_s26 + $0x7d0] ss:$8 sps:$4 sm:$0xff]  }
 0xd40   : > { %5859 = vmatpush1.bf16.xpose.msra.mxu0 %v10124_v0  ;;  %v10168_v0 = vld [vmem:[%s11367_s26 + $0x6c4] ss:$8 sps:$4 sm:$0xff]  }
 0xd41   : > { %5902 = vmatpush1.bf16.xpose.msra.mxu1 %v10127_v55  ;;  %5860 = vmatprep.subr.bf16.mxu0 %v10132_v1  ;;  %v10171_v55 = vld [vmem:[%s11367_s26 + $0x7c4] ss:$8 sps:$4 sm:$0xff]   ;;  %v10166_v1 = vld [vmem:[%s11367_s26 + $0x6c0] ss:$8 sps:$4 sm:$0xff]  }
 0xd42   : > { %5903 = vmatprep.subr.bf16.mxu1 %v10135_v11  ;;  %v10169_v11 = vld [vmem:[%s11367_s26 + $0x7c0] ss:$8 sps:$4 sm:$0xff]  }
 0xd48   : > { %5861 = vmatpush1.bf16.xpose.msra.mxu0 %v10130_v34  ;;  %v10174_v34 = vld [vmem:[%s11367_s26 + $0x6b4] ss:$8 sps:$4 sm:$0xff]  }
 0xd49   : > { %5904 = vmatpush1.bf16.xpose.msra.mxu1 %v10133_v3  ;;  %5862 = vmatprep.subr.bf16.mxu0 %v10138_v36  ;;  %v10177_v3 = vld [vmem:[%s11367_s26 + $0x7b4] ss:$8 sps:$4 sm:$0xff]   ;;  %v10172_v36 = vld [vmem:[%s11367_s26 + $0x6b0] ss:$8 sps:$4 sm:$0xff]  }
 0xd4a   : > { %5905 = vmatprep.subr.bf16.mxu1 %v10141_v38  ;;  %v10175_v38 = vld [vmem:[%s11367_s26 + $0x7b0] ss:$8 sps:$4 sm:$0xff]  }
 0xd50   : > { %5863 = vmatpush1.bf16.xpose.msra.mxu0 %v10136_v6  ;;  %v10180_v6 = vld [vmem:[%s11367_s26 + $0x6a4] ss:$8 sps:$4 sm:$0xff]  }
 0xd51   : > { %5906 = vmatpush1.bf16.xpose.msra.mxu1 %v10139_v20  ;;  %5864 = vmatprep.subr.bf16.mxu0 %v10144_v52  ;;  %v10183_v20 = vld [vmem:[%s11367_s26 + $0x7a4] ss:$8 sps:$4 sm:$0xff]   ;;  %v10178_v52 = vld [vmem:[%s11367_s26 + $0x6a0] ss:$8 sps:$4 sm:$0xff]  }
 0xd52   : > { %5907 = vmatprep.subr.bf16.mxu1 %v10147_v8  ;;  %v10181_v8 = vld [vmem:[%s11367_s26 + $0x7a0] ss:$8 sps:$4 sm:$0xff]  }
 0xd58   : > { %5865 = vmatpush1.bf16.xpose.msra.mxu0 %v10142_v12  ;;  %v10186_v12 = vld [vmem:[%s11367_s26 + $0x694] ss:$8 sps:$4 sm:$0xff]  }
 0xd59   : > { %5908 = vmatpush1.bf16.xpose.msra.mxu1 %v10145_v2  ;;  %5866 = vmatprep.subr.bf16.mxu0 %v10150_v4  ;;  %v10189_v2 = vld [vmem:[%s11367_s26 + $0x794] ss:$8 sps:$4 sm:$0xff]   ;;  %v10184_v4 = vld [vmem:[%s11367_s26 + $0x690] ss:$8 sps:$4 sm:$0xff]  }
 0xd5a   : > { %5909 = vmatprep.subr.bf16.mxu1 %v10153_v14  ;;  %v10187_v14 = vld [vmem:[%s11367_s26 + $0x790] ss:$8 sps:$4 sm:$0xff]  }
 0xd5f   : > { %v5712_v7 = vpop.f32.mrf.mxu0  ;;  %v5755_v22 = vpop.f32.mrf.mxu1 }
 0xd60   : > { %5867 = vmatpush2.bf16.xpose.msra.mxu0 %v10148_v16  ;;  %v5713_v46 = vadd.f32 %v5712_v7, %v4251_v5  ;;  %v5756_v23 = vadd.f32 %v5755_v22, %v4259_v15  ;;  %v10192_v16 = vld [vmem:[%s11367_s26 + $0x684] ss:$8 sps:$4 sm:$0xff]   ;;  %v10190_v7 = vld [vmem:[%s11367_s26 + $0x680] ss:$8 sps:$4 sm:$0xff]   ;;  %v4239_v22 = vrot.slane %v12175_v47, %v11531_v28 }
 0xd61   : > { %5910 = vmatpush2.bf16.xpose.msra.mxu1 %v10151_v62  ;;  %v12271_v58 = vpop.f32.mrf.mxu0  ;;  %v12273_v59 = vpop.f32.mrf.mxu1  ;;  %5868 = vmatprep.subr.bf16.mxu0 %v10156_v18  ;;  %v10195_v62 = vld [vmem:[%s11367_s26 + $0x784] ss:$8 sps:$4 sm:$0xff]  }
 0xd62   : > { %5911 = vmatprep.subr.bf16.mxu1 %v10159_v21  ;;  %v5940_v24 = vmax.f32 %v5713_v46, 0.0  ;;  %v5942_v53 = vmax.f32 %v5756_v23, 0.0  ;;  %v6080_v18 = vld [vmem:[%s11371_s1 + $0x380] sm:$0xff]  ;;  %v6089_v21 = vld [vmem:[%s11371_s1 + $0x3c8] sm:$0xff] }
 0xd63   : > { %v5716_v25 = vpop.f32.mrf.mxu0  ;;  %v5759_v50 = vpop.f32.mrf.mxu1  ;;  %v10193_v46 = vld [vmem:[%s11367_s26 + $0x780] ss:$8 sps:$4 sm:$0xff]  }
 0xd64   : > { %v5717_v29 = vadd.f32 %v5716_v25, %v4251_v5  ;;  %v5760_v49 = vadd.f32 %v5759_v50, %v4259_v15  ;;  %v6088_v5 = vld [vmem:[%s11371_s1 + $0x3c0] sm:$0xff]  ;;  %v6081_v15 = vld [vmem:[%s11371_s1 + $0x388] sm:$0xff]  ;;  %v4247_v25 = vrot.slane %v12175_v47, %v11527_v27 }
 0xd65   : > { %v9086_v23 = vcombine.high %v6080_v18, %v6088_v5  ;;  %v9088_v50 = vcombine.high %v6081_v15, %v6089_v21 }
 0xd66   : > { %v5956_v39 = vmax.f32 %v5717_v29, 0.0  ;;  %v5958_v30 = vmax.f32 %v5760_v49, 0.0  ;;  %v5633_v29 = vadd.f32 %v12259_v40, %v4239_v22  ;;  %v5676_v49 = vadd.f32 %v12261_v17, %v4247_v25 }
 0xd68   : > { %v12279_v54 = vpack.c.bf16 %v5956_v39, %v5940_v24  ;;  %v12281_v60 = vpack.c.bf16 %v5958_v30, %v5942_v53  ;;  %5869 = vmatpush2.bf16.xpose.msra.mxu0 %v10154_v48  ;;  %v5629_v48 = vadd.f32 %v12185_v44, %v4239_v22  ;;  %v6064_v24 = vld [vmem:[%s11371_s1 + $0x300] sm:$0xff]  ;;  %v5955_v39 = vmax.f32 %v5676_v49, 0.0 }
 0xd69   : > { %5912 = vmatpush2.bf16.xpose.msra.mxu1 %v10157_v33  ;;  %5870 = vmatprep.subr.bf16.mxu0 %v10162_v35  ;;  %v5672_v33 = vadd.f32 %v12187_v51, %v4247_v25  ;;  %v5953_v35 = vmax.f32 %v5633_v29, 0.0  ;;  %v6072_v53 = vld [vmem:[%s11371_s1 + $0x340] sm:$0xff]  ;;  %v9085_v30 = vcombine.low %v6080_v18, %v6088_v5  ;;  %v6017_v5 = vld [vmem:[%s11371_s1 + $0x188] sm:$0xff] }
 0xd6a   : > { %5913 = vmatprep.subr.bf16.mxu1 %v10165_v32  ;;  %v6065_v32 = vld [vmem:[%s11371_s1 + $0x308] sm:$0xff]  ;;  %v5937_v40 = vmax.f32 %v5629_v48, 0.0  ;;  %v9070_v44 = vcombine.high %v6064_v24, %v6072_v53  ;;  %v6024_v18 = vld [vmem:[%s11371_s1 + $0x1c0] sm:$0xff] }
 0xd6b   : > { %v5939_v17 = vmax.f32 %v5672_v33, 0.0  ;;  %v6008_v25 = vld [vmem:[%s11371_s1 + $0x140] sm:$0xff]  ;;  %v6009_v29 = vld [vmem:[%s11371_s1 + $0x148] sm:$0xff] }
 0xd70   : > { %5871 = vmatpush2.bf16.xpose.msra.mxu0 %v10160_v57  ;;  %v6073_v57 = vld [vmem:[%s11371_s1 + $0x348] sm:$0xff] }
 0xd71   : > { %5914 = vmatpush2.bf16.xpose.msra.mxu1 %v10163_v42  ;;  %5872 = vmatprep.subr.bf16.mxu0 %v10168_v0  ;;  %v9087_v42 = vcombine.low %v6081_v15, %v6089_v21  ;;  %v6225_v0 = vpack.c.bf16 %v5953_v35, %v5937_v40  ;;  %v9072_v51 = vcombine.high %v6065_v32, %v6073_v57  ;;  %v6025_v15 = vld [vmem:[%s11371_s1 + $0x1c8] sm:$0xff] }
 0xd72   : > { %5915 = vmatprep.subr.bf16.mxu1 %v10171_v55  ;;  %v6227_v55 = vpack.c.bf16 %v5955_v39, %v5939_v17  ;;  %v9023_v48 = vcombine.low %v6017_v5, %v6025_v15  ;;  %v5985_v39 = vld [vmem:[%s11371_s1 + $0x88] sm:$0xff]  ;;  %v5968_v17 = vld [vmem:[%s11371_s1] sm:$0xff] }
 0xd78   : > { %5873 = vmatpush2.bf16.xpose.msra.mxu0 %v10166_v1  ;;  %v6048_v1 = vld [vmem:[%s11371_s1 + $0x280] sm:$0xff] }
 0xd79   : > { %5916 = vmatpush2.bf16.xpose.msra.mxu1 %v10169_v11  ;;  %5874 = vmatprep.subr.bf16.mxu0 %v10174_v34  ;;  %v6056_v11 = vld [vmem:[%s11371_s1 + $0x2c0] sm:$0xff]  ;;  %v6049_v34 = vld [vmem:[%s11371_s1 + $0x288] sm:$0xff] }
 0xd7a   : > { %5917 = vmatprep.subr.bf16.mxu1 %v10177_v3  ;;  %v6057_v3 = vld [vmem:[%s11371_s1 + $0x2c8] sm:$0xff] }
 0xd80   : > { %5875 = vmatpush2.bf16.xpose.msra.mxu0 %v10172_v36  ;;  %v9069_v36 = vcombine.low %v6064_v24, %v6072_v53  ;;  %v5984_v24 = vld [vmem:[%s11371_s1 + $0x80] sm:$0xff] }
 0xd81   : > { %5918 = vmatpush2.bf16.xpose.msra.mxu1 %v10175_v38  ;;  %5876 = vmatprep.subr.bf16.mxu0 %v10180_v6  ;;  %v9071_v38 = vcombine.low %v6065_v32, %v6073_v57  ;;  %v9054_v6 = vcombine.high %v6048_v1, %v6056_v11  ;;  %v5992_v53 = vld [vmem:[%s11371_s1 + $0xc0] sm:$0xff] }
 0xd82   : > { %5919 = vmatprep.subr.bf16.mxu1 %v10183_v20  ;;  %v9056_v20 = vcombine.high %v6049_v34, %v6057_v3  ;;  %v8990_v40 = vcombine.high %v5984_v24, %v5992_v53 }
 0xd88   : > { %5877 = vmatpush2.bf16.xpose.msra.mxu0 %v10178_v52  ;;  %v6040_v52 = vld [vmem:[%s11371_s1 + $0x240] sm:$0xff] }
 0xd89   : > { %5920 = vmatpush2.bf16.xpose.msra.mxu1 %v10181_v8  ;;  %5878 = vmatprep.subr.bf16.mxu0 %v10186_v12  ;;  %v6033_v8 = vld [vmem:[%s11371_s1 + $0x208] sm:$0xff] }
 0xd8a   : > { %5921 = vmatprep.subr.bf16.mxu1 %v10189_v2  ;;  %v6041_v12 = vld [vmem:[%s11371_s1 + $0x248] sm:$0xff]  ;;  %v9053_v2 = vcombine.low %v6048_v1, %v6056_v11 }
 0xd90   : > { %5879 = vmatpush2.bf16.xpose.msra.mxu0 %v10184_v4  ;;  %v9055_v4 = vcombine.low %v6049_v34, %v6057_v3  ;;  %v6208_v3 = vld [vmem:[%s11371_s1 + $0x780] sm:$0xff] }
 0xd91   : > { %5922 = vmatpush2.bf16.xpose.msra.mxu1 %v10187_v14  ;;  %5880 = vmatprep.subr.bf16.mxu0 %v10192_v16  ;;  %v9040_v16 = vcombine.high %v6033_v8, %v6041_v12 }
 0xd92   : > { %5923 = vmatprep.subr.bf16.mxu1 %v10195_v62  ;;  %v6016_v62 = vld [vmem:[%s11371_s1 + $0x180] sm:$0xff] }
 0xd93   : > { %v9022_v22 = vcombine.high %v6016_v62, %v6024_v18  ;;  %v9021_v49 = vcombine.low %v6016_v62, %v6024_v18  ;;  %v12358_v18 = vpop.f32.mrf.mxu0 }
 0xd98   : > { %5881 = vmatpush2.bf16.xpose.msra.mxu0 %v10190_v7  ;;  %v9039_v7 = vcombine.low %v6033_v8, %v6041_v12  ;;  %v6192_v12 = vld [vmem:[%s11371_s1 + $0x700] sm:$0xff] }
 0xd99   : > { %5924 = vmatpush2.bf16.xpose.msra.mxu1 %v10193_v46  ;;  %7532 = vmatprep.subr.bf16.mxu0 %v9086_v23  ;;  %v9024_v46 = vcombine.high %v6017_v5, %v6025_v15  ;;  %v6000_v23 = vld [vmem:[%s11371_s1 + $0x100] sm:$0xff] }
 0xd9a   : > { %7575 = vmatprep.subr.bf16.mxu1 %v9088_v50  ;;  %v6001_v50 = vld [vmem:[%s11371_s1 + $0x108] sm:$0xff]  ;;  %v9006_v33 = vcombine.high %v6000_v23, %v6008_v25  ;;  %v9005_v32 = vcombine.low %v6000_v23, %v6008_v25 }
 0xd9b   : > { %v9008_v35 = vcombine.high %v6001_v50, %v6009_v29  ;;  %v9007_v57 = vcombine.low %v6001_v50, %v6009_v29 }
 0xd9f   : > { %5883 = vmatmul.mubr.bf16.vlgmr.msra.gmra.mxu0 %v12062_v61 }
 0xda0   : > { %5926 = vmatmul.mubr.bf16.vlgmr.msra.gmra.mxu1 %v12062_v61  ;;  %7533 = vmatpush1.bf16.xpose.msra.mxu0 %v9085_v30  ;;  %v6032_v61 = vld [vmem:[%s11371_s1 + $0x200] sm:$0xff]  ;;  %v5993_v30 = vld [vmem:[%s11371_s1 + $0xc8] sm:$0xff] }
 0xda1   : > { %7564 = vmatprep.mubr.bf16.mxu0 %v6225_v0  ;;  %7576 = vmatpush1.bf16.xpose.msra.mxu1 %v9087_v42  ;;  %v9038_v14 = vcombine.high %v6032_v61, %v6040_v52  ;;  %v9037_v21 = vcombine.low %v6032_v61, %v6040_v52  ;;  %v8992_v42 = vcombine.high %v5985_v39, %v5993_v30  ;;  %v5969_v0 = vld [vmem:[%s11371_s1 + $0x8] sm:$0xff] }
 0xda2   : > { %7607 = vmatprep.mubr.bf16.mxu1 %v6227_v55  ;;  %7534 = vmatprep.subr.bf16.mxu0 %v9070_v44  ;;  %v5976_v44 = vld [vmem:[%s11371_s1 + $0x40] sm:$0xff]  ;;  %v8989_v55 = vcombine.low %v5984_v24, %v5992_v53  ;;  %v8991_v1 = vcombine.low %v5985_v39, %v5993_v30  ;;  %v6177_v53 = vld [vmem:[%s11371_s1 + $0x688] sm:$0xff] }
 0xda3   : > { %7577 = vmatprep.subr.bf16.mxu1 %v9072_v51  ;;  %v5977_v51 = vld [vmem:[%s11371_s1 + $0x48] sm:$0xff]  ;;  %v8974_v11 = vcombine.high %v5968_v17, %v5976_v44 }
 0xda4   : > { %v8976_v34 = vcombine.high %v5969_v0, %v5977_v51  ;;  %v8975_v61 = vcombine.low %v5969_v0, %v5977_v51  ;;  %v6185_v39 = vld [vmem:[%s11371_s1 + $0x6c8] sm:$0xff] }
 0xda5   : > { %v9184_v0 = vcombine.high %v6177_v53, %v6185_v39 }
 0xda8   : > { %7535 = vmatpush1.bf16.xpose.msra.mxu0 %v9069_v36  ;;  %v6216_v36 = vld [vmem:[%s11371_s1 + $0x7c0] sm:$0xff] }
 0xda9   : > { %7578 = vmatpush1.bf16.xpose.msra.mxu1 %v9071_v38  ;;  %7536 = vmatprep.subr.bf16.mxu0 %v9054_v6  ;;  %v6209_v38 = vld [vmem:[%s11371_s1 + $0x788] sm:$0xff]  ;;  %v9214_v52 = vcombine.high %v6208_v3, %v6216_v36  ;;  %v9213_v62 = vcombine.low %v6208_v3, %v6216_v36  ;;  %v6168_v3 = vld [vmem:[%s11371_s1 + $0x640] sm:$0xff] }
 0xdaa   : > { %7579 = vmatprep.subr.bf16.mxu1 %v9056_v20  ;;  %v6217_v6 = vld [vmem:[%s11371_s1 + $0x7c8] sm:$0xff]  ;;  %v8973_v20 = vcombine.low %v5968_v17, %v5976_v44 }
 0xdab   : > { %v9216_v8 = vcombine.high %v6209_v38, %v6217_v6  ;;  %v9215_v5 = vcombine.low %v6209_v38, %v6217_v6  ;;  %v6161_v36 = vld [vmem:[%s11371_s1 + $0x608] sm:$0xff] }
 0xdac   : > { %v6169_v38 = vld [vmem:[%s11371_s1 + $0x648] sm:$0xff] }
 0xdb0   : > { %7537 = vmatpush1.bf16.xpose.msra.mxu0 %v9053_v2  ;;  %v6200_v2 = vld [vmem:[%s11371_s1 + $0x740] sm:$0xff] }
 0xdb1   : > { %7580 = vmatpush1.bf16.xpose.msra.mxu1 %v9055_v4  ;;  %7538 = vmatprep.subr.bf16.mxu0 %v9038_v14  ;;  %v12354_v4 = vld [vmem:[%s11369_s16 + $0x8] sm:$0xff]  ;;  %v9198_v15 = vcombine.high %v6192_v12, %v6200_v2 }
 0xdb2   : > { %7581 = vmatprep.subr.bf16.mxu1 %v9040_v16  ;;  %v6193_v14 = vld [vmem:[%s11371_s1 + $0x708] sm:$0xff]  ;;  %v4275_v23 = vrot.slane %v12354_v4, %v11509_v13  ;;  %v9197_v13 = vcombine.low %v6192_v12, %v6200_v2  ;;  %v6152_v12 = vld [vmem:[%s11371_s1 + $0x5c0] sm:$0xff] }
 0xdb3   : > { %v6201_v16 = vld [vmem:[%s11371_s1 + $0x748] sm:$0xff] }
 0xdb4   : > { %v6145_v2 = vld [vmem:[%s11371_s1 + $0x588] sm:$0xff] }
 0xdb8   : > { %7539 = vmatpush1.bf16.xpose.msra.mxu0 %v9037_v21  ;;  %v12360_v21 = vpop.f32.mrf.mxu1 }
 0xdb9   : > { %7582 = vmatpush1.bf16.xpose.msra.mxu1 %v9039_v7  ;;  %7540 = vmatprep.subr.bf16.mxu0 %v9022_v22  ;;  %v4267_v7 = vrot.slane %v12354_v4, %v11501_v10  ;;  %v9200_v22 = vcombine.high %v6193_v14, %v6201_v16 }
 0xdba   : > { %7583 = vmatprep.subr.bf16.mxu1 %v9024_v46 }
 0xdc0   : > { %7541 = vmatpush1.bf16.xpose.msra.mxu0 %v9021_v49 }
 0xdc1   : > { %7584 = vmatpush1.bf16.xpose.msra.mxu1 %v9023_v48  ;;  %7542 = vmatprep.subr.bf16.mxu0 %v9006_v33  ;;  %v6176_v48 = vld [vmem:[%s11371_s1 + $0x680] sm:$0xff] }
 0xdc2   : > { %7585 = vmatprep.subr.bf16.mxu1 %v9008_v35  ;;  %v6184_v33 = vld [vmem:[%s11371_s1 + $0x6c0] sm:$0xff] }
 0xdc3   : > { %v9181_v6 = vcombine.low %v6176_v48, %v6184_v33 }
 0xdc8   : > { %7543 = vmatpush1.bf16.xpose.msra.mxu0 %v9005_v32 }
 0xdc9   : > { %7586 = vmatpush1.bf16.xpose.msra.mxu1 %v9007_v57  ;;  %7544 = vmatprep.subr.bf16.mxu0 %v8990_v40  ;;  %v9199_v40 = vcombine.low %v6193_v14, %v6201_v16  ;;  %v6153_v14 = vld [vmem:[%s11371_s1 + $0x5c8] sm:$0xff] }
 0xdca   : > { %7587 = vmatprep.subr.bf16.mxu1 %v8992_v42  ;;  %v9182_v42 = vcombine.high %v6176_v48, %v6184_v33 }
 0xdd0   : > { %7545 = vmatpush1.bf16.xpose.msra.mxu0 %v8989_v55 }
 0xdd1   : > { %7588 = vmatpush1.bf16.xpose.msra.mxu1 %v8991_v1  ;;  %7546 = vmatprep.subr.bf16.mxu0 %v8974_v11 }
 0xdd2   : > { %7589 = vmatprep.subr.bf16.mxu1 %v8976_v34  ;;  %v6160_v34 = vld [vmem:[%s11371_s1 + $0x600] sm:$0xff] }
 0xdd3   : > { %v9165_v16 = vcombine.low %v6160_v34, %v6168_v3 }
 0xdd8   : > { %7547 = vmatpush1.bf16.xpose.msra.mxu0 %v8973_v20  ;;  %v9183_v20 = vcombine.low %v6177_v53, %v6185_v39  ;;  %v6113_v53 = vld [vmem:[%s11371_s1 + $0x488] sm:$0xff] }
 0xdd9   : > { %7590 = vmatpush1.bf16.xpose.msra.mxu1 %v8975_v61  ;;  %7548 = vmatprep.subr.bf16.mxu0 %v9214_v52  ;;  %v9166_v61 = vcombine.high %v6160_v34, %v6168_v3  ;;  %v9168_v52 = vcombine.high %v6161_v36, %v6169_v38  ;;  %v6121_v39 = vld [vmem:[%s11371_s1 + $0x4c8] sm:$0xff]  ;;  %v4262_v3 = vsub.s32 7, %v11498_v9  ;;  %v6071_v9 = vld [vmem:[%s11371_s1 + $0x338] sm:$0xff] }
 0xdda   : > { %7591 = vmatprep.subr.bf16.mxu1 %v9216_v8  ;;  %v6144_v8 = vld [vmem:[%s11371_s1 + $0x580] sm:$0xff] }
 0xddf   : > { %v5798_v46 = vpop.f32.mrf.mxu0 }
 0xde0   : > { %v5841_v25 = vpop.f32.mrf.mxu1  ;;  %7549 = vmatpush2.bf16.xpose.msra.mxu0 %v9213_v62  ;;  %v5799_v29 = vadd.f32 %v5798_v46, %v4267_v7  ;;  %v9167_v62 = vcombine.low %v6161_v36, %v6169_v38  ;;  %v6129_v46 = vld [vmem:[%s11371_s1 + $0x508] sm:$0xff]  ;;  %v6082_v36 = vld [vmem:[%s11371_s1 + $0x390] sm:$0xff] }
 0xde1   : > { %7592 = vmatpush2.bf16.xpose.msra.mxu1 %v9215_v5  ;;  %v12366_v50 = vpop.f32.mrf.mxu0  ;;  %7550 = vmatprep.subr.bf16.mxu0 %v9198_v15  ;;  %v5842_v35 = vadd.f32 %v5841_v25, %v4275_v23  ;;  %v9150_v5 = vcombine.high %v6144_v8, %v6152_v12  ;;  %v9152_v15 = vcombine.high %v6145_v2, %v6153_v14  ;;  %v6090_v38 = vld [vmem:[%s11371_s1 + $0x3d0] sm:$0xff] }
 0xde2   : > { %v12368_v49 = vpop.f32.mrf.mxu1  ;;  %7593 = vmatprep.subr.bf16.mxu1 %v9200_v22  ;;  %v5944_v17 = vmax.f32 %v5799_v29, 0.0  ;;  %v6136_v22 = vld [vmem:[%s11371_s1 + $0x540] sm:$0xff]  ;;  %v9149_v25 = vcombine.low %v6144_v8, %v6152_v12  ;;  %v9151_v29 = vcombine.low %v6145_v2, %v6153_v14  ;;  %v9090_v12 = vcombine.high %v6082_v36, %v6090_v38 }
 0xde3   : > { %v5802_v24 = vpop.f32.mrf.mxu0  ;;  %v5946_v51 = vmax.f32 %v5842_v35, 0.0  ;;  %v6112_v35 = vld [vmem:[%s11371_s1 + $0x480] sm:$0xff]  ;;  %v4263_v2 = vrot.slane %v12175_v47, %v4262_v3 }
 0xde4   : > { %v5803_v30 = vadd.f32 %v5802_v24, %v4267_v7  ;;  %v5845_v32 = vpop.f32.mrf.mxu1  ;;  %v6128_v7 = vld [vmem:[%s11371_s1 + $0x500] sm:$0xff] }
 0xde5   : > { %v5846_v57 = vadd.f32 %v5845_v32, %v4275_v23  ;;  %v6137_v23 = vld [vmem:[%s11371_s1 + $0x548] sm:$0xff]  ;;  %v9134_v48 = vcombine.high %v6128_v7, %v6136_v22  ;;  %v6120_v24 = vld [vmem:[%s11371_s1 + $0x4c0] sm:$0xff] }
 0xde6   : > { %v5960_v44 = vmax.f32 %v5803_v30, 0.0  ;;  %v9136_v33 = vcombine.high %v6129_v46, %v6137_v23  ;;  %v9133_v30 = vcombine.low %v6128_v7, %v6136_v22  ;;  %v9135_v32 = vcombine.low %v6129_v46, %v6137_v23  ;;  %v6066_v22 = vld [vmem:[%s11371_s1 + $0x310] sm:$0xff] }
 0xde7   : > { %v5962_v55 = vmax.f32 %v5846_v57, 0.0  ;;  %v9120_v57 = vcombine.high %v6113_v53, %v6121_v39  ;;  %v6074_v46 = vld [vmem:[%s11371_s1 + $0x350] sm:$0xff] }
 0xde8   : > { %v12374_v1 = vpack.c.bf16 %v5960_v44, %v5944_v17  ;;  %7551 = vmatpush2.bf16.xpose.msra.mxu0 %v9197_v13  ;;  %v9118_v13 = vcombine.high %v6112_v35, %v6120_v24  ;;  %v6097_v17 = vld [vmem:[%s11371_s1 + $0x408] sm:$0xff] }
 0xde9   : > { %v12376_v11 = vpack.c.bf16 %v5962_v55, %v5946_v51  ;;  %7594 = vmatpush2.bf16.xpose.msra.mxu1 %v9199_v40  ;;  %7552 = vmatprep.subr.bf16.mxu0 %v9182_v42  ;;  %v6096_v40 = vld [vmem:[%s11371_s1 + $0x400] sm:$0xff]  ;;  %v6105_v44 = vld [vmem:[%s11371_s1 + $0x448] sm:$0xff]  ;;  %v9119_v51 = vcombine.low %v6113_v53, %v6121_v39  ;;  %v6058_v53 = vld [vmem:[%s11371_s1 + $0x2d0] sm:$0xff] }
 0xdea   : > { %7595 = vmatprep.subr.bf16.mxu1 %v9184_v0  ;;  %v6104_v42 = vld [vmem:[%s11371_s1 + $0x440] sm:$0xff]  ;;  %v9117_v0 = vcombine.low %v6112_v35, %v6120_v24  ;;  %v9104_v34 = vcombine.high %v6097_v17, %v6105_v44  ;;  %v9103_v8 = vcombine.low %v6097_v17, %v6105_v44  ;;  %v6050_v24 = vld [vmem:[%s11371_s1 + $0x290] sm:$0xff]  ;;  %v6051_v39 = vld [vmem:[%s11371_s1 + $0x298] sm:$0xff] }
 0xdeb   : > { %v9102_v55 = vcombine.high %v6096_v40, %v6104_v42  ;;  %v6043_v17 = vld [vmem:[%s11371_s1 + $0x258] sm:$0xff]  ;;  %v9057_v44 = vcombine.low %v6050_v24, %v6058_v53 }
 0xdf0   : > { %7553 = vmatpush2.bf16.xpose.msra.mxu0 %v9181_v6  ;;  %v6083_v6 = vld [vmem:[%s11371_s1 + $0x398] sm:$0xff] }
 0xdf1   : > { %7596 = vmatpush2.bf16.xpose.msra.mxu1 %v9183_v20  ;;  %7554 = vmatprep.subr.bf16.mxu0 %v9166_v61  ;;  %v6091_v20 = vld [vmem:[%s11371_s1 + $0x3d8] sm:$0xff]  ;;  %v9101_v61 = vcombine.low %v6096_v40, %v6104_v42  ;;  %v6042_v40 = vld [vmem:[%s11371_s1 + $0x250] sm:$0xff] }
 0xdf2   : > { %7597 = vmatprep.subr.bf16.mxu1 %v9168_v52  ;;  %v4255_v52 = vrot.slane %v12175_v47, %v11684_v45  ;;  %v9092_v14 = vcombine.high %v6083_v6, %v6091_v20  ;;  %v6067_v47 = vld [vmem:[%s11371_s1 + $0x318] sm:$0xff] }
 0xdf3   : > { %v6035_v42 = vld [vmem:[%s11371_s1 + $0x218] sm:$0xff] }
 0xdf8   : > { %7555 = vmatpush2.bf16.xpose.msra.mxu0 %v9165_v16  ;;  %v5719_v16 = vadd.f32 %v12358_v18, %v4255_v52 }
 0xdf9   : > { %7598 = vmatpush2.bf16.xpose.msra.mxu1 %v9167_v62  ;;  %7556 = vmatprep.subr.bf16.mxu0 %v9150_v5  ;;  %v5762_v62 = vadd.f32 %v12360_v21, %v4263_v2  ;;  %v5715_v5 = vadd.f32 %v12271_v58, %v4255_v52  ;;  %v9074_v58 = vcombine.high %v6066_v22, %v6074_v46 }
 0xdfa   : > { %7599 = vmatprep.subr.bf16.mxu1 %v9152_v15  ;;  %v5758_v15 = vadd.f32 %v12273_v59, %v4263_v2  ;;  %v5957_v7 = vmax.f32 %v5719_v16, 0.0  ;;  %v6010_v2 = vld [vmem:[%s11371_s1 + $0x150] sm:$0xff]  ;;  %v6011_v16 = vld [vmem:[%s11371_s1 + $0x158] sm:$0xff] }
 0xdfb   : > { %v5959_v23 = vmax.f32 %v5762_v62, 0.0  ;;  %v5941_v18 = vmax.f32 %v5715_v5, 0.0 }
 0xdfc   : > { %v5943_v21 = vmax.f32 %v5758_v15, 0.0 }
 0xdfe   : > { %v6231_v35 = vpack.c.bf16 %v5959_v23, %v5943_v21  ;;  %v5987_v23 = vld [vmem:[%s11371_s1 + $0x98] sm:$0xff]  ;;  %v5970_v21 = vld [vmem:[%s11371_s1 + $0x10] sm:$0xff] }
 0xe00   : > { %7557 = vmatpush2.bf16.xpose.msra.mxu0 %v9149_v25  ;;  %v9089_v25 = vcombine.low %v6082_v36, %v6090_v38  ;;  %v6026_v36 = vld [vmem:[%s11371_s1 + $0x1d0] sm:$0xff]  ;;  %v6019_v38 = vld [vmem:[%s11371_s1 + $0x198] sm:$0xff] }
 0xe01   : > { %7600 = vmatpush2.bf16.xpose.msra.mxu1 %v9151_v29  ;;  %7558 = vmatprep.subr.bf16.mxu0 %v9134_v48  ;;  %v6075_v29 = vld [vmem:[%s11371_s1 + $0x358] sm:$0xff]  ;;  %v9091_v48 = vcombine.low %v6083_v6, %v6091_v20 }
 0xe02   : > { %7601 = vmatprep.subr.bf16.mxu1 %v9136_v33  ;;  %v6229_v33 = vpack.c.bf16 %v5957_v7, %v5941_v18  ;;  %v9076_v59 = vcombine.high %v6067_v47, %v6075_v29  ;;  %v6027_v6 = vld [vmem:[%s11371_s1 + $0x1d8] sm:$0xff] }
 0xe03   : > { %v9027_v5 = vcombine.low %v6019_v38, %v6027_v6 }
 0xe08   : > { %7559 = vmatpush2.bf16.xpose.msra.mxu0 %v9133_v30  ;;  %v6059_v30 = vld [vmem:[%s11371_s1 + $0x2d8] sm:$0xff] }
 0xe09   : > { %7602 = vmatpush2.bf16.xpose.msra.mxu1 %v9135_v32  ;;  %7560 = vmatprep.subr.bf16.mxu0 %v9118_v13  ;;  %v9073_v32 = vcombine.low %v6066_v22, %v6074_v46  ;;  %v9058_v13 = vcombine.high %v6050_v24, %v6058_v53  ;;  %v5986_v22 = vld [vmem:[%s11371_s1 + $0x90] sm:$0xff] }
 0xe0a   : > { %7603 = vmatprep.subr.bf16.mxu1 %v9120_v57  ;;  %v9060_v57 = vcombine.high %v6051_v39, %v6059_v30  ;;  %v5994_v46 = vld [vmem:[%s11371_s1 + $0xd0] sm:$0xff] }
 0xe0b   : > { %v8994_v18 = vcombine.high %v5986_v22, %v5994_v46 }
 0xe10   : > { %7561 = vmatpush2.bf16.xpose.msra.mxu0 %v9117_v0  ;;  %v9059_v0 = vcombine.low %v6051_v39, %v6059_v30  ;;  %v6210_v30 = vld [vmem:[%s11371_s1 + $0x790] sm:$0xff] }
 0xe11   : > { %7604 = vmatpush2.bf16.xpose.msra.mxu1 %v9119_v51  ;;  %7562 = vmatprep.subr.bf16.mxu0 %v9102_v55  ;;  %v9044_v55 = vcombine.high %v6035_v42, %v6043_v17 }
 0xe12   : > { %7605 = vmatprep.subr.bf16.mxu1 %v9104_v34  ;;  %v6018_v34 = vld [vmem:[%s11371_s1 + $0x190] sm:$0xff] }
 0xe13   : > { %v9026_v52 = vcombine.high %v6018_v34, %v6026_v36  ;;  %v9025_v62 = vcombine.low %v6018_v34, %v6026_v36  ;;  %v12450_v34 = vpop.f32.mrf.mxu0 }
 0xe18   : > { %7563 = vmatpush2.bf16.xpose.msra.mxu0 %v9101_v61  ;;  %v9043_v61 = vcombine.low %v6035_v42, %v6043_v17  ;;  %v6194_v17 = vld [vmem:[%s11371_s1 + $0x710] sm:$0xff] }
 0xe19   : > { %7606 = vmatpush2.bf16.xpose.msra.mxu1 %v9103_v8  ;;  %7618 = vmatprep.subr.bf16.mxu0 %v9090_v12  ;;  %v9028_v8 = vcombine.high %v6019_v38, %v6027_v6  ;;  %v6002_v12 = vld [vmem:[%s11371_s1 + $0x110] sm:$0xff]  ;;  %v12452_v6 = vpop.f32.mrf.mxu1 }
 0xe1a   : > { %7661 = vmatprep.subr.bf16.mxu1 %v9092_v14  ;;  %v6003_v14 = vld [vmem:[%s11371_s1 + $0x118] sm:$0xff]  ;;  %v9010_v15 = vcombine.high %v6002_v12, %v6010_v2 }
 0xe1b   : > { %v9012_v7 = vcombine.high %v6003_v14, %v6011_v16 }
 0xe1f   : > { %7565 = vmatmul.mubr.bf16.vlgmr.msra.gmra.mxu0 %v12193_v19  ;;  %v9075_v19 = vcombine.low %v6067_v47, %v6075_v29  ;;  %v9009_v47 = vcombine.low %v6002_v12, %v6010_v2  ;;  %v9011_v29 = vcombine.low %v6003_v14, %v6011_v16 }
 0xe20   : > { %7608 = vmatmul.mubr.bf16.vlgmr.msra.gmra.mxu1 %v12195_v41  ;;  %7619 = vmatpush1.bf16.xpose.msra.mxu0 %v9089_v25  ;;  %v6034_v41 = vld [vmem:[%s11371_s1 + $0x210] sm:$0xff]  ;;  %v5995_v25 = vld [vmem:[%s11371_s1 + $0xd8] sm:$0xff] }
 0xe21   : > { %7650 = vmatprep.mubr.bf16.mxu0 %v6229_v33  ;;  %7662 = vmatpush1.bf16.xpose.msra.mxu1 %v9091_v48  ;;  %v9042_v51 = vcombine.high %v6034_v41, %v6042_v40  ;;  %v9041_v20 = vcombine.low %v6034_v41, %v6042_v40  ;;  %v8996_v48 = vcombine.high %v5987_v23, %v5995_v25  ;;  %v5971_v33 = vld [vmem:[%s11371_s1 + $0x18] sm:$0xff] }
 0xe22   : > { %7693 = vmatprep.mubr.bf16.mxu1 %v6231_v35  ;;  %7620 = vmatprep.subr.bf16.mxu0 %v9074_v58  ;;  %v5978_v58 = vld [vmem:[%s11371_s1 + $0x50] sm:$0xff]  ;;  %v8993_v35 = vcombine.low %v5986_v22, %v5994_v46  ;;  %v8995_v24 = vcombine.low %v5987_v23, %v5995_v25  ;;  %v6187_v22 = vld [vmem:[%s11371_s1 + $0x6d8] sm:$0xff] }
 0xe23   : > { %7663 = vmatprep.subr.bf16.mxu1 %v9076_v59  ;;  %v5979_v59 = vld [vmem:[%s11371_s1 + $0x58] sm:$0xff]  ;;  %v8978_v53 = vcombine.high %v5970_v21, %v5978_v58 }
 0xe24   : > { %v8980_v39 = vcombine.high %v5971_v33, %v5979_v59  ;;  %v8979_v41 = vcombine.low %v5971_v33, %v5979_v59 }
 0xe28   : > { %7621 = vmatpush1.bf16.xpose.msra.mxu0 %v9073_v32  ;;  %v6218_v32 = vld [vmem:[%s11371_s1 + $0x7d0] sm:$0xff] }
 0xe29   : > { %7664 = vmatpush1.bf16.xpose.msra.mxu1 %v9075_v19  ;;  %7622 = vmatprep.subr.bf16.mxu0 %v9058_v13  ;;  %v6211_v19 = vld [vmem:[%s11371_s1 + $0x798] sm:$0xff]  ;;  %v9218_v40 = vcombine.high %v6210_v30, %v6218_v32 }
 0xe2a   : > { %7665 = vmatprep.subr.bf16.mxu1 %v9060_v57  ;;  %v6219_v13 = vld [vmem:[%s11371_s1 + $0x7d8] sm:$0xff]  ;;  %v8977_v57 = vcombine.low %v5970_v21, %v5978_v58 }
 0xe2b   : > { %v9220_v42 = vcombine.high %v6211_v19, %v6219_v13  ;;  %v9219_v36 = vcombine.low %v6211_v19, %v6219_v13 }
 0xe30   : > { %7623 = vmatpush1.bf16.xpose.msra.mxu0 %v9057_v44  ;;  %v6202_v44 = vld [vmem:[%s11371_s1 + $0x750] sm:$0xff] }
 0xe31   : > { %7666 = vmatpush1.bf16.xpose.msra.mxu1 %v9059_v0  ;;  %7624 = vmatprep.subr.bf16.mxu0 %v9042_v51  ;;  %v6195_v0 = vld [vmem:[%s11371_s1 + $0x718] sm:$0xff]  ;;  %v9202_v38 = vcombine.high %v6194_v17, %v6202_v44 }
 0xe32   : > { %7667 = vmatprep.subr.bf16.mxu1 %v9044_v55  ;;  %v6203_v51 = vld [vmem:[%s11371_s1 + $0x758] sm:$0xff]  ;;  %v9217_v55 = vcombine.low %v6210_v30, %v6218_v32 }
 0xe33   : > { %v6171_v30 = vld [vmem:[%s11371_s1 + $0x658] sm:$0xff] }
 0xe38   : > { %7625 = vmatpush1.bf16.xpose.msra.mxu0 %v9041_v20  ;;  %v4283_v20 = vrot.slane %v12354_v4, %v11569_v43  ;;  %v6186_v43 = vld [vmem:[%s11371_s1 + $0x6d0] sm:$0xff] }
 0xe39   : > { %7668 = vmatpush1.bf16.xpose.msra.mxu1 %v9043_v61  ;;  %7626 = vmatprep.subr.bf16.mxu0 %v9026_v52  ;;  %v9204_v61 = vcombine.high %v6195_v0, %v6203_v51 }
 0xe3a   : > { %7669 = vmatprep.subr.bf16.mxu1 %v9028_v8  ;;  %v4291_v8 = vrot.slane %v12354_v4, %v4258_v63  ;;  %v9201_v63 = vcombine.low %v6194_v17, %v6202_v44  ;;  %v6155_v17 = vld [vmem:[%s11371_s1 + $0x5d8] sm:$0xff] }
 0xe40   : > { %7627 = vmatpush1.bf16.xpose.msra.mxu0 %v9025_v62  ;;  %v6178_v62 = vld [vmem:[%s11371_s1 + $0x690] sm:$0xff] }
 0xe41   : > { %7670 = vmatpush1.bf16.xpose.msra.mxu1 %v9027_v5  ;;  %7628 = vmatprep.subr.bf16.mxu0 %v9010_v15  ;;  %v9185_v32 = vcombine.low %v6178_v62, %v6186_v43 }
 0xe42   : > { %7671 = vmatprep.subr.bf16.mxu1 %v9012_v7  ;;  %v6179_v7 = vld [vmem:[%s11371_s1 + $0x698] sm:$0xff] }
 0xe43   : > { %v9188_v21 = vcombine.high %v6179_v7, %v6187_v22  ;;  %v9187_v19 = vcombine.low %v6179_v7, %v6187_v22 }
 0xe48   : > { %7629 = vmatpush1.bf16.xpose.msra.mxu0 %v9009_v47  ;;  %v9203_v47 = vcombine.low %v6195_v0, %v6203_v51 }
 0xe49   : > { %7672 = vmatpush1.bf16.xpose.msra.mxu1 %v9011_v29  ;;  %7630 = vmatprep.subr.bf16.mxu0 %v8994_v18  ;;  %v9186_v29 = vcombine.high %v6178_v62, %v6186_v43  ;;  %v6114_v62 = vld [vmem:[%s11371_s1 + $0x490] sm:$0xff] }
 0xe4a   : > { %7673 = vmatprep.subr.bf16.mxu1 %v8996_v48  ;;  %v6122_v43 = vld [vmem:[%s11371_s1 + $0x4d0] sm:$0xff] }
 0xe50   : > { %7631 = vmatpush1.bf16.xpose.msra.mxu0 %v8993_v35 }
 0xe51   : > { %7674 = vmatpush1.bf16.xpose.msra.mxu1 %v8995_v24  ;;  %7632 = vmatprep.subr.bf16.mxu0 %v8978_v53  ;;  %v6162_v24 = vld [vmem:[%s11371_s1 + $0x610] sm:$0xff] }
 0xe52   : > { %7675 = vmatprep.subr.bf16.mxu1 %v8980_v39  ;;  %v6170_v53 = vld [vmem:[%s11371_s1 + $0x650] sm:$0xff]  ;;  %v6163_v39 = vld [vmem:[%s11371_s1 + $0x618] sm:$0xff] }
 0xe53   : > { %v9170_v13 = vcombine.high %v6162_v24, %v6170_v53  ;;  %v9169_v44 = vcombine.low %v6162_v24, %v6170_v53  ;;  %v9171_v0 = vcombine.low %v6163_v39, %v6171_v30  ;;  %v6092_v24 = vld [vmem:[%s11371_s1 + $0x3e0] sm:$0xff]  ;;  %v6085_v53 = vld [vmem:[%s11371_s1 + $0x3a8] sm:$0xff] }
 0xe58   : > { %7633 = vmatpush1.bf16.xpose.msra.mxu0 %v8977_v57  ;;  %v9172_v57 = vcombine.high %v6163_v39, %v6171_v30  ;;  %v6093_v39 = vld [vmem:[%s11371_s1 + $0x3e8] sm:$0xff] }
 0xe59   : > { %7676 = vmatpush1.bf16.xpose.msra.mxu1 %v8979_v41  ;;  %7634 = vmatprep.subr.bf16.mxu0 %v9218_v40  ;;  %v6146_v41 = vld [vmem:[%s11371_s1 + $0x590] sm:$0xff] }
 0xe5a   : > { %7677 = vmatprep.subr.bf16.mxu1 %v9220_v42  ;;  %v6154_v40 = vld [vmem:[%s11371_s1 + $0x5d0] sm:$0xff]  ;;  %v6147_v42 = vld [vmem:[%s11371_s1 + $0x598] sm:$0xff] }
 0xe5b   : > { %v9154_v51 = vcombine.high %v6146_v41, %v6154_v40 }
 0xe5f   : > { %v5884_v52 = vpop.f32.mrf.mxu0 }
 0xe60   : > { %v5927_v12 = vpop.f32.mrf.mxu1  ;;  %7635 = vmatpush2.bf16.xpose.msra.mxu0 %v9217_v55  ;;  %v5885_v14 = vadd.f32 %v5884_v52, %v4283_v20  ;;  %v9156_v55 = vcombine.high %v6147_v42, %v6155_v17  ;;  %v9153_v52 = vcombine.low %v6146_v41, %v6154_v40  ;;  %v9096_v41 = vcombine.high %v6085_v53, %v6093_v39 }
 0xe61   : > { %7678 = vmatpush2.bf16.xpose.msra.mxu1 %v9219_v36  ;;  %v12459_v2 = vpop.f32.mrf.mxu0  ;;  %7636 = vmatprep.subr.bf16.mxu0 %v9202_v38  ;;  %v5928_v5 = vadd.f32 %v5927_v12, %v4291_v8  ;;  %v6130_v36 = vld [vmem:[%s11371_s1 + $0x510] sm:$0xff] }
 0xe62   : > { %v12461_v16 = vpop.f32.mrf.mxu1  ;;  %7679 = vmatprep.subr.bf16.mxu1 %v9204_v61  ;;  %v5948_v18 = vmax.f32 %v5885_v14, 0.0  ;;  %v6138_v38 = vld [vmem:[%s11371_s1 + $0x550] sm:$0xff]  ;;  %v6139_v61 = vld [vmem:[%s11371_s1 + $0x558] sm:$0xff] }
 0xe63   : > { %v5888_v15 = vpop.f32.mrf.mxu0  ;;  %v5950_v58 = vmax.f32 %v5928_v5, 0.0  ;;  %v9138_v12 = vcombine.high %v6130_v36, %v6138_v38  ;;  %v6115_v5 = vld [vmem:[%s11371_s1 + $0x498] sm:$0xff]  ;;  %v9137_v7 = vcombine.low %v6130_v36, %v6138_v38 }
 0xe64   : > { %v5889_v46 = vadd.f32 %v5888_v15, %v4283_v20  ;;  %v5931_v23 = vpop.f32.mrf.mxu1  ;;  %v6131_v20 = vld [vmem:[%s11371_s1 + $0x518] sm:$0xff] }
 0xe65   : > { %v5932_v25 = vadd.f32 %v5931_v23, %v4291_v8  ;;  %v9155_v8 = vcombine.low %v6147_v42, %v6155_v17  ;;  %v9140_v14 = vcombine.high %v6131_v20, %v6139_v61  ;;  %v6123_v15 = vld [vmem:[%s11371_s1 + $0x4d8] sm:$0xff]  ;;  %v9139_v22 = vcombine.low %v6131_v20, %v6139_v61 }
 0xe66   : > { %v5964_v48 = vmax.f32 %v5889_v46, 0.0  ;;  %v9122_v46 = vcombine.high %v6114_v62, %v6122_v43  ;;  %v9124_v23 = vcombine.high %v6115_v5, %v6123_v15  ;;  %v9095_v20 = vcombine.low %v6085_v53, %v6093_v39  ;;  %v6004_v39 = vld [vmem:[%s11371_s1 + $0x120] sm:$0xff] }
 0xe67   : > { %v5966_v33 = vmax.f32 %v5932_v25, 0.0  ;;  %v6106_v25 = vld [vmem:[%s11371_s1 + $0x450] sm:$0xff] }
 0xe68   : > { %v12467_v59 = vpack.c.bf16 %v5964_v48, %v5948_v18  ;;  %7637 = vmatpush2.bf16.xpose.msra.mxu0 %v9201_v63  ;;  %v6098_v63 = vld [vmem:[%s11371_s1 + $0x410] sm:$0xff]  ;;  %v9121_v18 = vcombine.low %v6114_v62, %v6122_v43  ;;  %v9123_v48 = vcombine.low %v6115_v5, %v6123_v15  ;;  %v6061_v62 = vld [vmem:[%s11371_s1 + $0x2e8] sm:$0xff] }
 0xe69   : > { %v12469_v35 = vpack.c.bf16 %v5966_v33, %v5950_v58  ;;  %7680 = vmatpush2.bf16.xpose.msra.mxu1 %v9203_v47  ;;  %7638 = vmatprep.subr.bf16.mxu0 %v9186_v29  ;;  %v6099_v47 = vld [vmem:[%s11371_s1 + $0x418] sm:$0xff]  ;;  %v6084_v33 = vld [vmem:[%s11371_s1 + $0x3a0] sm:$0xff]  ;;  %v9105_v30 = vcombine.low %v6098_v63, %v6106_v25 }
 0xe6a   : > { %7681 = vmatprep.subr.bf16.mxu1 %v9188_v21  ;;  %v6107_v29 = vld [vmem:[%s11371_s1 + $0x458] sm:$0xff]  ;;  %v9106_v21 = vcombine.high %v6098_v63, %v6106_v25  ;;  %v9093_v38 = vcombine.low %v6084_v33, %v6092_v24 }
 0xe6b   : > { %v9108_v58 = vcombine.high %v6099_v47, %v6107_v29 }
 0xe70   : > { %7639 = vmatpush2.bf16.xpose.msra.mxu0 %v9185_v32  ;;  %v4271_v32 = vrot.slane %v12354_v4, %v11531_v28 }
 0xe71   : > { %7682 = vmatpush2.bf16.xpose.msra.mxu1 %v9187_v19  ;;  %7640 = vmatprep.subr.bf16.mxu0 %v9170_v13  ;;  %v9107_v19 = vcombine.low %v6099_v47, %v6107_v29  ;;  %v9094_v13 = vcombine.high %v6084_v33, %v6092_v24  ;;  %v6020_v29 = vld [vmem:[%s11371_s1 + $0x1a0] sm:$0xff] }
 0xe72   : > { %7683 = vmatprep.subr.bf16.mxu1 %v9172_v57  ;;  %v4279_v57 = vrot.slane %v12354_v4, %v11527_v27  ;;  %v5805_v40 = vadd.f32 %v12450_v34, %v4271_v32  ;;  %v5801_v17 = vadd.f32 %v12366_v50, %v4271_v32  ;;  %v6069_v27 = vld [vmem:[%s11371_s1 + $0x328] sm:$0xff] }
 0xe73   : > { %v6077_v4 = vld [vmem:[%s11371_s1 + $0x368] sm:$0xff] }
 0xe74   : > { %v5848_v42 = vadd.f32 %v12452_v6, %v4279_v57  ;;  %v5945_v34 = vmax.f32 %v5801_v17, 0.0  ;;  %v6005_v32 = vld [vmem:[%s11371_s1 + $0x128] sm:$0xff]  ;;  %v5996_v17 = vld [vmem:[%s11371_s1 + $0xe0] sm:$0xff] }
 0xe76   : > { %v5963_v36 = vmax.f32 %v5848_v42, 0.0  ;;  %v5988_v42 = vld [vmem:[%s11371_s1 + $0xa0] sm:$0xff] }
 0xe78   : > { %7641 = vmatpush2.bf16.xpose.msra.mxu0 %v9169_v44  ;;  %v5844_v44 = vadd.f32 %v12368_v49, %v4279_v57  ;;  %v9080_v49 = vcombine.high %v6069_v27, %v6077_v4 }
 0xe79   : > { %7684 = vmatpush2.bf16.xpose.msra.mxu1 %v9171_v0  ;;  %7642 = vmatprep.subr.bf16.mxu0 %v9154_v51  ;;  %v5961_v0 = vmax.f32 %v5805_v40, 0.0  ;;  %v6068_v51 = vld [vmem:[%s11371_s1 + $0x320] sm:$0xff] }
 0xe7a   : > { %7685 = vmatprep.subr.bf16.mxu1 %v9156_v55  ;;  %v6076_v55 = vld [vmem:[%s11371_s1 + $0x360] sm:$0xff]  ;;  %v5947_v6 = vmax.f32 %v5844_v44, 0.0  ;;  %v5989_v44 = vld [vmem:[%s11371_s1 + $0xa8] sm:$0xff] }
 0xe7b   : > { %v9078_v50 = vcombine.high %v6068_v51, %v6076_v55  ;;  %v6233_v61 = vpack.c.bf16 %v5961_v0, %v5945_v34  ;;  %v9077_v43 = vcombine.low %v6068_v51, %v6076_v55  ;;  %v5997_v0 = vld [vmem:[%s11371_s1 + $0xe8] sm:$0xff] }
 0xe7c   : > { %v5973_v34 = vld [vmem:[%s11371_s1 + $0x28] sm:$0xff] }
 0xe80   : > { %7643 = vmatpush2.bf16.xpose.msra.mxu0 %v9153_v52  ;;  %v6235_v52 = vpack.c.bf16 %v5963_v36, %v5947_v6  ;;  %v8998_v36 = vcombine.high %v5988_v42, %v5996_v17  ;;  %v8997_v6 = vcombine.low %v5988_v42, %v5996_v17  ;;  %v6156_v42 = vld [vmem:[%s11371_s1 + $0x5e0] sm:$0xff]  ;;  %v6149_v17 = vld [vmem:[%s11371_s1 + $0x5a8] sm:$0xff] }
 0xe81   : > { %7686 = vmatpush2.bf16.xpose.msra.mxu1 %v9155_v8  ;;  %7644 = vmatprep.subr.bf16.mxu0 %v9138_v12  ;;  %v6052_v8 = vld [vmem:[%s11371_s1 + $0x2a0] sm:$0xff] }
 0xe82   : > { %7687 = vmatprep.subr.bf16.mxu1 %v9140_v14  ;;  %v6060_v12 = vld [vmem:[%s11371_s1 + $0x2e0] sm:$0xff]  ;;  %v6053_v14 = vld [vmem:[%s11371_s1 + $0x2a8] sm:$0xff] }
 0xe83   : > { %v9062_v5 = vcombine.high %v6052_v8, %v6060_v12  ;;  %v9064_v15 = vcombine.high %v6053_v14, %v6061_v62  ;;  %v9063_v63 = vcombine.low %v6053_v14, %v6061_v62  ;;  %v6221_v14 = vld [vmem:[%s11371_s1 + $0x7e8] sm:$0xff] }
 0xe88   : > { %7645 = vmatpush2.bf16.xpose.msra.mxu0 %v9137_v7  ;;  %v6044_v7 = vld [vmem:[%s11371_s1 + $0x260] sm:$0xff] }
 0xe89   : > { %7688 = vmatpush2.bf16.xpose.msra.mxu1 %v9139_v22  ;;  %7646 = vmatprep.subr.bf16.mxu0 %v9122_v46  ;;  %v6037_v22 = vld [vmem:[%s11371_s1 + $0x228] sm:$0xff] }
 0xe8a   : > { %7689 = vmatprep.subr.bf16.mxu1 %v9124_v23  ;;  %v6045_v46 = vld [vmem:[%s11371_s1 + $0x268] sm:$0xff]  ;;  %v9061_v23 = vcombine.low %v6052_v8, %v6060_v12  ;;  %v6220_v8 = vld [vmem:[%s11371_s1 + $0x7e0] sm:$0xff] }
 0xe8b   : > { %v9048_v47 = vcombine.high %v6037_v22, %v6045_v46  ;;  %v9047_v33 = vcombine.low %v6037_v22, %v6045_v46  ;;  %v6213_v12 = vld [vmem:[%s11371_s1 + $0x7a8] sm:$0xff] }
 0xe8c   : > { %v6205_v22 = vld [vmem:[%s11371_s1 + $0x768] sm:$0xff] }
 0xe90   : > { %7647 = vmatpush2.bf16.xpose.msra.mxu0 %v9121_v18  ;;  %v6028_v18 = vld [vmem:[%s11371_s1 + $0x1e0] sm:$0xff] }
 0xe91   : > { %7690 = vmatpush2.bf16.xpose.msra.mxu1 %v9123_v48  ;;  %7648 = vmatprep.subr.bf16.mxu0 %v9106_v21  ;;  %v6021_v48 = vld [vmem:[%s11371_s1 + $0x1a8] sm:$0xff]  ;;  %v9030_v24 = vcombine.high %v6020_v29, %v6028_v18 }
 0xe92   : > { %7691 = vmatprep.subr.bf16.mxu1 %v9108_v58  ;;  %v6029_v21 = vld [vmem:[%s11371_s1 + $0x1e8] sm:$0xff] }
 0xe93   : > { %v9032_v53 = vcombine.high %v6021_v48, %v6029_v21  ;;  %v9031_v57 = vcombine.low %v6021_v48, %v6029_v21  ;;  %v6189_v48 = vld [vmem:[%s11371_s1 + $0x6e8] sm:$0xff] }
 0xe98   : > { %7649 = vmatpush2.bf16.xpose.msra.mxu0 %v9105_v30  ;;  %v6012_v30 = vld [vmem:[%s11371_s1 + $0x160] sm:$0xff] }
 0xe99   : > { %7692 = vmatpush2.bf16.xpose.msra.mxu1 %v9107_v19  ;;  %7704 = vmatprep.subr.bf16.mxu0 %v9094_v13  ;;  %v6013_v19 = vld [vmem:[%s11371_s1 + $0x168] sm:$0xff]  ;;  %v9029_v13 = vcombine.low %v6020_v29, %v6028_v18  ;;  %v9013_v51 = vcombine.low %v6004_v39, %v6012_v30  ;;  %v6188_v29 = vld [vmem:[%s11371_s1 + $0x6e0] sm:$0xff] }
 0xe9a   : > { %7747 = vmatprep.subr.bf16.mxu1 %v9096_v41  ;;  %v9014_v41 = vcombine.high %v6004_v39, %v6012_v30  ;;  %v9016_v40 = vcombine.high %v6005_v32, %v6013_v19  ;;  %v9015_v55 = vcombine.low %v6005_v32, %v6013_v19  ;;  %v6181_v18 = vld [vmem:[%s11371_s1 + $0x6a8] sm:$0xff]  ;;  %v6172_v39 = vld [vmem:[%s11371_s1 + $0x660] sm:$0xff] }
 0xe9b   : > { %v6165_v30 = vld [vmem:[%s11371_s1 + $0x628] sm:$0xff] }
 0xe9c   : > { %v6173_v32 = vld [vmem:[%s11371_s1 + $0x668] sm:$0xff] }
 0xe9f   : > { %7651 = vmatmul.mubr.bf16.vlgmr.msra.gmra.mxu0 %v12279_v54  ;;  %v9079_v54 = vcombine.low %v6069_v27, %v6077_v4  ;;  %v5972_v27 = vld [vmem:[%s11371_s1 + $0x20] sm:$0xff] }
 0xea0   : > { %7694 = vmatmul.mubr.bf16.vlgmr.msra.gmra.mxu1 %v12281_v60  ;;  %7705 = vmatpush1.bf16.xpose.msra.mxu0 %v9093_v38  ;;  %v6036_v60 = vld [vmem:[%s11371_s1 + $0x220] sm:$0xff]  ;;  %v9000_v38 = vcombine.high %v5989_v44, %v5997_v0 }
 0xea1   : > { %7736 = vmatprep.mubr.bf16.mxu0 %v6233_v61  ;;  %7748 = vmatpush1.bf16.xpose.msra.mxu1 %v9095_v20  ;;  %v9046_v25 = vcombine.high %v6036_v60, %v6044_v7  ;;  %v9045_v58 = vcombine.low %v6036_v60, %v6044_v7  ;;  %v5980_v4 = vld [vmem:[%s11371_s1 + $0x60] sm:$0xff]  ;;  %v5981_v20 = vld [vmem:[%s11371_s1 + $0x68] sm:$0xff] }
 0xea2   : > { %7779 = vmatprep.mubr.bf16.mxu1 %v6235_v52  ;;  %7706 = vmatprep.subr.bf16.mxu0 %v9078_v50  ;;  %v8999_v50 = vcombine.low %v5989_v44, %v5997_v0  ;;  %v8982_v61 = vcombine.high %v5972_v27, %v5980_v4  ;;  %v6212_v52 = vld [vmem:[%s11371_s1 + $0x7a0] sm:$0xff]  ;;  %v8981_v62 = vcombine.low %v5972_v27, %v5980_v4  ;;  %v6197_v7 = vld [vmem:[%s11371_s1 + $0x728] sm:$0xff] }
 0xea3   : > { %7749 = vmatprep.subr.bf16.mxu1 %v9080_v49  ;;  %v8984_v49 = vcombine.high %v5973_v34, %v5981_v20  ;;  %v6204_v60 = vld [vmem:[%s11371_s1 + $0x760] sm:$0xff]  ;;  %v9221_v46 = vcombine.low %v6212_v52, %v6220_v8  ;;  %v6157_v44 = vld [vmem:[%s11371_s1 + $0x5e8] sm:$0xff] }
 0xea4   : > { %v6140_v27 = vld [vmem:[%s11371_s1 + $0x560] sm:$0xff]  ;;  %v6133_v4 = vld [vmem:[%s11371_s1 + $0x528] sm:$0xff] }
 0xea8   : > { %7707 = vmatpush1.bf16.xpose.msra.mxu0 %v9077_v43  ;;  %v8983_v43 = vcombine.low %v5973_v34, %v5981_v20  ;;  %v6141_v34 = vld [vmem:[%s11371_s1 + $0x568] sm:$0xff] }
 0xea9   : > { %7750 = vmatpush1.bf16.xpose.msra.mxu1 %v9079_v54  ;;  %7708 = vmatprep.subr.bf16.mxu0 %v9062_v5  ;;  %v9222_v54 = vcombine.high %v6212_v52, %v6220_v8  ;;  %v9224_v5 = vcombine.high %v6213_v12, %v6221_v14  ;;  %v6124_v52 = vld [vmem:[%s11371_s1 + $0x4e0] sm:$0xff]  ;;  %v6117_v8 = vld [vmem:[%s11371_s1 + $0x4a8] sm:$0xff] }
 0xeaa   : > { %7751 = vmatprep.subr.bf16.mxu1 %v9064_v15  ;;  %v6196_v15 = vld [vmem:[%s11371_s1 + $0x720] sm:$0xff] }
 0xeab   : > { %v9205_v21 = vcombine.low %v6196_v15, %v6204_v60 }
 0xeb0   : > { %7709 = vmatpush1.bf16.xpose.msra.mxu0 %v9061_v23  ;;  %v9223_v23 = vcombine.low %v6213_v12, %v6221_v14  ;;  %v6125_v12 = vld [vmem:[%s11371_s1 + $0x4e8] sm:$0xff] }
 0xeb1   : > { %7752 = vmatpush1.bf16.xpose.msra.mxu1 %v9063_v63  ;;  %7710 = vmatprep.subr.bf16.mxu0 %v9046_v25  ;;  %v9206_v63 = vcombine.high %v6196_v15, %v6204_v60  ;;  %v9208_v25 = vcombine.high %v6197_v7, %v6205_v22  ;;  %v6108_v15 = vld [vmem:[%s11371_s1 + $0x460] sm:$0xff]  ;;  %v6101_v60 = vld [vmem:[%s11371_s1 + $0x428] sm:$0xff] }
 0xeb2   : > { %7753 = vmatprep.subr.bf16.mxu1 %v9048_v47  ;;  %v6180_v47 = vld [vmem:[%s11371_s1 + $0x6a0] sm:$0xff] }
 0xeb3   : > { %v9189_v19 = vcombine.low %v6180_v47, %v6188_v29 }
 0xeb8   : > { %7711 = vmatpush1.bf16.xpose.msra.mxu0 %v9045_v58  ;;  %v9207_v58 = vcombine.low %v6197_v7, %v6205_v22  ;;  %v6109_v7 = vld [vmem:[%s11371_s1 + $0x468] sm:$0xff] }
 0xeb9   : > { %7754 = vmatpush1.bf16.xpose.msra.mxu1 %v9047_v33  ;;  %7712 = vmatprep.subr.bf16.mxu0 %v9030_v24  ;;  %v9190_v33 = vcombine.high %v6180_v47, %v6188_v29  ;;  %v9192_v24 = vcombine.high %v6181_v18, %v6189_v48  ;;  %v6094_v47 = vld [vmem:[%s11371_s1 + $0x3f0] sm:$0xff]  ;;  %v6087_v29 = vld [vmem:[%s11371_s1 + $0x3b8] sm:$0xff] }
 0xeba   : > { %7755 = vmatprep.subr.bf16.mxu1 %v9032_v53  ;;  %v6164_v53 = vld [vmem:[%s11371_s1 + $0x620] sm:$0xff] }
 0xebb   : > { %v9173_v0 = vcombine.low %v6164_v53, %v6172_v39 }
 0xec0   : > { %7713 = vmatpush1.bf16.xpose.msra.mxu0 %v9029_v13  ;;  %v9191_v13 = vcombine.low %v6181_v18, %v6189_v48  ;;  %v6095_v18 = vld [vmem:[%s11371_s1 + $0x3f8] sm:$0xff]  ;;  %v5890_v48 = vpop.f32.mrf.mxu0 }
 0xec1   : > { %7756 = vmatpush1.bf16.xpose.msra.mxu1 %v9031_v57  ;;  %7714 = vmatprep.subr.bf16.mxu0 %v9014_v41  ;;  %v9174_v57 = vcombine.high %v6164_v53, %v6172_v39  ;;  %v9176_v41 = vcombine.high %v6165_v30, %v6173_v32  ;;  %v9111_v53 = vcombine.low %v6101_v60, %v6109_v7 }
 0xec2   : > { %7757 = vmatprep.subr.bf16.mxu1 %v9016_v40  ;;  %v6148_v40 = vld [vmem:[%s11371_s1 + $0x5a0] sm:$0xff] }
 0xec3   : > { %v9157_v20 = vcombine.low %v6148_v40, %v6156_v42 }
 0xec8   : > { %7715 = vmatpush1.bf16.xpose.msra.mxu0 %v9013_v51  ;;  %v9175_v51 = vcombine.low %v6165_v30, %v6173_v32  ;;  %v9100_v32 = vcombine.high %v6087_v29, %v6095_v18 }
 0xec9   : > { %7758 = vmatpush1.bf16.xpose.msra.mxu1 %v9015_v55  ;;  %7716 = vmatprep.subr.bf16.mxu0 %v8998_v36  ;;  %v9158_v55 = vcombine.high %v6148_v40, %v6156_v42  ;;  %v9160_v36 = vcombine.high %v6149_v17, %v6157_v44  ;;  %v6070_v40 = vld [vmem:[%s11371_s1 + $0x330] sm:$0xff] }
 0xeca   : > { %7759 = vmatprep.subr.bf16.mxu1 %v9000_v38  ;;  %v6132_v38 = vld [vmem:[%s11371_s1 + $0x520] sm:$0xff]  ;;  %v6078_v42 = vld [vmem:[%s11371_s1 + $0x370] sm:$0xff] }
 0xecb   : > { %v9141_v14 = vcombine.low %v6132_v38, %v6140_v27 }
 0xed0   : > { %7717 = vmatpush1.bf16.xpose.msra.mxu0 %v8997_v6  ;;  %v9159_v6 = vcombine.low %v6149_v17, %v6157_v44 }
 0xed1   : > { %7760 = vmatpush1.bf16.xpose.msra.mxu1 %v8999_v50  ;;  %7718 = vmatprep.subr.bf16.mxu0 %v8982_v61  ;;  %v9142_v50 = vcombine.high %v6132_v38, %v6140_v27  ;;  %v9144_v61 = vcombine.high %v6133_v4, %v6141_v34  ;;  %v6054_v27 = vld [vmem:[%s11371_s1 + $0x2b0] sm:$0xff] }
 0xed2   : > { %7761 = vmatprep.subr.bf16.mxu1 %v8984_v49  ;;  %v6116_v49 = vld [vmem:[%s11371_s1 + $0x4a0] sm:$0xff] }
 0xed3   : > { %v9125_v22 = vcombine.low %v6116_v49, %v6124_v52 }
 0xed8   : > { %7719 = vmatpush1.bf16.xpose.msra.mxu0 %v8981_v62  ;;  %v9143_v62 = vcombine.low %v6133_v4, %v6141_v34  ;;  %v6062_v4 = vld [vmem:[%s11371_s1 + $0x2f0] sm:$0xff]  ;;  %v6055_v34 = vld [vmem:[%s11371_s1 + $0x2b8] sm:$0xff] }
 0xed9   : > { %7762 = vmatpush1.bf16.xpose.msra.mxu1 %v8983_v43  ;;  %7720 = vmatprep.subr.bf16.mxu0 %v9222_v54  ;;  %v9126_v43 = vcombine.high %v6116_v49, %v6124_v52  ;;  %v9128_v54 = vcombine.high %v6117_v8, %v6125_v12  ;;  %v6046_v49 = vld [vmem:[%s11371_s1 + $0x270] sm:$0xff]  ;;  %v6039_v52 = vld [vmem:[%s11371_s1 + $0x238] sm:$0xff] }
 0xeda   : > { %7763 = vmatprep.subr.bf16.mxu1 %v9224_v5  ;;  %v6100_v5 = vld [vmem:[%s11371_s1 + $0x420] sm:$0xff] }
 0xee0   : > { %7721 = vmatpush2.bf16.xpose.msra.mxu0 %v9221_v46  ;;  %v9127_v46 = vcombine.low %v6117_v8, %v6125_v12  ;;  %v6047_v8 = vld [vmem:[%s11371_s1 + $0x278] sm:$0xff]  ;;  %v9065_v12 = vcombine.low %v6054_v27, %v6062_v4 }
 0xee1   : > { %7764 = vmatpush2.bf16.xpose.msra.mxu1 %v9223_v23  ;;  %7722 = vmatprep.subr.bf16.mxu0 %v9206_v63  ;;  %v9110_v23 = vcombine.high %v6100_v5, %v6108_v15  ;;  %v9112_v63 = vcombine.high %v6101_v60, %v6109_v7  ;;  %v6031_v60 = vld [vmem:[%s11371_s1 + $0x1f8] sm:$0xff] }
 0xee2   : > { %7765 = vmatprep.subr.bf16.mxu1 %v9208_v25  ;;  %v6086_v25 = vld [vmem:[%s11371_s1 + $0x3b0] sm:$0xff] }
 0xee3   : > { %v9098_v39 = vcombine.high %v6086_v25, %v6094_v47  ;;  %v9097_v44 = vcombine.low %v6086_v25, %v6094_v47  ;;  %v6014_v25 = vld [vmem:[%s11371_s1 + $0x170] sm:$0xff]  ;;  %v6007_v47 = vld [vmem:[%s11371_s1 + $0x138] sm:$0xff] }
 0xee8   : > { %7723 = vmatpush2.bf16.xpose.msra.mxu0 %v9205_v21  ;;  %v9109_v21 = vcombine.low %v6100_v5, %v6108_v15  ;;  %v6030_v5 = vld [vmem:[%s11371_s1 + $0x1f0] sm:$0xff]  ;;  %v6023_v15 = vld [vmem:[%s11371_s1 + $0x1b8] sm:$0xff] }
 0xee9   : > { %7766 = vmatpush2.bf16.xpose.msra.mxu1 %v9207_v58  ;;  %7724 = vmatprep.subr.bf16.mxu0 %v9190_v33  ;;  %v10272_v58 = vld [vmem:[%s11369_s16 + $0x8] sm:$0xff]  ;;  %s12791_s16 = sld [smem:[#allocation47_spill]] (!%p9229_p11) }
 0xeea   : > { %7767 = vmatprep.subr.bf16.mxu1 %v9192_v24  ;;  %v4287_v33 = vrot.slane %v10272_v58, %v11684_v45  ;;  %v5933_v24 = vpop.f32.mrf.mxu1  ;;  %v4295_v30 = vrot.slane %v10272_v58, %v4262_v3  ;;  %v6079_v3 = vld [vmem:[%s11371_s1 + $0x378] sm:$0xff] }
 0xef0   : > { %7725 = vmatpush2.bf16.xpose.msra.mxu0 %v9189_v19  ;;  %v5891_v19 = vadd.f32 %v5890_v48, %v4287_v33  ;;  %v9035_v48 = vcombine.low %v6023_v15, %v6031_v60 }
 0xef1   : > { %7768 = vmatpush2.bf16.xpose.msra.mxu1 %v9191_v13  ;;  %7726 = vmatprep.subr.bf16.mxu0 %v9174_v57  ;;  %v5934_v13 = vadd.f32 %v5933_v24, %v4295_v30  ;;  %v5887_v57 = vadd.f32 %v12459_v2, %v4287_v33  ;;  %v9082_v2 = vcombine.high %v6070_v40, %v6078_v42  ;;  %v5990_v33 = vld [vmem:[%s11371_s1 + $0xb0] sm:$0xff] }
 0xef2   : > { %7769 = vmatprep.subr.bf16.mxu1 %v9176_v41  ;;  %v5930_v41 = vadd.f32 %v12461_v16, %v4295_v30  ;;  %v5965_v45 = vmax.f32 %v5891_v19, 0.0  ;;  %v9084_v16 = vcombine.high %v6071_v9, %v6079_v3  ;;  %v5998_v24 = vld [vmem:[%s11371_s1 + $0xf0] sm:$0xff] }
 0xef3   : > { %v5967_v17 = vmax.f32 %v5934_v13, 0.0  ;;  %v9002_v19 = vcombine.high %v5990_v33, %v5998_v24 }
 0xef8   : > { %7727 = vmatpush2.bf16.xpose.msra.mxu0 %v9173_v0  ;;  %v5949_v0 = vmax.f32 %v5887_v57, 0.0  ;;  %v5974_v57 = vld [vmem:[%s11371_s1 + $0x30] sm:$0xff] }
 0xef9   : > { %7770 = vmatpush2.bf16.xpose.msra.mxu1 %v9175_v51  ;;  %7728 = vmatprep.subr.bf16.mxu0 %v9158_v55  ;;  %v9099_v51 = vcombine.low %v6087_v29, %v6095_v18  ;;  %v5951_v55 = vmax.f32 %v5930_v41, 0.0  ;;  %v6015_v29 = vld [vmem:[%s11371_s1 + $0x178] sm:$0xff]  ;;  %v5982_v41 = vld [vmem:[%s11371_s1 + $0x70] sm:$0xff] }
 0xefa   : > { %7771 = vmatprep.subr.bf16.mxu1 %v9160_v36  ;;  %v6237_v36 = vpack.c.bf16 %v5965_v45, %v5949_v0  ;;  %v9020_v58 = vcombine.high %v6007_v47, %v6015_v29  ;;  %v5975_v45 = vld [vmem:[%s11371_s1 + $0x38] sm:$0xff]  ;;  %v6222_v0 = vld [vmem:[%s11371_s1 + $0x7f0] sm:$0xff] }
 0xefb   : > { %v6239_v38 = vpack.c.bf16 %v5967_v17, %v5951_v55  ;;  %v6223_v55 = vld [vmem:[%s11371_s1 + $0x7f8] sm:$0xff] }
 0xf00   : > { %7729 = vmatpush2.bf16.xpose.msra.mxu0 %v9157_v20  ;;  %v6063_v20 = vld [vmem:[%s11371_s1 + $0x2f8] sm:$0xff] }
 0xf01   : > { %7772 = vmatpush2.bf16.xpose.msra.mxu1 %v9159_v6  ;;  %7730 = vmatprep.subr.bf16.mxu0 %v9142_v50  ;;  %v9081_v6 = vcombine.low %v6070_v40, %v6078_v42  ;;  %v9066_v50 = vcombine.high %v6054_v27, %v6062_v4  ;;  %v5983_v40 = vld [vmem:[%s11371_s1 + $0x78] sm:$0xff]  ;;  %v9001_v42 = vcombine.low %v5990_v33, %v5998_v24  ;;  %v6198_v27 = vld [vmem:[%s11371_s1 + $0x730] sm:$0xff] }
 0xf02   : > { %7773 = vmatprep.subr.bf16.mxu1 %v9144_v61  ;;  %v9068_v61 = vcombine.high %v6055_v34, %v6063_v20  ;;  %v6206_v4 = vld [vmem:[%s11371_s1 + $0x770] sm:$0xff] }
 0xf03   : > { %v6134_v33 = vld [vmem:[%s11371_s1 + $0x530] sm:$0xff] }
 0xf04   : > { %v6142_v24 = vld [vmem:[%s11371_s1 + $0x570] sm:$0xff] }
 0xf08   : > { %7731 = vmatpush2.bf16.xpose.msra.mxu0 %v9141_v14  ;;  %v9067_v14 = vcombine.low %v6055_v34, %v6063_v20  ;;  %v6199_v34 = vld [vmem:[%s11371_s1 + $0x738] sm:$0xff] }
 0xf09   : > { %7774 = vmatpush2.bf16.xpose.msra.mxu1 %v9143_v62  ;;  %7732 = vmatprep.subr.bf16.mxu0 %v9126_v43  ;;  %v9052_v43 = vcombine.high %v6039_v52, %v6047_v8  ;;  %v6207_v20 = vld [vmem:[%s11371_s1 + $0x778] sm:$0xff] }
 0xf0a   : > { %7775 = vmatprep.subr.bf16.mxu1 %v9128_v54  ;;  %v6022_v54 = vld [vmem:[%s11371_s1 + $0x1b0] sm:$0xff] }
 0xf0b   : > { %v9033_v18 = vcombine.low %v6022_v54, %v6030_v5 }
 0xf10   : > { %7733 = vmatpush2.bf16.xpose.msra.mxu0 %v9125_v22  ;;  %v9051_v22 = vcombine.low %v6039_v52, %v6047_v8  ;;  %v6183_v52 = vld [vmem:[%s11371_s1 + $0x6b8] sm:$0xff] }
 0xf11   : > { %7776 = vmatpush2.bf16.xpose.msra.mxu1 %v9127_v46  ;;  %7734 = vmatprep.subr.bf16.mxu0 %v9110_v23  ;;  %v9034_v46 = vcombine.high %v6022_v54, %v6030_v5  ;;  %v9036_v23 = vcombine.high %v6023_v15, %v6031_v60  ;;  %v6191_v8 = vld [vmem:[%s11371_s1 + $0x6f8] sm:$0xff]  ;;  %v6166_v54 = vld [vmem:[%s11371_s1 + $0x630] sm:$0xff] }
 0xf12   : > { %7777 = vmatprep.subr.bf16.mxu1 %v9112_v63  ;;  %v6006_v63 = vld [vmem:[%s11371_s1 + $0x130] sm:$0xff]  ;;  %v6167_v15 = vld [vmem:[%s11371_s1 + $0x638] sm:$0xff] }
 0xf13   : > { %v9017_v30 = vcombine.low %v6006_v63, %v6014_v25  ;;  %v6174_v5 = vld [vmem:[%s11371_s1 + $0x670] sm:$0xff]  ;;  %v6175_v60 = vld [vmem:[%s11371_s1 + $0x678] sm:$0xff] }
 0xf18   : > { %7735 = vmatpush2.bf16.xpose.msra.mxu0 %v9109_v21  ;;  %v9018_v21 = vcombine.high %v6006_v63, %v6014_v25  ;;  %v6150_v63 = vld [vmem:[%s11371_s1 + $0x5b0] sm:$0xff] }
 0xf19   : > { %7778 = vmatpush2.bf16.xpose.msra.mxu1 %v9111_v53  ;;  %7790 = vmatprep.subr.bf16.mxu0 %v9098_v39  ;;  %v5991_v53 = vld [vmem:[%s11371_s1 + $0xb8] sm:$0xff]  ;;  %v6158_v25 = vld [vmem:[%s11371_s1 + $0x5f0] sm:$0xff] }
 0xf1a   : > { %7833 = vmatprep.subr.bf16.mxu1 %v9100_v32  ;;  %v5999_v39 = vld [vmem:[%s11371_s1 + $0xf8] sm:$0xff]  ;;  %v9019_v32 = vcombine.low %v6007_v47, %v6015_v29 }
 0xf1b   : > { %v9004_v13 = vcombine.high %v5991_v53, %v5999_v39  ;;  %v9003_v17 = vcombine.low %v5991_v53, %v5999_v39  ;;  %v6151_v47 = vld [vmem:[%s11371_s1 + $0x5b8] sm:$0xff] }
 0xf1c   : > { %v6159_v29 = vld [vmem:[%s11371_s1 + $0x5f8] sm:$0xff] }
 0xf1d   : > { %v6135_v53 = vld [vmem:[%s11371_s1 + $0x538] sm:$0xff] }
 0xf1e   : > { %v6143_v39 = vld [vmem:[%s11371_s1 + $0x578] sm:$0xff] }
 0xf1f   : > { %7737 = vmatmul.mubr.bf16.vlgmr.msra.gmra.mxu0 %v12374_v1  ;;  %v9083_v1 = vcombine.low %v6071_v9, %v6079_v3  ;;  %v8988_v9 = vcombine.high %v5975_v45, %v5983_v40  ;;  %v6214_v3 = vld [vmem:[%s11371_s1 + $0x7b0] sm:$0xff] }
 0xf20   : > { %7780 = vmatmul.mubr.bf16.vlgmr.msra.gmra.mxu1 %v12376_v11  ;;  %7791 = vmatpush1.bf16.xpose.msra.mxu0 %v9097_v44  ;;  %v6038_v11 = vld [vmem:[%s11371_s1 + $0x230] sm:$0xff]  ;;  %v8986_v44 = vcombine.high %v5974_v57, %v5982_v41 }
 0xf21   : > { %7822 = vmatprep.mubr.bf16.mxu0 %v6237_v36  ;;  %7834 = vmatpush1.bf16.xpose.msra.mxu1 %v9099_v51  ;;  %v9050_v62 = vcombine.high %v6038_v11, %v6046_v49  ;;  %v9049_v7 = vcombine.low %v6038_v11, %v6046_v49  ;;  %v6215_v51 = vld [vmem:[%s11371_s1 + $0x7b8] sm:$0xff]  ;;  %v8987_v36 = vcombine.low %v5975_v45, %v5983_v40  ;;  %v6182_v11 = vld [vmem:[%s11371_s1 + $0x6b0] sm:$0xff] }
 0xf22   : > { %7865 = vmatprep.mubr.bf16.mxu1 %v6239_v38  ;;  %7792 = vmatprep.subr.bf16.mxu0 %v9082_v2  ;;  %v8985_v2 = vcombine.low %v5974_v57, %v5982_v41  ;;  %v9228_v38 = vcombine.high %v6215_v51, %v6223_v55  ;;  %v6190_v49 = vld [vmem:[%s11371_s1 + $0x6f0] sm:$0xff]  ;;  %v6119_v45 = vld [vmem:[%s11371_s1 + $0x4b8] sm:$0xff] }
 0xf23   : > { %7835 = vmatprep.subr.bf16.mxu1 %v9084_v16  ;;  %v9226_v16 = vcombine.high %v6214_v3, %v6222_v0  ;;  %v6118_v57 = vld [vmem:[%s11371_s1 + $0x4b0] sm:$0xff]  ;;  %v6127_v40 = vld [vmem:[%s11371_s1 + $0x4f8] sm:$0xff] }
 0xf24   : > { %v6126_v41 = vld [vmem:[%s11371_s1 + $0x4f0] sm:$0xff] }
 0xf28   : > { %7793 = vmatpush1.bf16.xpose.msra.mxu0 %v9081_v6  ;;  %v9225_v6 = vcombine.low %v6214_v3, %v6222_v0  ;;  %v6102_v3 = vld [vmem:[%s11371_s1 + $0x430] sm:$0xff] }
 0xf29   : > { %7836 = vmatpush1.bf16.xpose.msra.mxu1 %v9083_v1  ;;  %7794 = vmatprep.subr.bf16.mxu0 %v9066_v50  ;;  %v9227_v1 = vcombine.low %v6215_v51, %v6223_v55  ;;  %v9210_v50 = vcombine.high %v6198_v27, %v6206_v4  ;;  %v6110_v0 = vld [vmem:[%s11371_s1 + $0x470] sm:$0xff]  ;;  %v6103_v51 = vld [vmem:[%s11371_s1 + $0x438] sm:$0xff] }
 0xf2a   : > { %7837 = vmatprep.subr.bf16.mxu1 %v9068_v61  ;;  %v9212_v61 = vcombine.high %v6199_v34, %v6207_v20  ;;  %v6111_v55 = vld [vmem:[%s11371_s1 + $0x478] sm:$0xff] }
 0xf30   : > { %7795 = vmatpush1.bf16.xpose.msra.mxu0 %v9065_v12  ;;  %v9209_v12 = vcombine.low %v6198_v27, %v6206_v4  ;;  %v9113_v27 = vcombine.low %v6102_v3, %v6110_v0  ;;  %v9115_v4 = vcombine.low %v6103_v51, %v6111_v55 }
 0xf31   : > { %7838 = vmatpush1.bf16.xpose.msra.mxu1 %v9067_v14  ;;  %7796 = vmatprep.subr.bf16.mxu0 %v9050_v62  ;;  %v9211_v14 = vcombine.low %v6199_v34, %v6207_v20  ;;  %v9194_v62 = vcombine.high %v6182_v11, %v6190_v49  ;;  %v7566_v34 = vpop.f32.mrf.mxu0  ;;  %v7609_v20 = vpop.f32.mrf.mxu1 }
 0xf32   : > { %7839 = vmatprep.subr.bf16.mxu1 %v9052_v43  ;;  %v9196_v43 = vcombine.high %v6183_v52, %v6191_v8 }
 0xf38   : > { %7797 = vmatpush1.bf16.xpose.msra.mxu0 %v9049_v7  ;;  %v9193_v7 = vcombine.low %v6182_v11, %v6190_v49 }
 0xf39   : > { %7840 = vmatpush1.bf16.xpose.msra.mxu1 %v9051_v22  ;;  %7798 = vmatprep.subr.bf16.mxu0 %v9034_v46  ;;  %v9195_v22 = vcombine.low %v6183_v52, %v6191_v8  ;;  %v9178_v46 = vcombine.high %v6166_v54, %v6174_v5 }
 0xf3a   : > { %7841 = vmatprep.subr.bf16.mxu1 %v9036_v23  ;;  %v9180_v23 = vcombine.high %v6167_v15, %v6175_v60 }
 0xf40   : > { %7799 = vmatpush1.bf16.xpose.msra.mxu0 %v9033_v18  ;;  %v9177_v18 = vcombine.low %v6166_v54, %v6174_v5 }
 0xf41   : > { %7842 = vmatpush1.bf16.xpose.msra.mxu1 %v9035_v48  ;;  %7800 = vmatprep.subr.bf16.mxu0 %v9018_v21  ;;  %v9179_v48 = vcombine.low %v6167_v15, %v6175_v60  ;;  %v9162_v21 = vcombine.high %v6150_v63, %v6158_v25 }
 0xf42   : > { %7843 = vmatprep.subr.bf16.mxu1 %v9020_v58  ;;  %v9164_v58 = vcombine.high %v6151_v47, %v6159_v29 }
 0xf48   : > { %7801 = vmatpush1.bf16.xpose.msra.mxu0 %v9017_v30  ;;  %v9161_v30 = vcombine.low %v6150_v63, %v6158_v25 }
 0xf49   : > { %7844 = vmatpush1.bf16.xpose.msra.mxu1 %v9019_v32  ;;  %7802 = vmatprep.subr.bf16.mxu0 %v9002_v19  ;;  %v9163_v32 = vcombine.low %v6151_v47, %v6159_v29  ;;  %v9146_v19 = vcombine.high %v6134_v33, %v6142_v24 }
 0xf4a   : > { %7845 = vmatprep.subr.bf16.mxu1 %v9004_v13  ;;  %v9148_v13 = vcombine.high %v6135_v53, %v6143_v39 }
 0xf50   : > { %7803 = vmatpush1.bf16.xpose.msra.mxu0 %v9001_v42  ;;  %v9145_v42 = vcombine.low %v6134_v33, %v6142_v24 }
 0xf51   : > { %7846 = vmatpush1.bf16.xpose.msra.mxu1 %v9003_v17  ;;  %7804 = vmatprep.subr.bf16.mxu0 %v8986_v44  ;;  %v9147_v17 = vcombine.low %v6135_v53, %v6143_v39  ;;  %v9130_v44 = vcombine.high %v6118_v57, %v6126_v41 }
 0xf52   : > { %7847 = vmatprep.subr.bf16.mxu1 %v8988_v9  ;;  %v9132_v9 = vcombine.high %v6119_v45, %v6127_v40 }
 0xf58   : > { %7805 = vmatpush1.bf16.xpose.msra.mxu0 %v8985_v2  ;;  %v9129_v2 = vcombine.low %v6118_v57, %v6126_v41 }
 0xf59   : > { %7848 = vmatpush1.bf16.xpose.msra.mxu1 %v8987_v36  ;;  %7806 = vmatprep.subr.bf16.mxu0 %v9226_v16  ;;  %v9131_v36 = vcombine.low %v6119_v45, %v6127_v40  ;;  %v9114_v16 = vcombine.high %v6102_v3, %v6110_v0 }
 0xf5a   : > { %7849 = vmatprep.subr.bf16.mxu1 %v9228_v38  ;;  %v9116_v38 = vcombine.high %v6103_v51, %v6111_v55 }
 0xf60   : > { %7807 = vmatpush2.bf16.xpose.msra.mxu0 %v9225_v6  ;;  %v7568_v6 = vpop.f32.mrf.mxu0 }
 0xf61   : > { %7850 = vmatpush2.bf16.xpose.msra.mxu1 %v9227_v1  ;;  %7808 = vmatprep.subr.bf16.mxu0 %v9210_v50  ;;  %v7611_v1 = vpop.f32.mrf.mxu1 }
 0xf62   : > { %7851 = vmatprep.subr.bf16.mxu1 %v9212_v61  ;;  %v7570_v50 = vpop.f32.mrf.mxu0 }
 0xf63   : > { %v7613_v61 = vpop.f32.mrf.mxu1 }
 0xf64   : > { %v7572_v11 = vpop.f32.mrf.mxu0 }
 0xf65   : > { %v7615_v49 = vpop.f32.mrf.mxu1 }
 0xf66   : > { %v7652_v52 = vpop.f32.mrf.mxu0 }
 0xf67   : > { %v7695_v8 = vpop.f32.mrf.mxu1 }
 0xf68   : > { %7809 = vmatpush2.bf16.xpose.msra.mxu0 %v9209_v12  ;;  %v6240_v12 = vld [vmem:[%s920_s3] sm:$0x3] }
 0xf69   : > { %7852 = vmatpush2.bf16.xpose.msra.mxu1 %v9211_v14  ;;  %7810 = vmatprep.subr.bf16.mxu0 %v9194_v62  ;;  %v7654_v14 = vpop.f32.mrf.mxu0  ;;  %v7697_v62 = vpop.f32.mrf.mxu1 }
 0xf6a   : > { %7853 = vmatprep.subr.bf16.mxu1 %v9196_v43  ;;  %v6245_v43 = vrot.slane %v6240_v12, %v11501_v10 }
 0xf6b   : > { %v7656_v54 = vpop.f32.mrf.mxu0 }
 0xf6c   : > { %v7567_v5 = vadd.f32 %v7566_v34, %v6245_v43 }
 0xf6d   : > { %v7658_v15 = vpop.f32.mrf.mxu0 }
 0xf70   : > { %7811 = vmatpush2.bf16.xpose.msra.mxu0 %v9193_v7 }
 0xf71   : > { %7854 = vmatpush2.bf16.xpose.msra.mxu1 %v9195_v22  ;;  %7812 = vmatprep.subr.bf16.mxu0 %v9178_v46  ;;  %v7610_v46 = vadd.f32 %v7609_v20, %v7567_v5 }
 0xf72   : > { %7855 = vmatprep.subr.bf16.mxu1 %v9180_v23  ;;  %v7571_v23 = vadd.f32 %v7570_v50, %v6245_v43 }
 0xf73   : > { %v7653_v29 = vadd.f32 %v7652_v52, %v7610_v46 }
 0xf75   : > { %v7696_v24 = vadd.f32 %v7695_v8, %v7653_v29 }
 0xf78   : > { %7813 = vmatpush2.bf16.xpose.msra.mxu0 %v9177_v18 }
 0xf79   : > { %7856 = vmatpush2.bf16.xpose.msra.mxu1 %v9179_v48  ;;  %7814 = vmatprep.subr.bf16.mxu0 %v9162_v21  ;;  %v7614_v48 = vadd.f32 %v7613_v61, %v7571_v23 }
 0xf7a   : > { %7857 = vmatprep.subr.bf16.mxu1 %v9164_v58 }
 0xf7b   : > { %v7657_v53 = vadd.f32 %v7656_v54, %v7614_v48 }
 0xf80   : > { %7815 = vmatpush2.bf16.xpose.msra.mxu0 %v9161_v30 }
 0xf81   : > { %7858 = vmatpush2.bf16.xpose.msra.mxu1 %v9163_v32  ;;  %7816 = vmatprep.subr.bf16.mxu0 %v9146_v19 }
 0xf82   : > { %7859 = vmatprep.subr.bf16.mxu1 %v9148_v13 }
 0xf88   : > { %7817 = vmatpush2.bf16.xpose.msra.mxu0 %v9145_v42 }
 0xf89   : > { %7860 = vmatpush2.bf16.xpose.msra.mxu1 %v9147_v17  ;;  %7818 = vmatprep.subr.bf16.mxu0 %v9130_v44 }
 0xf8a   : > { %7861 = vmatprep.subr.bf16.mxu1 %v9132_v9 }
 0xf90   : > { %7819 = vmatpush2.bf16.xpose.msra.mxu0 %v9129_v2 }
 0xf91   : > { %7862 = vmatpush2.bf16.xpose.msra.mxu1 %v9131_v36  ;;  %7820 = vmatprep.subr.bf16.mxu0 %v9114_v16 }
 0xf92   : > { %7863 = vmatprep.subr.bf16.mxu1 %v9116_v38 }
 0xf98   : > { %7821 = vmatpush2.bf16.xpose.msra.mxu0 %v9113_v27 }
 0xf99   : > { %7864 = vmatpush2.bf16.xpose.msra.mxu1 %v9115_v4 }
 0xf9f   : > { %7823 = vmatmul.mubr.bf16.vlgmr.msra.gmra.mxu0 %v12467_v59  ;;  %v6249_v59 = vrot.slane %v6240_v12, %v11531_v28 }
 0xfa0   : > { %7866 = vmatmul.mubr.bf16.vlgmr.msra.gmra.mxu1 %v12469_v35  ;;  %v7699_v35 = vpop.f32.mrf.mxu1 }
 0xfa1   : > { %v7569_v60 = vadd.f32 %v7568_v6, %v6249_v59  ;;  %v7573_v47 = vadd.f32 %v7572_v11, %v6249_v59  ;;  %v7700_v57 = vadd.f32 %v7699_v35, %v7657_v53 }
 0xfa2   : > { %v7701_v7 = vpop.f32.mrf.mxu1 }
 0xfa3   : > { %v7612_v25 = vadd.f32 %v7611_v1, %v7569_v60  ;;  %v7616_v33 = vadd.f32 %v7615_v49, %v7573_v47 }
 0xfa5   : > { %v7655_v21 = vadd.f32 %v7654_v14, %v7612_v25  ;;  %v7659_v32 = vadd.f32 %v7658_v15, %v7616_v33  ;;  %v7881_v33 = vld [vmem:[%s938_s7] sm:$0x3] }
 0xfa7   : > { %v7698_v30 = vadd.f32 %v7697_v62, %v7655_v21  ;;  %v7702_v40 = vadd.f32 %v7701_v7, %v7659_v32  ;;  %v7937_v32 = vrot.slane %v7881_v33, %v11531_v28 }
 0xfdf   : > { %v7738_v22 = vpop.f32.mrf.mxu0 }
 0xfe0   : > { %v7781_v63 = vpop.f32.mrf.mxu1  ;;  %v7739_v19 = vadd.f32 %v7738_v22, %v7696_v24 }
 0xfe1   : > { %v7740_v18 = vpop.f32.mrf.mxu0 }
 0xfe2   : > { %v7783_v58 = vpop.f32.mrf.mxu1  ;;  %v7741_v41 = vadd.f32 %v7740_v18, %v7698_v30  ;;  %v7782_v42 = vadd.f32 %v7781_v63, %v7739_v19  ;;  %v7933_v30 = vrot.slane %v7881_v33, %v11501_v10 }
 0xfe3   : > { %v7742_v39 = vpop.f32.mrf.mxu0 }
 0xfe4   : > { %v7785_v13 = vpop.f32.mrf.mxu1  ;;  %v7743_v17 = vadd.f32 %v7742_v39, %v7700_v57  ;;  %v7784_v3 = vadd.f32 %v7783_v58, %v7741_v41  ;;  %v7880_v58 = vld [vmem:[%s929_s0] sm:$0x3] }
 0xfe5   : > { %v7744_v45 = vpop.f32.mrf.mxu0  ;;  %v7918_v24 = vrot.slane %v7880_v58, %v11501_v10  ;;  %v7922_v53 = vrot.slane %v7880_v58, %v11531_v28 }
 0xfe6   : > { %v7787_v44 = vpop.f32.mrf.mxu1  ;;  %v7745_v0 = vadd.f32 %v7744_v45, %v7702_v40  ;;  %v7786_v36 = vadd.f32 %v7785_v13, %v7743_v17 }
 0xfe8   : > { %v7788_v34 = vadd.f32 %v7787_v44, %v7745_v0 }
0x105f   : > { %v7824_v9 = vpop.f32.mrf.mxu0 }
0x1060   : > { %v7825_v51 = vadd.f32 %v7824_v9, %v7782_v42  ;;  %v7867_v55 = vpop.f32.mrf.mxu1 }
0x1061   : > { %v7826_v2 = vpop.f32.mrf.mxu0 }
0x1062   : > { %v7868_v16 = vadd.f32 %v7867_v55, %v7825_v51  ;;  %v7827_v38 = vadd.f32 %v7826_v2, %v7784_v3  ;;  %v7869_v27 = vpop.f32.mrf.mxu1 }
0x1063   : > { %v7828_v4 = vpop.f32.mrf.mxu0 }
0x1064   : > { %v7870_v20 = vadd.f32 %v7869_v27, %v7827_v38  ;;  %v7829_v6 = vadd.f32 %v7828_v4, %v7786_v36  ;;  %v7871_v1 = vpop.f32.mrf.mxu1  ;;  %v7876_v61 = vadd.f32 %v7868_v16, %v12052_v26 }
0x1065   : > { %v7830_v50 = vpop.f32.mrf.mxu0 }
0x1066   : > { %v7877_v11 = vadd.f32 %v7870_v20, %v12054_v37  ;;  %v7872_v49 = vadd.f32 %v7871_v1, %v7829_v6  ;;  %v7831_v52 = vadd.f32 %v7830_v50, %v7788_v34  ;;  %v7873_v8 = vpop.f32.mrf.mxu1 }
0x1068   : > { %v7874_v12 = vadd.f32 %v7873_v8, %v7831_v52  ;;  %v7882_v14 = vadd.f32 %v7877_v11, %v7876_v61  ;;  %v7878_v62 = vadd.f32 %v7872_v49, %v12056_v31 }
0x106a   : > { %v7879_v43 = vadd.f32 %v7874_v12, %v12058_v56  ;;  %7883 = vadd.xlane.f32.xlu1 %v7882_v14 }
0x106c   : > { %v7885_v54 = vadd.f32 %v7879_v43, %v7878_v62 }
0x106e   : > { %7886 = vadd.xlane.f32.xlu0 %v7885_v54 }
0x10f3   : > { %v7884_v59 = vpop.xlane.xlu1 %7883 }
0x10f4   : > { %v7888_v35 = vmul.f32 0.00390625, %v7884_v59 }
0x10f6   : > { %v7890_v5 = vsub.f32 %v7876_v61, %v7888_v35  ;;  %v7891_v15 = vsub.f32 %v7877_v11, %v7888_v35 }
0x10f7   : > { %v7887_v60 = vpop.xlane.xlu0 %7886 }
0x10f8   : > { %v7889_v26 = vmul.f32 0.00390625, %v7887_v60  ;;  %v7894_v7 = vmul.f32 %v7890_v5, %v7890_v5  ;;  %v7895_v37 = vmul.f32 %v7891_v15, %v7891_v15 }
0x10fa   : > { %v7892_v22 = vsub.f32 %v7878_v62, %v7889_v26  ;;  %v7893_v46 = vsub.f32 %v7879_v43, %v7889_v26  ;;  %v7898_v23 = vadd.f32 %v7895_v37, %v7894_v7 }
0x10fc   : > { %7899 = vadd.xlane.f32.xlu1 %v7898_v23  ;;  %v7896_v31 = vmul.f32 %v7892_v22, %v7892_v22  ;;  %v7897_v63 = vmul.f32 %v7893_v46, %v7893_v46 }
0x10fe   : > { %v7901_v56 = vadd.f32 %v7897_v63, %v7896_v31 }
0x1100   : > { %7902 = vadd.xlane.f32.xlu0 %v7901_v56 }
0x1185   : > { %v7900_v25 = vpop.xlane.xlu1 %7899 }
0x1186   : > { %v7904_v47 = vmul.f32 0.00390625, %v7900_v25 }
0x1188   : > { %v7906_v29 = vadd.f32 1e-05, %v7904_v47 }
0x1189   : > { %v7903_v18 = vpop.xlane.xlu0 %7902 }
0x118a   : > { %10264 = vrsqrt.f32 %v7906_v29  ;;  %v7905_v48 = vmul.f32 0.00390625, %v7903_v18 }
0x118c   : > { %v7907_v21 = vadd.f32 1e-05, %v7905_v48 }
0x118e   : > { %10266 = vrsqrt.f32 %v7907_v21 }
0x1197   : > { %v10265_v39 = vpop.eup %10264 }
0x1198   : > { %v7910_v19 = vmul.f32 %v10265_v39, %v7890_v5  ;;  %v7911_v13 = vmul.f32 %v10265_v39, %v7891_v15 }
0x119a   : > { %v7925_v57 = vmul.f32 %v7918_v24, %v7910_v19  ;;  %v7926_v41 = vmul.f32 %v7922_v53, %v7911_v13 }
0x119b   : > { %v10267_v45 = vpop.eup %10266 }
0x119c   : > { %v7940_v40 = vadd.f32 %v7933_v30, %v7925_v57  ;;  %v7941_v42 = vadd.f32 %v7937_v32, %v7926_v41  ;;  %v7912_v17 = vmul.f32 %v10267_v45, %v7892_v22  ;;  %v7913_v44 = vmul.f32 %v10267_v45, %v7893_v46 }
0x119e   : > { %7944 = vst [vmem:[#allocation2 + $0x10] sm:$0xff] %v7940_v40  ;;  %7945 = vst [vmem:[#allocation2] sm:$0xff] %v7941_v42  ;;  %v7927_v9 = vmul.f32 %v7918_v24, %v7912_v17  ;;  %v7928_v3 = vmul.f32 %v7922_v53, %v7913_v44  ;;  %7951 = sbr.rel (%p9229_p11) target bundleno = 4916 (0x1334), region = 168 }
0x11a0   : > { %v7942_v0 = vadd.f32 %v7933_v30, %v7927_v9  ;;  %v7943_v51 = vadd.f32 %v7937_v32, %v7928_v3 }
0x11a2   : > { %7946 = vst [vmem:[#allocation2 + $0x18] sm:$0xff] %v7942_v0  ;;  %7947 = vst [vmem:[#allocation2 + $0x8] sm:$0xff] %v7943_v51 }
0x11a3   : > { %7984 = vmatprep.subr.mxu0 %v7943_v51  ;;  %v7952_v10 = vld [vmem:[%s12790_s19] sm:$0x3]  ;;  %v10813_v28 = vmov 0.0   ;;  %v10273_v55 = vld [vmem:[#allocation20 + $0x74] ss:$8 sps:$4 sm:$0xff]  }
0x11a4   : > { %7985 = vmatpush1.msra.mxu0 %v7942_v0  ;;  %8020 = vmatprep.mubr.f32.mxu0 %v10813_v28  ;;  %v10275_v2 = vld [vmem:[#allocation20 + $0x70] ss:$8 sps:$4 sm:$0xff]   ;;  %v10276_v36 = vld [vmem:[#allocation20 + $0x64] ss:$8 sps:$4 sm:$0xff]   ;;  %v10278_v16 = vld [vmem:[#allocation20 + $0x60] ss:$8 sps:$4 sm:$0xff]  }
0x11a5   : > { %7986 = vmatprep.subr.mxu0 %v7941_v42  ;;  %8132 = vmatprep.subr.bf16.mxu1 %v10273_v55  ;;  %v10279_v38 = vld [vmem:[#allocation20 + $0x54] ss:$8 sps:$4 sm:$0xff]   ;;  %v10281_v27 = vld [vmem:[#allocation20 + $0x50] ss:$8 sps:$4 sm:$0xff]   ;;  %v10282_v4 = vld [vmem:[#allocation20 + $0x44] ss:$8 sps:$4 sm:$0xff]  }
0x11a6   : > { %7987 = vmatpush1.msra.mxu0 %v7940_v40  ;;  %8133 = vmatpush1.bf16.xpose.msra.mxu1 %v10275_v2  ;;  %v10284_v34 = vld [vmem:[#allocation20 + $0x40] ss:$8 sps:$4 sm:$0xff]   ;;  %v10285_v20 = vld [vmem:[#allocation20 + $0x34] ss:$8 sps:$4 sm:$0xff]   ;;  %v10287_v6 = vld [vmem:[#allocation20 + $0x30] ss:$8 sps:$4 sm:$0xff]  }
0x11a7   : > { %9230 = vmatmul.mubr.msk.f32.vlgmr.msra.gmra.mxu0 %vm2083_vm1, %v7952_v10  ;;  %8134 = vmatprep.subr.bf16.mxu1 %v10276_v36  ;;  %v10288_v1 = vld [vmem:[#allocation20 + $0x24] ss:$8 sps:$4 sm:$0xff]   ;;  %v10290_v50 = vld [vmem:[#allocation20 + $0x20] ss:$8 sps:$4 sm:$0xff]   ;;  %v10291_v61 = vld [vmem:[#allocation20 + $0x14] ss:$8 sps:$4 sm:$0xff]  }
0x11a8   : > { %v10293_v11 = vld [vmem:[#allocation20 + $0x10] ss:$8 sps:$4 sm:$0xff]   ;;  %v10294_v49 = vld [vmem:[#allocation20 + $0x4] ss:$8 sps:$4 sm:$0xff]   ;;  %v10296_v52 = vld [vmem:[#allocation20] ss:$8 sps:$4 sm:$0xff]  }
0x11a9   : > { %v9231_v43 = vld [vmem:[#allocation21] ss:$0 sm:$0xff] }
0x11ae   : > { %8135 = vmatpush1.bf16.xpose.msra.mxu1 %v10278_v16 }
0x11af   : > { %8136 = vmatprep.subr.bf16.mxu1 %v10279_v38 }
0x11b6   : > { %8137 = vmatpush1.bf16.xpose.msra.mxu1 %v10281_v27 }
0x11b7   : > { %8138 = vmatprep.subr.bf16.mxu1 %v10282_v4 }
0x11be   : > { %8139 = vmatpush1.bf16.xpose.msra.mxu1 %v10284_v34 }
0x11bf   : > { %8140 = vmatprep.subr.bf16.mxu1 %v10285_v20 }
0x11c6   : > { %8141 = vmatpush1.bf16.xpose.msra.mxu1 %v10287_v6 }
0x11c7   : > { %8142 = vmatprep.subr.bf16.mxu1 %v10288_v1 }
0x11ce   : > { %8143 = vmatpush1.bf16.xpose.msra.mxu1 %v10290_v50 }
0x11cf   : > { %8144 = vmatprep.subr.bf16.mxu1 %v10291_v61 }
0x11d6   : > { %8145 = vmatpush1.bf16.xpose.msra.mxu1 %v10293_v11 }
0x11d7   : > { %8146 = vmatprep.subr.bf16.mxu1 %v10294_v49 }
0x11de   : > { %8147 = vmatpush1.bf16.xpose.msra.mxu1 %v10296_v52 }
0x1267   : > { %v8022_v8 = vpop.f32.mrf.mxu0 }
0x1268   : > { %v8043_v62 = vpack.c.bf16 %v8022_v8, %v8022_v8 }
0x1269   : > { %v8024_v12 = vpop.f32.mrf.mxu0 }
0x126a   : > { %v8044_v14 = vpack.c.bf16 %v8024_v12, %v8024_v12 }
0x126c   : > { %8164 = vmatprep.mubr.bf16.mxu1 %v8044_v14 }
0x126d   : > { %8165 = vmatmul.mubr.bf16.vlgmr.msra.gmra.mxu1 %v8043_v62 }
0x132d   : > { %v8166_v54 = vpop.f32.mrf.mxu1 }
0x132e   : > { %v8167_v59 = vadd.f32 %v9231_v43, %v8166_v54 }
0x132f   : > { %v8168_v35 = vpop.f32.mrf.mxu1 }
0x1330   : > { %8172 = vst [vmem:[%s12791_s16] sm:$0x3] %v8167_v59 }
0x1331   : > { %v8169_v5 = vpop.f32.mrf.mxu1 }
0x1333   : > { %v8170_v15 = vpop.f32.mrf.mxu1 }
0x1334 PF: > { %s12792_s21 = sld [smem:[#allocation31_spill]] }
0x1335   : > { %s12793_s0 = sld [smem:[#allocation28_spill]] }
0x1336   : > { %s12794_s30 = sld [smem:[#allocation29_spill]] }
0x1337   : > { %s12795_s20 = sld [smem:[#allocation32_spill]] }
0x133a   : > { %p29_p4 = scmp.ge.s32.totalorder %s12792_s21, 6  }
0x133c   :  { %31 = sbr.rel (!%p29_p4) target bundleno = 18 (0x12), region = 276 }
0x1341   :  { %8184 = vsyncpa [#allocation5], 1 }
0x1342   :  { %8186 = vsyncpa [#allocation5 + $0x1], 1 }
0x1343   :  { %8187 = vsyncpa [#allocation7], 1 }
0x1344   :  { %8188 = vsyncpa [#allocation22], 1 }

</bundles_post_ra>
